<compile_context>
chip_gen: v5e
topology: v5e:2x2
jax: 0.10.0
libtpu: 0.0.40
codegen_flags: <defaults>
</compile_context>

<pallas_src>
import functools

import numpy as np

import jax
import jax.numpy as jnp
from jax import lax
from jax.experimental import pallas as pl
from jax.experimental.pallas import tpu as pltpu

BN_EPS = 1e-5
OUT_LANES = 128   # lane-dense width for the final (B, 7) output


# ----------------------------------------------------------------------------
# The fused Pallas kernel (one grid step == BT batch elements)
#
# Flat slab layout: every layer's activation is a 2-D (BT*slab, C) array where
# each batch element owns `slab` consecutive rows: [zero halo | data | zeros].
# Slab lengths are chosen so a conv/pool tap is a UNIFORM row shift (stride-1)
# or a uniform stride-2 row shift across the whole flat array:
#   conv1 in/out slab  S0 = W + 8      (data at rows 3..W+2 in, 1..W out)
#   pool-out / rb1 slab S2 = Wh + 4    (data at rows 1..Wh)       S0 = 2*S2
#   rb2 slab            S5 = Wq + 2    (data at rows 1..Wq)       S2 = 2*S5
# Rows that would mix two batch elements ("garbage" rows at slab boundaries)
# are zeroed with a precomputed interior mask.
# ----------------------------------------------------------------------------
def _fused_forward_kernel(
    x_ref,                          # (BT, W, 2)  channels-last input tile
    ma_ref, mb_ref, mc_ref,         # interior masks (R1,1), (R2,1), (R5,1)
    w1_ref, b1_ref,                 # conv1+BN folded : (7, 2, 32),   (1, 32)
    w2_ref, b2_ref,                 # rb1 conv1       : (3, 32, 64),  (1, 64)
    w3_ref, b3_ref,                 # rb1 conv2       : (3, 64, 64),  (1, 64)
    w4_ref, b4_ref,                 # rb2 conv1 (s=2) : (3, 64, 128), (1, 128)
    w5_ref, b5_ref,                 # rb2 conv2       : (3, 128,128), (1, 128)
    f1w_ref, f1b_ref,               # (Wq, 128, 64), (1, 64)   (flatten folded)
    f2w_ref, f2b_ref,               # (64, 128), (1, 128)      (lane padded)
    o_ref,                          # (BT, 128)
    x0_ref, y1_ref, y4_ref, y6_ref, # VMEM scratch (stride-2 / gather staging)
    *, W, BT,
):
    f32 = jnp.float32
    Wh, Wq = W // 2, W // 4
    S0, S2, S5 = W + 8, Wh + 4, Wq + 2
    R1 = (BT - 1) * S0 + W          # candidate rows, conv1
    R2 = (BT - 1) * S2 + Wh         # candidate rows, pool / resblock1
    R5 = (BT - 1) * S5 + Wq         # candidate rows, resblock2
    ma, mb, mc = ma_ref[...], mb_ref[...], mc_ref[...]

    # ---- stage the input into flat per-batch padded slabs --------------------
    # Tiny (2-lane) buffer; memset every step so the kernel is correct even
    # when the grid is sharded across TensorCores (no program_id==0 init).
    x0_ref[...] = jnp.zeros((BT * S0, 2), f32)
    for b in range(BT):                                    # static offsets
        x0_ref[pl.ds(b * S0 + 3, W), :] = x_ref[b]

    # ---- conv1 (K=7, pad=3) + folded BN + ReLU --------------------------------
    acc = jnp.zeros((R1, 32), f32)
    for k in range(7):
        acc = acc + jnp.dot(x0_ref[pl.ds(k, R1), :], w1_ref[k],
                            preferred_element_type=f32)
    y = jnp.maximum(acc + b1_ref[...], 0.0) * ma           # (R1, 32)

    # Stage for the pool's stride-2 reads.  Slab-boundary rows were masked to
    # zero above; only row 0 (slab 0's left halo) needs an explicit zero.
    y1_ref[0:1, :] = jnp.zeros((1, 32), f32)
    y1_ref[pl.ds(1, R1), :] = y

    # ---- MaxPool1d(3, stride=2, padding=1) ------------------------------------
    # y >= 0 (post-ReLU), so a zero halo is equivalent to PyTorch's -inf pad.
    p = jnp.maximum(jnp.maximum(y1_ref[pl.ds(0, R2, 2), :],
                                y1_ref[pl.ds(1, R2, 2), :]),
                    y1_ref[pl.ds(2, R2, 2), :]) * mb       # (R2, 32)
    p_full = jnp.concatenate(
        [jnp.zeros((1, 32), f32), p, jnp.zeros((3, 32), f32)], axis=0)

    def conv3_relu(x_full, w_ref, b_ref, rows, cout, mask):
        """K=3, pad=1, stride-1 conv(+folded BN)+ReLU on a flat slab value."""
        a = jnp.zeros((rows, cout), f32)
        for k in range(3):
            a = a + jnp.dot(x_full[k:k + rows, :], w_ref[k],
                            preferred_element_type=f32)
        out = jnp.maximum(a + b_ref[...], 0.0)
        return out * mask if mask is not None else out

    # ---- resblock1: conv-BN-ReLU, conv-BN-ReLU (all value-level) --------------
    y = conv3_relu(p_full, w2_ref, b2_ref, R2, 64, mb)
    y_full = jnp.concatenate(
        [jnp.zeros((1, 64), f32), y, jnp.zeros((3, 64), f32)], axis=0)
    y = conv3_relu(y_full, w3_ref, b3_ref, R2, 64, mb)

    # Stage for resblock2's stride-2 conv reads (same halo argument as y1_ref).
    y4_ref[0:1, :] = jnp.zeros((1, 64), f32)
    y4_ref[pl.ds(1, R2), :] = y

    # ---- resblock2: stride-2 conv, then stride-1 conv --------------------------
    acc = jnp.zeros((R5, 128), f32)
    for k in range(3):
        acc = acc + jnp.dot(y4_ref[pl.ds(k, R5, 2), :], w4_ref[k],
                            preferred_element_type=f32)
    y = jnp.maximum(acc + b4_ref[...], 0.0) * mc           # (R5, 128)
    y_full = jnp.concatenate(
        [jnp.zeros((1, 128), f32), y, jnp.zeros((1, 128), f32)], axis=0)
    h = conv3_relu(y_full, w5_ref, b5_ref, R5, 128, None)  # (R5, 128)

    # Final features, staged so fc1 can gather one position per batch element.
    y6_ref[pl.ds(1, R5), :] = h

    # TODO(synk): Dropout(0.5) layers are identity in eval mode; no train path.

    # ---- fc1 + ReLU (channel-major flatten folded into fc1's weight) ----------
    acc = jnp.zeros((BT, 64), f32)
    for l in range(Wq):
        rows = y6_ref[pl.ds(1 + l, BT, S5), :]             # (BT, 128)
        acc = acc + jnp.dot(rows, f1w_ref[l], preferred_element_type=f32)
    z = jnp.maximum(acc + f1b_ref[...], 0.0)               # (BT, 64)

    # ---- fc2 + sigmoid (exact; lane-dense 128-wide final store) ---------------
    z = jnp.dot(z, f2w_ref[...], preferred_element_type=f32) + f2b_ref[...]
    o_ref[...] = 1.0 / (1.0 + jnp.exp(-z))


# ----------------------------------------------------------------------------
# Wrapper: one pallas_call for the whole network
# ----------------------------------------------------------------------------
def _interior_mask(bt, slab, lout):
    """(rows, 1) f32 mask: 1 on real data rows, 0 on slab-boundary rows."""
    rows = (bt - 1) * slab + lout
    j = np.arange(rows) % slab
    return jnp.asarray(j < lout, dtype=jnp.float32).reshape(rows, 1)


def step_counter_cnn_forward(kp, x, *, channels_last=False, batch_tile=None):
    """x: (B, 2, window_size) as in PyTorch (or (B, W, 2) if channels_last).
    Returns (B, 7)."""
    if channels_last:
        B, W, C = x.shape
        xcl = x
    else:
        B, C, W = x.shape
        # Small HBM->HBM transpose; pass channels_last=True to skip it.
        xcl = jnp.transpose(x, (0, 2, 1))
    assert C == 2 and W % 4 == 0
    Wh, Wq = W // 2, W // 4

    if batch_tile is None:
        # Amortise per-step overhead, but keep grid length >= 2 when possible
        # so both v7x TensorCores get work.
        batch_tile = max(1, min(8, -(-B // 2)))
    BT = batch_tile
    G = -(-B // BT)
    Bp = G * BT
    if Bp != B:
        xcl = jnp.pad(xcl, ((0, Bp - B), (0, 0), (0, 0)))

    S0, S2, S5 = W + 8, Wh + 4, Wq + 2
    R1 = (BT - 1) * S0 + W
    R2 = (BT - 1) * S2 + Wh
    R5 = (BT - 1) * S5 + Wq
    ma = _interior_mask(BT, S0, W)
    mb = _interior_mask(BT, S2, Wh)
    mc = _interior_mask(BT, S5, Wq)

    def inv(shape):                     # grid-invariant (weights / masks)
        return pl.BlockSpec(shape, lambda g, _n=len(shape): (0,) * _n)

    grid_spec = pltpu.PrefetchScalarGridSpec(
        num_scalar_prefetch=0,
        grid=(G,),
        in_specs=[
            pl.BlockSpec((BT, W, 2), lambda g: (g, 0, 0)),
            inv((R1, 1)), inv((R2, 1)), inv((R5, 1)),
            inv((7, 2, 32)),    inv((1, 32)),
            inv((3, 32, 64)),   inv((1, 64)),
            inv((3, 64, 64)),   inv((1, 64)),
            inv((3, 64, 128)),  inv((1, 128)),
            inv((3, 128, 128)), inv((1, 128)),
            inv((Wq, 128, 64)), inv((1, 64)),
            inv((64, OUT_LANES)), inv((1, OUT_LANES)),
        ],
        out_specs=pl.BlockSpec((None, BT, OUT_LANES), lambda g: (g, 0, 0)),
        scratch_shapes=[
            pltpu.VMEM((BT * S0, 2), jnp.float32),     # padded conv1 input
            pltpu.VMEM((BT * S0, 32), jnp.float32),    # conv1 out (pool reads)
            pltpu.VMEM((BT * S2, 64), jnp.float32),    # rb1c2 out (s=2 reads)
            pltpu.VMEM((BT * S5, 128), jnp.float32),   # rb2c2 out (fc1 gather)
        ],
    )

    # NOTE: for large window sizes, raise vmem_limit_bytes in CompilerParams
    # and consider pipeline_mode=pl.Buffered(1) / bf16 for the fc1 weight.
    out = pl.pallas_call(
        functools.partial(_fused_forward_kernel, W=W, BT=BT),
        out_shape=jax.ShapeDtypeStruct((G, BT, OUT_LANES), jnp.float32),
        grid_spec=grid_spec,
        compiler_params=pltpu.CompilerParams(
            dimension_semantics=("parallel",)),
    )(xcl, ma, mb, mc,
      kp["w1"], kp["b1"], kp["w2"], kp["b2"], kp["w3"], kp["b3"],
      kp["w4"], kp["b4"], kp["w5"], kp["b5"],
      kp["fc1_w"], kp["fc1_b"], kp["fc2_w"], kp["fc2_b"])
    return out.reshape(Bp, OUT_LANES)[:B, :7]


# ----------------------------------------------------------------------------
# Parameters: raw PyTorch-style params + preprocessing into kernel layouts
# ----------------------------------------------------------------------------
def init_params(key, window_size):
    """Raw PyTorch-style parameters (conv OIW, BN stats, linear (out,in))."""
    final_length = window_size // 4
    keys = jax.random.split(key, 12)

    def conv_p(k, cout, cin, ksz):
        k1, k2 = jax.random.split(k)
        w = 0.1 * jax.random.normal(k1, (cout, cin, ksz), jnp.float32)
        b = 0.05 * jax.random.normal(k2, (cout,), jnp.float32)
        return w, b

    def bn_p(k, c):
        k1, k2, k3, k4 = jax.random.split(k, 4)
        gamma = 1.0 + 0.1 * jax.random.normal(k1, (c,), jnp.float32)
        beta = 0.1 * jax.random.normal(k2, (c,), jnp.float32)
        mean = 0.1 * jax.random.normal(k3, (c,), jnp.float32)
        var = 0.5 + jax.random.uniform(k4, (c,), jnp.float32)
        return gamma, beta, mean, var

    raw = {}
    raw["conv1_w"], raw["conv1_b"] = conv_p(keys[0], 32, 2, 7)
    raw["bn1"] = bn_p(keys[1], 32)
    raw["rb1c1_w"], raw["rb1c1_b"] = conv_p(keys[2], 64, 32, 3)
    raw["bn_rb1c1"] = bn_p(keys[3], 64)
    raw["rb1c2_w"], raw["rb1c2_b"] = conv_p(keys[4], 64, 64, 3)
    raw["bn_rb1c2"] = bn_p(keys[5], 64)
    raw["rb2c1_w"], raw["rb2c1_b"] = conv_p(keys[6], 128, 64, 3)
    raw["bn_rb2c1"] = bn_p(keys[7], 128)
    raw["rb2c2_w"], raw["rb2c2_b"] = conv_p(keys[8], 128, 128, 3)
    raw["bn_rb2c2"] = bn_p(keys[9], 128)
    k1, k2 = jax.random.split(keys[10])
    raw["fc1_w"] = 0.1 * jax.random.normal(k1, (64, 128 * final_length), jnp.float32)
    raw["fc1_b"] = 0.05 * jax.random.normal(k2, (64,), jnp.float32)
    k1, k2 = jax.random.split(keys[11])
    raw["fc2_w"] = 0.1 * jax.random.normal(k1, (7, 64), jnp.float32)
    raw["fc2_b"] = 0.05 * jax.random.normal(k2, (7,), jnp.float32)
    return raw


def prepare_kernel_params(raw, window_size):
    """Fold eval-mode BN into convs + reshape weights into kernel layouts."""
    Wq = window_size // 4

    def fold(w, b, bn):
        gamma, beta, mean, var = bn
        scale = gamma / jnp.sqrt(var + BN_EPS)
        return w * scale[:, None, None], (b - mean) * scale + beta

    def to_kio(w):                       # (Cout, Cin, K) -> (K, Cin, Cout)
        return jnp.transpose(w, (2, 1, 0))

    p = {}
    for name, (wk, bk, bnk) in {
        "1": ("conv1_w", "conv1_b", "bn1"),
        "2": ("rb1c1_w", "rb1c1_b", "bn_rb1c1"),
        "3": ("rb1c2_w", "rb1c2_b", "bn_rb1c2"),
        "4": ("rb2c1_w", "rb2c1_b", "bn_rb2c1"),
        "5": ("rb2c2_w", "rb2c2_b", "bn_rb2c2"),
    }.items():
        w, b = fold(raw[wk], raw[bk], raw[bnk])
        p["w" + name] = to_kio(w)
        p["b" + name] = b.reshape(1, -1)

    # fc1: PyTorch consumes a channel-major flatten (row index = c*Wq + l).
    # Store as (L, C, out) so the kernel can consume channels-last rows.
    w = raw["fc1_w"].T.reshape(128, Wq, 64).transpose(1, 0, 2)   # (Wq, 128, 64)
    p["fc1_w"] = w
    p["fc1_b"] = raw["fc1_b"].reshape(1, -1)

    # fc2: pad 7 -> 128 output lanes for a lane-dense final store.
    w2 = raw["fc2_w"].T                                           # (64, 7)
    p["fc2_w"] = jnp.pad(w2, ((0, 0), (0, OUT_LANES - 7)))
    p["fc2_b"] = jnp.pad(raw["fc2_b"].reshape(1, -1), ((0, 0), (0, OUT_LANES - 7)))
    return p


# ----------------------------------------------------------------------------
# Pure-JAX reference with PyTorch semantics (unfolded BN, NCW, flatten(1))
# ----------------------------------------------------------------------------
def _ref_forward(raw, x_ncw):
    hp = lax.Precision.HIGHEST

    def conv(x, w, b, stride, pad):
        y = lax.conv_general_dilated(
            x, w, window_strides=(stride,), padding=[(pad, pad)],
            dimension_numbers=("NCH", "OIH", "NCH"), precision=hp)
        return y + b[None, :, None]

    def bn(y, p):
        gamma, beta, mean, var = p
        return ((y - mean[None, :, None])
                * (gamma[None, :, None] / jnp.sqrt(var[None, :, None] + BN_EPS))
                + beta[None, :, None])

    def relu(x):
        return jnp.maximum(x, 0.0)

    def pool(x):
        return lax.reduce_window(x, -jnp.inf, lax.max,
                                 (1, 1, 3), (1, 1, 2),
                                 [(0, 0), (0, 0), (1, 1)])

    x = x_ncw
    x = pool(relu(bn(conv(x, raw["conv1_w"], raw["conv1_b"], 1, 3), raw["bn1"])))
    x = relu(bn(conv(x, raw["rb1c1_w"], raw["rb1c1_b"], 1, 1), raw["bn_rb1c1"]))
    x = relu(bn(conv(x, raw["rb1c2_w"], raw["rb1c2_b"], 1, 1), raw["bn_rb1c2"]))
    x = relu(bn(conv(x, raw["rb2c1_w"], raw["rb2c1_b"], 2, 1), raw["bn_rb2c1"]))
    x = relu(bn(conv(x, raw["rb2c2_w"], raw["rb2c2_b"], 1, 1), raw["bn_rb2c2"]))
    B = x.shape[0]
    x = x.reshape(B, -1)                               # PyTorch flatten(1), NCW
    x = relu(jnp.dot(x, raw["fc1_w"].T, precision=hp) + raw["fc1_b"])
    x = jnp.dot(x, raw["fc2_w"].T, precision=hp) + raw["fc2_b"]
    return 1.0 / (1.0 + jnp.exp(-x))


if __name__ == "__main__":
    window_size = 16
    batch = 8                       # -> BT=4, grid=(2,)
    key = jax.random.PRNGKey(0)
    pkey, xkey = jax.random.split(key)

    raw = init_params(pkey, window_size)
    kp = prepare_kernel_params(raw, window_size)
    x = jax.random.normal(xkey, (batch, 2, window_size), jnp.float32)

    fwd = jax.jit(step_counter_cnn_forward)
    out = jax.block_until_ready(fwd(kp, x))

    ref = _ref_forward(raw, x)
    assert out.shape == (batch, 7), out.shape
    assert bool(jnp.all(jnp.isfinite(out)))
    assert jnp.allclose(out, ref, atol=2e-3, rtol=2e-3), (out, ref)

    print("KERNEL_OK")
</pallas_src>

<mosaic_0001>
module attributes {stable_mosaic.version = 11 : i64} {
  func.func @_fused_forward_kernel(%arg0: i32, %arg1: memref<4x16x2xf32, #tpu.memory_space<vmem>>, %arg2: memref<88x1xf32, #tpu.memory_space<vmem>>, %arg3: memref<44x1xf32, #tpu.memory_space<vmem>>, %arg4: memref<22x1xf32, #tpu.memory_space<vmem>>, %arg5: memref<7x2x32xf32, #tpu.memory_space<vmem>>, %arg6: memref<1x32xf32, #tpu.memory_space<vmem>>, %arg7: memref<3x32x64xf32, #tpu.memory_space<vmem>>, %arg8: memref<1x64xf32, #tpu.memory_space<vmem>>, %arg9: memref<3x64x64xf32, #tpu.memory_space<vmem>>, %arg10: memref<1x64xf32, #tpu.memory_space<vmem>>, %arg11: memref<3x64x128xf32, #tpu.memory_space<vmem>>, %arg12: memref<1x128xf32, #tpu.memory_space<vmem>>, %arg13: memref<3x128x128xf32, #tpu.memory_space<vmem>>, %arg14: memref<1x128xf32, #tpu.memory_space<vmem>>, %arg15: memref<4x128x64xf32, #tpu.memory_space<vmem>>, %arg16: memref<1x64xf32, #tpu.memory_space<vmem>>, %arg17: memref<64x128xf32, #tpu.memory_space<vmem>>, %arg18: memref<1x128xf32, #tpu.memory_space<vmem>>, %arg19: memref<1x4x128xf32, #tpu.memory_space<vmem>>, %arg20: memref<96x2xf32, #tpu.memory_space<vmem>>, %arg21: memref<96x32xf32, #tpu.memory_space<vmem>>, %arg22: memref<48x64xf32, #tpu.memory_space<vmem>>, %arg23: memref<24x128xf32, #tpu.memory_space<vmem>>) attributes {dimension_semantics = [#tpu.dimension_semantics<parallel>], iteration_bounds = array<i64: 2>, scalar_prefetch = 0 : i64, scratch_operands = 4 : i64, tpu.core_type = #tpu.core_type<tc>, window_params = [{transform_indices = @transform_0, window_bounds = array<i64: 4, 16, 2>}, {pipeline_mode = #tpu.pipeline_mode<synchronous>, transform_indices = @transform_1, window_bounds = array<i64: 88, 1>}, {pipeline_mode = #tpu.pipeline_mode<synchronous>, transform_indices = @transform_2, window_bounds = array<i64: 44, 1>}, {pipeline_mode = #tpu.pipeline_mode<synchronous>, transform_indices = @transform_3, window_bounds = array<i64: 22, 1>}, {pipeline_mode = #tpu.pipeline_mode<synchronous>, transform_indices = @transform_4, window_bounds = array<i64: 7, 2, 32>}, {pipeline_mode = #tpu.pipeline_mode<synchronous>, transform_indices = @transform_5, window_bounds = array<i64: 1, 32>}, {pipeline_mode = #tpu.pipeline_mode<synchronous>, transform_indices = @transform_6, window_bounds = array<i64: 3, 32, 64>}, {pipeline_mode = #tpu.pipeline_mode<synchronous>, transform_indices = @transform_7, window_bounds = array<i64: 1, 64>}, {pipeline_mode = #tpu.pipeline_mode<synchronous>, transform_indices = @transform_8, window_bounds = array<i64: 3, 64, 64>}, {pipeline_mode = #tpu.pipeline_mode<synchronous>, transform_indices = @transform_9, window_bounds = array<i64: 1, 64>}, {pipeline_mode = #tpu.pipeline_mode<synchronous>, transform_indices = @transform_10, window_bounds = array<i64: 3, 64, 128>}, {pipeline_mode = #tpu.pipeline_mode<synchronous>, transform_indices = @transform_11, window_bounds = array<i64: 1, 128>}, {pipeline_mode = #tpu.pipeline_mode<synchronous>, transform_indices = @transform_12, window_bounds = array<i64: 3, 128, 128>}, {pipeline_mode = #tpu.pipeline_mode<synchronous>, transform_indices = @transform_13, window_bounds = array<i64: 1, 128>}, {pipeline_mode = #tpu.pipeline_mode<synchronous>, transform_indices = @transform_14, window_bounds = array<i64: 4, 128, 64>}, {pipeline_mode = #tpu.pipeline_mode<synchronous>, transform_indices = @transform_15, window_bounds = array<i64: 1, 64>}, {pipeline_mode = #tpu.pipeline_mode<synchronous>, transform_indices = @transform_16, window_bounds = array<i64: 64, 128>}, {pipeline_mode = #tpu.pipeline_mode<synchronous>, transform_indices = @transform_17, window_bounds = array<i64: 1, 128>}, {transform_indices = @transform_18, window_bounds = array<i64: 1, 4, 128>}]} {
    %c0 = arith.constant 0 : index
    %c0_0 = arith.constant 0 : index
    %0 = vector.load %arg2[%c0, %c0_0] : memref<88x1xf32, #tpu.memory_space<vmem>>, vector<88x1xf32>
    %c0_1 = arith.constant 0 : index
    %c0_2 = arith.constant 0 : index
    %1 = vector.load %arg3[%c0_1, %c0_2] : memref<44x1xf32, #tpu.memory_space<vmem>>, vector<44x1xf32>
    %c0_3 = arith.constant 0 : index
    %c0_4 = arith.constant 0 : index
    %2 = vector.load %arg4[%c0_3, %c0_4] : memref<22x1xf32, #tpu.memory_space<vmem>>, vector<22x1xf32>
    %cst = arith.constant 0.000000e+00 : f32
    %3 = vector.broadcast %cst : f32 to vector<96x2xf32>
    %c0_5 = arith.constant 0 : index
    %c0_6 = arith.constant 0 : index
    %4 = vector.load %arg20[%c0_5, %c0_6] : memref<96x2xf32, #tpu.memory_space<vmem>>, vector<96x2xf32>
    tpu.vector_store %arg20[%c0_5, %c0_6], %3 {strides = array<i32>} : memref<96x2xf32, #tpu.memory_space<vmem>>, vector<96x2xf32>,
    %c0_7 = arith.constant 0 : index
    %c0_8 = arith.constant 0 : index
    %c0_9 = arith.constant 0 : index
    %5 = vector.load %arg1[%c0_7, %c0_8, %c0_9] : memref<4x16x2xf32, #tpu.memory_space<vmem>>, vector<1x16x2xf32>
    %6 = vector.shape_cast %5 : vector<1x16x2xf32> to vector<16x2xf32>
    %c3 = arith.constant 3 : index
    %c0_10 = arith.constant 0 : index
    %7 = vector.load %arg20[%c3, %c0_10] : memref<96x2xf32, #tpu.memory_space<vmem>>, vector<16x2xf32>
    tpu.vector_store %arg20[%c3, %c0_10], %6 {strides = array<i32>} : memref<96x2xf32, #tpu.memory_space<vmem>>, vector<16x2xf32>,
    %c1 = arith.constant 1 : index
    %c0_11 = arith.constant 0 : index
    %c0_12 = arith.constant 0 : index
    %8 = vector.load %arg1[%c1, %c0_11, %c0_12] : memref<4x16x2xf32, #tpu.memory_space<vmem>>, vector<1x16x2xf32>
    %9 = vector.shape_cast %8 : vector<1x16x2xf32> to vector<16x2xf32>
    %c27 = arith.constant 27 : index
    %c0_13 = arith.constant 0 : index
    %10 = vector.load %arg20[%c27, %c0_13] : memref<96x2xf32, #tpu.memory_space<vmem>>, vector<16x2xf32>
    tpu.vector_store %arg20[%c27, %c0_13], %9 {strides = array<i32>} : memref<96x2xf32, #tpu.memory_space<vmem>>, vector<16x2xf32>,
    %c2 = arith.constant 2 : index
    %c0_14 = arith.constant 0 : index
    %c0_15 = arith.constant 0 : index
    %11 = vector.load %arg1[%c2, %c0_14, %c0_15] : memref<4x16x2xf32, #tpu.memory_space<vmem>>, vector<1x16x2xf32>
    %12 = vector.shape_cast %11 : vector<1x16x2xf32> to vector<16x2xf32>
    %c51 = arith.constant 51 : index
    %c0_16 = arith.constant 0 : index
    %13 = vector.load %arg20[%c51, %c0_16] : memref<96x2xf32, #tpu.memory_space<vmem>>, vector<16x2xf32>
    tpu.vector_store %arg20[%c51, %c0_16], %12 {strides = array<i32>} : memref<96x2xf32, #tpu.memory_space<vmem>>, vector<16x2xf32>,
    %c3_17 = arith.constant 3 : index
    %c0_18 = arith.constant 0 : index
    %c0_19 = arith.constant 0 : index
    %14 = vector.load %arg1[%c3_17, %c0_18, %c0_19] : memref<4x16x2xf32, #tpu.memory_space<vmem>>, vector<1x16x2xf32>
    %15 = vector.shape_cast %14 : vector<1x16x2xf32> to vector<16x2xf32>
    %c75 = arith.constant 75 : index
    %c0_20 = arith.constant 0 : index
    %16 = vector.load %arg20[%c75, %c0_20] : memref<96x2xf32, #tpu.memory_space<vmem>>, vector<16x2xf32>
    tpu.vector_store %arg20[%c75, %c0_20], %15 {strides = array<i32>} : memref<96x2xf32, #tpu.memory_space<vmem>>, vector<16x2xf32>,
    %cst_21 = arith.constant 0.000000e+00 : f32
    %17 = vector.broadcast %cst_21 : f32 to vector<88x32xf32>
    %c0_22 = arith.constant 0 : index
    %c0_23 = arith.constant 0 : index
    %18 = vector.load %arg20[%c0_22, %c0_23] : memref<96x2xf32, #tpu.memory_space<vmem>>, vector<88x2xf32>
    %c0_24 = arith.constant 0 : index
    %c0_25 = arith.constant 0 : index
    %c0_26 = arith.constant 0 : index
    %19 = vector.load %arg5[%c0_24, %c0_25, %c0_26] : memref<7x2x32xf32, #tpu.memory_space<vmem>>, vector<1x2x32xf32>
    %20 = vector.shape_cast %19 : vector<1x2x32xf32> to vector<2x32xf32>
    %cst_27 = arith.constant dense<0.000000e+00> : vector<88x32xf32>
    %21 = tpu.matmul %18, %20, %cst_27 {dimension_numbers = #tpu.dot_dimension_numbers<[1], [0], [0], [1], [0, 0, 1, 1], [], []>} : vector<88x2xf32>, vector<2x32xf32>, vector<88x32xf32> -> vector<88x32xf32>
    %22 = arith.addf %17, %21 : vector<88x32xf32>
    %c1_28 = arith.constant 1 : index
    %c0_29 = arith.constant 0 : index
    %23 = vector.load %arg20[%c1_28, %c0_29] : memref<96x2xf32, #tpu.memory_space<vmem>>, vector<88x2xf32>
    %c1_30 = arith.constant 1 : index
    %c0_31 = arith.constant 0 : index
    %c0_32 = arith.constant 0 : index
    %24 = vector.load %arg5[%c1_30, %c0_31, %c0_32] : memref<7x2x32xf32, #tpu.memory_space<vmem>>, vector<1x2x32xf32>
    %25 = vector.shape_cast %24 : vector<1x2x32xf32> to vector<2x32xf32>
    %cst_33 = arith.constant dense<0.000000e+00> : vector<88x32xf32>
    %26 = tpu.matmul %23, %25, %cst_33 {dimension_numbers = #tpu.dot_dimension_numbers<[1], [0], [0], [1], [0, 0, 1, 1], [], []>} : vector<88x2xf32>, vector<2x32xf32>, vector<88x32xf32> -> vector<88x32xf32>
    %27 = arith.addf %22, %26 : vector<88x32xf32>
    %c2_34 = arith.constant 2 : index
    %c0_35 = arith.constant 0 : index
    %28 = vector.load %arg20[%c2_34, %c0_35] : memref<96x2xf32, #tpu.memory_space<vmem>>, vector<88x2xf32>
    %c2_36 = arith.constant 2 : index
    %c0_37 = arith.constant 0 : index
    %c0_38 = arith.constant 0 : index
    %29 = vector.load %arg5[%c2_36, %c0_37, %c0_38] : memref<7x2x32xf32, #tpu.memory_space<vmem>>, vector<1x2x32xf32>
    %30 = vector.shape_cast %29 : vector<1x2x32xf32> to vector<2x32xf32>
    %cst_39 = arith.constant dense<0.000000e+00> : vector<88x32xf32>
    %31 = tpu.matmul %28, %30, %cst_39 {dimension_numbers = #tpu.dot_dimension_numbers<[1], [0], [0], [1], [0, 0, 1, 1], [], []>} : vector<88x2xf32>, vector<2x32xf32>, vector<88x32xf32> -> vector<88x32xf32>
    %32 = arith.addf %27, %31 : vector<88x32xf32>
    %c3_40 = arith.constant 3 : index
    %c0_41 = arith.constant 0 : index
    %33 = vector.load %arg20[%c3_40, %c0_41] : memref<96x2xf32, #tpu.memory_space<vmem>>, vector<88x2xf32>
    %c3_42 = arith.constant 3 : index
    %c0_43 = arith.constant 0 : index
    %c0_44 = arith.constant 0 : index
    %34 = vector.load %arg5[%c3_42, %c0_43, %c0_44] : memref<7x2x32xf32, #tpu.memory_space<vmem>>, vector<1x2x32xf32>
    %35 = vector.shape_cast %34 : vector<1x2x32xf32> to vector<2x32xf32>
    %cst_45 = arith.constant dense<0.000000e+00> : vector<88x32xf32>
    %36 = tpu.matmul %33, %35, %cst_45 {dimension_numbers = #tpu.dot_dimension_numbers<[1], [0], [0], [1], [0, 0, 1, 1], [], []>} : vector<88x2xf32>, vector<2x32xf32>, vector<88x32xf32> -> vector<88x32xf32>
    %37 = arith.addf %32, %36 : vector<88x32xf32>
    %c4 = arith.constant 4 : index
    %c0_46 = arith.constant 0 : index
    %38 = vector.load %arg20[%c4, %c0_46] : memref<96x2xf32, #tpu.memory_space<vmem>>, vector<88x2xf32>
    %c4_47 = arith.constant 4 : index
    %c0_48 = arith.constant 0 : index
    %c0_49 = arith.constant 0 : index
    %39 = vector.load %arg5[%c4_47, %c0_48, %c0_49] : memref<7x2x32xf32, #tpu.memory_space<vmem>>, vector<1x2x32xf32>
    %40 = vector.shape_cast %39 : vector<1x2x32xf32> to vector<2x32xf32>
    %cst_50 = arith.constant dense<0.000000e+00> : vector<88x32xf32>
    %41 = tpu.matmul %38, %40, %cst_50 {dimension_numbers = #tpu.dot_dimension_numbers<[1], [0], [0], [1], [0, 0, 1, 1], [], []>} : vector<88x2xf32>, vector<2x32xf32>, vector<88x32xf32> -> vector<88x32xf32>
    %42 = arith.addf %37, %41 : vector<88x32xf32>
    %c5 = arith.constant 5 : index
    %c0_51 = arith.constant 0 : index
    %43 = vector.load %arg20[%c5, %c0_51] : memref<96x2xf32, #tpu.memory_space<vmem>>, vector<88x2xf32>
    %c5_52 = arith.constant 5 : index
    %c0_53 = arith.constant 0 : index
    %c0_54 = arith.constant 0 : index
    %44 = vector.load %arg5[%c5_52, %c0_53, %c0_54] : memref<7x2x32xf32, #tpu.memory_space<vmem>>, vector<1x2x32xf32>
    %45 = vector.shape_cast %44 : vector<1x2x32xf32> to vector<2x32xf32>
    %cst_55 = arith.constant dense<0.000000e+00> : vector<88x32xf32>
    %46 = tpu.matmul %43, %45, %cst_55 {dimension_numbers = #tpu.dot_dimension_numbers<[1], [0], [0], [1], [0, 0, 1, 1], [], []>} : vector<88x2xf32>, vector<2x32xf32>, vector<88x32xf32> -> vector<88x32xf32>
    %47 = arith.addf %42, %46 : vector<88x32xf32>
    %c6 = arith.constant 6 : index
    %c0_56 = arith.constant 0 : index
    %48 = vector.load %arg20[%c6, %c0_56] : memref<96x2xf32, #tpu.memory_space<vmem>>, vector<88x2xf32>
    %c6_57 = arith.constant 6 : index
    %c0_58 = arith.constant 0 : index
    %c0_59 = arith.constant 0 : index
    %49 = vector.load %arg5[%c6_57, %c0_58, %c0_59] : memref<7x2x32xf32, #tpu.memory_space<vmem>>, vector<1x2x32xf32>
    %50 = vector.shape_cast %49 : vector<1x2x32xf32> to vector<2x32xf32>
    %cst_60 = arith.constant dense<0.000000e+00> : vector<88x32xf32>
    %51 = tpu.matmul %48, %50, %cst_60 {dimension_numbers = #tpu.dot_dimension_numbers<[1], [0], [0], [1], [0, 0, 1, 1], [], []>} : vector<88x2xf32>, vector<2x32xf32>, vector<88x32xf32> -> vector<88x32xf32>
    %52 = arith.addf %47, %51 : vector<88x32xf32>
    %c0_61 = arith.constant 0 : index
    %c0_62 = arith.constant 0 : index
    %53 = vector.load %arg6[%c0_61, %c0_62] : memref<1x32xf32, #tpu.memory_space<vmem>>, vector<1x32xf32>
    %54 = vector.broadcast %53 : vector<1x32xf32> to vector<88x32xf32>
    %55 = arith.addf %52, %54 : vector<88x32xf32>
    %cst_63 = arith.constant 0.000000e+00 : f32
    %56 = vector.broadcast %cst_63 : f32 to vector<88x32xf32>
    %57 = arith.maximumf %55, %56 : vector<88x32xf32>
    %58 = vector.broadcast %0 : vector<88x1xf32> to vector<88x32xf32>
    %59 = arith.mulf %57, %58 : vector<88x32xf32>
    %cst_64 = arith.constant 0.000000e+00 : f32
    %60 = vector.broadcast %cst_64 : f32 to vector<1x32xf32>
    %c0_65 = arith.constant 0 : index
    %c0_66 = arith.constant 0 : index
    %61 = vector.load %arg21[%c0_65, %c0_66] : memref<96x32xf32, #tpu.memory_space<vmem>>, vector<1x32xf32>
    tpu.vector_store %arg21[%c0_65, %c0_66], %60 {strides = array<i32>} : memref<96x32xf32, #tpu.memory_space<vmem>>, vector<1x32xf32>,
    %c1_67 = arith.constant 1 : index
    %c0_68 = arith.constant 0 : index
    %62 = vector.load %arg21[%c1_67, %c0_68] : memref<96x32xf32, #tpu.memory_space<vmem>>, vector<88x32xf32>
    tpu.vector_store %arg21[%c1_67, %c0_68], %59 {strides = array<i32>} : memref<96x32xf32, #tpu.memory_space<vmem>>, vector<88x32xf32>,
    %c0_69 = arith.constant 0 : index
    %c0_70 = arith.constant 0 : index
    %63 = tpu.strided_load %arg21[%c0_69, %c0_70] {strides = array<i32: 2, 1>} : memref<96x32xf32, #tpu.memory_space<vmem>>, vector<44x32xf32>
    %c1_71 = arith.constant 1 : index
    %c0_72 = arith.constant 0 : index
    %64 = tpu.strided_load %arg21[%c1_71, %c0_72] {strides = array<i32: 2, 1>} : memref<96x32xf32, #tpu.memory_space<vmem>>, vector<44x32xf32>
    %65 = arith.maximumf %63, %64 : vector<44x32xf32>
    %c2_73 = arith.constant 2 : index
    %c0_74 = arith.constant 0 : index
    %66 = tpu.strided_load %arg21[%c2_73, %c0_74] {strides = array<i32: 2, 1>} : memref<96x32xf32, #tpu.memory_space<vmem>>, vector<44x32xf32>
    %67 = arith.maximumf %65, %66 : vector<44x32xf32>
    %68 = vector.broadcast %1 : vector<44x1xf32> to vector<44x32xf32>
    %69 = arith.mulf %67, %68 : vector<44x32xf32>
    %cst_75 = arith.constant 0.000000e+00 : f32
    %70 = vector.broadcast %cst_75 : f32 to vector<1x32xf32>
    %cst_76 = arith.constant 0.000000e+00 : f32
    %71 = vector.broadcast %cst_76 : f32 to vector<3x32xf32>
    %72 = tpu.concatenate %70, %69, %71 in 0 : vector<1x32xf32>, vector<44x32xf32>, vector<3x32xf32> -> vector<48x32xf32>
    %cst_77 = arith.constant 0.000000e+00 : f32
    %73 = vector.broadcast %cst_77 : f32 to vector<44x64xf32>
    %74 = vector.extract_strided_slice %72 {offsets = [0, 0], sizes = [44, 32], strides = [1, 1]} : vector<48x32xf32> to vector<44x32xf32>
    %c0_78 = arith.constant 0 : index
    %c0_79 = arith.constant 0 : index
    %c0_80 = arith.constant 0 : index
    %75 = vector.load %arg7[%c0_78, %c0_79, %c0_80] : memref<3x32x64xf32, #tpu.memory_space<vmem>>, vector<1x32x64xf32>
    %76 = vector.shape_cast %75 : vector<1x32x64xf32> to vector<32x64xf32>
    %cst_81 = arith.constant dense<0.000000e+00> : vector<44x64xf32>
    %77 = tpu.matmul %74, %76, %cst_81 {dimension_numbers = #tpu.dot_dimension_numbers<[1], [0], [0], [1], [0, 0, 1, 1], [], []>} : vector<44x32xf32>, vector<32x64xf32>, vector<44x64xf32> -> vector<44x64xf32>
    %78 = arith.addf %73, %77 : vector<44x64xf32>
    %79 = vector.extract_strided_slice %72 {offsets = [1, 0], sizes = [44, 32], strides = [1, 1]} : vector<48x32xf32> to vector<44x32xf32>
    %c1_82 = arith.constant 1 : index
    %c0_83 = arith.constant 0 : index
    %c0_84 = arith.constant 0 : index
    %80 = vector.load %arg7[%c1_82, %c0_83, %c0_84] : memref<3x32x64xf32, #tpu.memory_space<vmem>>, vector<1x32x64xf32>
    %81 = vector.shape_cast %80 : vector<1x32x64xf32> to vector<32x64xf32>
    %cst_85 = arith.constant dense<0.000000e+00> : vector<44x64xf32>
    %82 = tpu.matmul %79, %81, %cst_85 {dimension_numbers = #tpu.dot_dimension_numbers<[1], [0], [0], [1], [0, 0, 1, 1], [], []>} : vector<44x32xf32>, vector<32x64xf32>, vector<44x64xf32> -> vector<44x64xf32>
    %83 = arith.addf %78, %82 : vector<44x64xf32>
    %84 = vector.extract_strided_slice %72 {offsets = [2, 0], sizes = [44, 32], strides = [1, 1]} : vector<48x32xf32> to vector<44x32xf32>
    %c2_86 = arith.constant 2 : index
    %c0_87 = arith.constant 0 : index
    %c0_88 = arith.constant 0 : index
    %85 = vector.load %arg7[%c2_86, %c0_87, %c0_88] : memref<3x32x64xf32, #tpu.memory_space<vmem>>, vector<1x32x64xf32>
    %86 = vector.shape_cast %85 : vector<1x32x64xf32> to vector<32x64xf32>
    %cst_89 = arith.constant dense<0.000000e+00> : vector<44x64xf32>
    %87 = tpu.matmul %84, %86, %cst_89 {dimension_numbers = #tpu.dot_dimension_numbers<[1], [0], [0], [1], [0, 0, 1, 1], [], []>} : vector<44x32xf32>, vector<32x64xf32>, vector<44x64xf32> -> vector<44x64xf32>
    %88 = arith.addf %83, %87 : vector<44x64xf32>
    %c0_90 = arith.constant 0 : index
    %c0_91 = arith.constant 0 : index
    %89 = vector.load %arg8[%c0_90, %c0_91] : memref<1x64xf32, #tpu.memory_space<vmem>>, vector<1x64xf32>
    %90 = vector.broadcast %89 : vector<1x64xf32> to vector<44x64xf32>
    %91 = arith.addf %88, %90 : vector<44x64xf32>
    %cst_92 = arith.constant 0.000000e+00 : f32
    %92 = vector.broadcast %cst_92 : f32 to vector<44x64xf32>
    %93 = arith.maximumf %91, %92 : vector<44x64xf32>
    %94 = vector.broadcast %1 : vector<44x1xf32> to vector<44x64xf32>
    %95 = arith.mulf %93, %94 : vector<44x64xf32>
    %cst_93 = arith.constant 0.000000e+00 : f32
    %96 = vector.broadcast %cst_93 : f32 to vector<1x64xf32>
    %cst_94 = arith.constant 0.000000e+00 : f32
    %97 = vector.broadcast %cst_94 : f32 to vector<3x64xf32>
    %98 = tpu.concatenate %96, %95, %97 in 0 : vector<1x64xf32>, vector<44x64xf32>, vector<3x64xf32> -> vector<48x64xf32>
    %cst_95 = arith.constant 0.000000e+00 : f32
    %99 = vector.broadcast %cst_95 : f32 to vector<44x64xf32>
    %100 = vector.extract_strided_slice %98 {offsets = [0, 0], sizes = [44, 64], strides = [1, 1]} : vector<48x64xf32> to vector<44x64xf32>
    %c0_96 = arith.constant 0 : index
    %c0_97 = arith.constant 0 : index
    %c0_98 = arith.constant 0 : index
    %101 = vector.load %arg9[%c0_96, %c0_97, %c0_98] : memref<3x64x64xf32, #tpu.memory_space<vmem>>, vector<1x64x64xf32>
    %102 = vector.shape_cast %101 : vector<1x64x64xf32> to vector<64x64xf32>
    %cst_99 = arith.constant dense<0.000000e+00> : vector<44x64xf32>
    %103 = tpu.matmul %100, %102, %cst_99 {dimension_numbers = #tpu.dot_dimension_numbers<[1], [0], [0], [1], [0, 0, 1, 1], [], []>} : vector<44x64xf32>, vector<64x64xf32>, vector<44x64xf32> -> vector<44x64xf32>
    %104 = arith.addf %99, %103 : vector<44x64xf32>
    %105 = vector.extract_strided_slice %98 {offsets = [1, 0], sizes = [44, 64], strides = [1, 1]} : vector<48x64xf32> to vector<44x64xf32>
    %c1_100 = arith.constant 1 : index
    %c0_101 = arith.constant 0 : index
    %c0_102 = arith.constant 0 : index
    %106 = vector.load %arg9[%c1_100, %c0_101, %c0_102] : memref<3x64x64xf32, #tpu.memory_space<vmem>>, vector<1x64x64xf32>
    %107 = vector.shape_cast %106 : vector<1x64x64xf32> to vector<64x64xf32>
    %cst_103 = arith.constant dense<0.000000e+00> : vector<44x64xf32>
    %108 = tpu.matmul %105, %107, %cst_103 {dimension_numbers = #tpu.dot_dimension_numbers<[1], [0], [0], [1], [0, 0, 1, 1], [], []>} : vector<44x64xf32>, vector<64x64xf32>, vector<44x64xf32> -> vector<44x64xf32>
    %109 = arith.addf %104, %108 : vector<44x64xf32>
    %110 = vector.extract_strided_slice %98 {offsets = [2, 0], sizes = [44, 64], strides = [1, 1]} : vector<48x64xf32> to vector<44x64xf32>
    %c2_104 = arith.constant 2 : index
    %c0_105 = arith.constant 0 : index
    %c0_106 = arith.constant 0 : index
    %111 = vector.load %arg9[%c2_104, %c0_105, %c0_106] : memref<3x64x64xf32, #tpu.memory_space<vmem>>, vector<1x64x64xf32>
    %112 = vector.shape_cast %111 : vector<1x64x64xf32> to vector<64x64xf32>
    %cst_107 = arith.constant dense<0.000000e+00> : vector<44x64xf32>
    %113 = tpu.matmul %110, %112, %cst_107 {dimension_numbers = #tpu.dot_dimension_numbers<[1], [0], [0], [1], [0, 0, 1, 1], [], []>} : vector<44x64xf32>, vector<64x64xf32>, vector<44x64xf32> -> vector<44x64xf32>
    %114 = arith.addf %109, %113 : vector<44x64xf32>
    %c0_108 = arith.constant 0 : index
    %c0_109 = arith.constant 0 : index
    %115 = vector.load %arg10[%c0_108, %c0_109] : memref<1x64xf32, #tpu.memory_space<vmem>>, vector<1x64xf32>
    %116 = vector.broadcast %115 : vector<1x64xf32> to vector<44x64xf32>
    %117 = arith.addf %114, %116 : vector<44x64xf32>
    %cst_110 = arith.constant 0.000000e+00 : f32
    %118 = vector.broadcast %cst_110 : f32 to vector<44x64xf32>
    %119 = arith.maximumf %117, %118 : vector<44x64xf32>
    %120 = vector.broadcast %1 : vector<44x1xf32> to vector<44x64xf32>
    %121 = arith.mulf %119, %120 : vector<44x64xf32>
    %cst_111 = arith.constant 0.000000e+00 : f32
    %122 = vector.broadcast %cst_111 : f32 to vector<1x64xf32>
    %c0_112 = arith.constant 0 : index
    %c0_113 = arith.constant 0 : index
    %123 = vector.load %arg22[%c0_112, %c0_113] : memref<48x64xf32, #tpu.memory_space<vmem>>, vector<1x64xf32>
    tpu.vector_store %arg22[%c0_112, %c0_113], %122 {strides = array<i32>} : memref<48x64xf32, #tpu.memory_space<vmem>>, vector<1x64xf32>,
    %c1_114 = arith.constant 1 : index
    %c0_115 = arith.constant 0 : index
    %124 = vector.load %arg22[%c1_114, %c0_115] : memref<48x64xf32, #tpu.memory_space<vmem>>, vector<44x64xf32>
    tpu.vector_store %arg22[%c1_114, %c0_115], %121 {strides = array<i32>} : memref<48x64xf32, #tpu.memory_space<vmem>>, vector<44x64xf32>,
    %cst_116 = arith.constant 0.000000e+00 : f32
    %125 = vector.broadcast %cst_116 : f32 to vector<22x128xf32>
    %c0_117 = arith.constant 0 : index
    %c0_118 = arith.constant 0 : index
    %126 = tpu.strided_load %arg22[%c0_117, %c0_118] {strides = array<i32: 2, 1>} : memref<48x64xf32, #tpu.memory_space<vmem>>, vector<22x64xf32>
    %c0_119 = arith.constant 0 : index
    %c0_120 = arith.constant 0 : index
    %c0_121 = arith.constant 0 : index
    %127 = vector.load %arg11[%c0_119, %c0_120, %c0_121] : memref<3x64x128xf32, #tpu.memory_space<vmem>>, vector<1x64x128xf32>
    %128 = vector.shape_cast %127 : vector<1x64x128xf32> to vector<64x128xf32>
    %cst_122 = arith.constant dense<0.000000e+00> : vector<22x128xf32>
    %129 = tpu.matmul %126, %128, %cst_122 {dimension_numbers = #tpu.dot_dimension_numbers<[1], [0], [0], [1], [0, 0, 1, 1], [], []>} : vector<22x64xf32>, vector<64x128xf32>, vector<22x128xf32> -> vector<22x128xf32>
    %130 = arith.addf %125, %129 : vector<22x128xf32>
    %c1_123 = arith.constant 1 : index
    %c0_124 = arith.constant 0 : index
    %131 = tpu.strided_load %arg22[%c1_123, %c0_124] {strides = array<i32: 2, 1>} : memref<48x64xf32, #tpu.memory_space<vmem>>, vector<22x64xf32>
    %c1_125 = arith.constant 1 : index
    %c0_126 = arith.constant 0 : index
    %c0_127 = arith.constant 0 : index
    %132 = vector.load %arg11[%c1_125, %c0_126, %c0_127] : memref<3x64x128xf32, #tpu.memory_space<vmem>>, vector<1x64x128xf32>
    %133 = vector.shape_cast %132 : vector<1x64x128xf32> to vector<64x128xf32>
    %cst_128 = arith.constant dense<0.000000e+00> : vector<22x128xf32>
    %134 = tpu.matmul %131, %133, %cst_128 {dimension_numbers = #tpu.dot_dimension_numbers<[1], [0], [0], [1], [0, 0, 1, 1], [], []>} : vector<22x64xf32>, vector<64x128xf32>, vector<22x128xf32> -> vector<22x128xf32>
    %135 = arith.addf %130, %134 : vector<22x128xf32>
    %c2_129 = arith.constant 2 : index
    %c0_130 = arith.constant 0 : index
    %136 = tpu.strided_load %arg22[%c2_129, %c0_130] {strides = array<i32: 2, 1>} : memref<48x64xf32, #tpu.memory_space<vmem>>, vector<22x64xf32>
    %c2_131 = arith.constant 2 : index
    %c0_132 = arith.constant 0 : index
    %c0_133 = arith.constant 0 : index
    %137 = vector.load %arg11[%c2_131, %c0_132, %c0_133] : memref<3x64x128xf32, #tpu.memory_space<vmem>>, vector<1x64x128xf32>
    %138 = vector.shape_cast %137 : vector<1x64x128xf32> to vector<64x128xf32>
    %cst_134 = arith.constant dense<0.000000e+00> : vector<22x128xf32>
    %139 = tpu.matmul %136, %138, %cst_134 {dimension_numbers = #tpu.dot_dimension_numbers<[1], [0], [0], [1], [0, 0, 1, 1], [], []>} : vector<22x64xf32>, vector<64x128xf32>, vector<22x128xf32> -> vector<22x128xf32>
    %140 = arith.addf %135, %139 : vector<22x128xf32>
    %c0_135 = arith.constant 0 : index
    %c0_136 = arith.constant 0 : index
    %141 = vector.load %arg12[%c0_135, %c0_136] : memref<1x128xf32, #tpu.memory_space<vmem>>, vector<1x128xf32>
    %142 = vector.broadcast %141 : vector<1x128xf32> to vector<22x128xf32>
    %143 = arith.addf %140, %142 : vector<22x128xf32>
    %cst_137 = arith.constant 0.000000e+00 : f32
    %144 = vector.broadcast %cst_137 : f32 to vector<22x128xf32>
    %145 = arith.maximumf %143, %144 : vector<22x128xf32>
    %146 = vector.broadcast %2 : vector<22x1xf32> to vector<22x128xf32>
    %147 = arith.mulf %145, %146 : vector<22x128xf32>
    %cst_138 = arith.constant 0.000000e+00 : f32
    %148 = vector.broadcast %cst_138 : f32 to vector<1x128xf32>
    %cst_139 = arith.constant 0.000000e+00 : f32
    %149 = vector.broadcast %cst_139 : f32 to vector<1x128xf32>
    %150 = tpu.concatenate %148, %147, %149 in 0 : vector<1x128xf32>, vector<22x128xf32>, vector<1x128xf32> -> vector<24x128xf32>
    %cst_140 = arith.constant 0.000000e+00 : f32
    %151 = vector.broadcast %cst_140 : f32 to vector<22x128xf32>
    %152 = vector.extract_strided_slice %150 {offsets = [0, 0], sizes = [22, 128], strides = [1, 1]} : vector<24x128xf32> to vector<22x128xf32>
    %c0_141 = arith.constant 0 : index
    %c0_142 = arith.constant 0 : index
    %c0_143 = arith.constant 0 : index
    %153 = vector.load %arg13[%c0_141, %c0_142, %c0_143] : memref<3x128x128xf32, #tpu.memory_space<vmem>>, vector<1x128x128xf32>
    %154 = vector.shape_cast %153 : vector<1x128x128xf32> to vector<128x128xf32>
    %cst_144 = arith.constant dense<0.000000e+00> : vector<22x128xf32>
    %155 = tpu.matmul %152, %154, %cst_144 {dimension_numbers = #tpu.dot_dimension_numbers<[1], [0], [0], [1], [0, 0, 1, 1], [], []>} : vector<22x128xf32>, vector<128x128xf32>, vector<22x128xf32> -> vector<22x128xf32>
    %156 = arith.addf %151, %155 : vector<22x128xf32>
    %157 = vector.extract_strided_slice %150 {offsets = [1, 0], sizes = [22, 128], strides = [1, 1]} : vector<24x128xf32> to vector<22x128xf32>
    %c1_145 = arith.constant 1 : index
    %c0_146 = arith.constant 0 : index
    %c0_147 = arith.constant 0 : index
    %158 = vector.load %arg13[%c1_145, %c0_146, %c0_147] : memref<3x128x128xf32, #tpu.memory_space<vmem>>, vector<1x128x128xf32>
    %159 = vector.shape_cast %158 : vector<1x128x128xf32> to vector<128x128xf32>
    %cst_148 = arith.constant dense<0.000000e+00> : vector<22x128xf32>
    %160 = tpu.matmul %157, %159, %cst_148 {dimension_numbers = #tpu.dot_dimension_numbers<[1], [0], [0], [1], [0, 0, 1, 1], [], []>} : vector<22x128xf32>, vector<128x128xf32>, vector<22x128xf32> -> vector<22x128xf32>
    %161 = arith.addf %156, %160 : vector<22x128xf32>
    %162 = vector.extract_strided_slice %150 {offsets = [2, 0], sizes = [22, 128], strides = [1, 1]} : vector<24x128xf32> to vector<22x128xf32>
    %c2_149 = arith.constant 2 : index
    %c0_150 = arith.constant 0 : index
    %c0_151 = arith.constant 0 : index
    %163 = vector.load %arg13[%c2_149, %c0_150, %c0_151] : memref<3x128x128xf32, #tpu.memory_space<vmem>>, vector<1x128x128xf32>
    %164 = vector.shape_cast %163 : vector<1x128x128xf32> to vector<128x128xf32>
    %cst_152 = arith.constant dense<0.000000e+00> : vector<22x128xf32>
    %165 = tpu.matmul %162, %164, %cst_152 {dimension_numbers = #tpu.dot_dimension_numbers<[1], [0], [0], [1], [0, 0, 1, 1], [], []>} : vector<22x128xf32>, vector<128x128xf32>, vector<22x128xf32> -> vector<22x128xf32>
    %166 = arith.addf %161, %165 : vector<22x128xf32>
    %c0_153 = arith.constant 0 : index
    %c0_154 = arith.constant 0 : index
    %167 = vector.load %arg14[%c0_153, %c0_154] : memref<1x128xf32, #tpu.memory_space<vmem>>, vector<1x128xf32>
    %168 = vector.broadcast %167 : vector<1x128xf32> to vector<22x128xf32>
    %169 = arith.addf %166, %168 : vector<22x128xf32>
    %cst_155 = arith.constant 0.000000e+00 : f32
    %170 = vector.broadcast %cst_155 : f32 to vector<22x128xf32>
    %171 = arith.maximumf %169, %170 : vector<22x128xf32>
    %c1_156 = arith.constant 1 : index
    %c0_157 = arith.constant 0 : index
    %172 = vector.load %arg23[%c1_156, %c0_157] : memref<24x128xf32, #tpu.memory_space<vmem>>, vector<22x128xf32>
    tpu.vector_store %arg23[%c1_156, %c0_157], %171 {strides = array<i32>} : memref<24x128xf32, #tpu.memory_space<vmem>>, vector<22x128xf32>,
    %cst_158 = arith.constant 0.000000e+00 : f32
    %173 = vector.broadcast %cst_158 : f32 to vector<4x64xf32>
    %c1_159 = arith.constant 1 : index
    %c0_160 = arith.constant 0 : index
    %174 = tpu.strided_load %arg23[%c1_159, %c0_160] {strides = array<i32: 6, 1>} : memref<24x128xf32, #tpu.memory_space<vmem>>, vector<4x128xf32>
    %c0_161 = arith.constant 0 : index
    %c0_162 = arith.constant 0 : index
    %c0_163 = arith.constant 0 : index
    %175 = vector.load %arg15[%c0_161, %c0_162, %c0_163] : memref<4x128x64xf32, #tpu.memory_space<vmem>>, vector<1x128x64xf32>
    %176 = vector.shape_cast %175 : vector<1x128x64xf32> to vector<128x64xf32>
    %cst_164 = arith.constant dense<0.000000e+00> : vector<4x64xf32>
    %177 = tpu.matmul %174, %176, %cst_164 {dimension_numbers = #tpu.dot_dimension_numbers<[1], [0], [0], [1], [0, 0, 1, 1], [], []>} : vector<4x128xf32>, vector<128x64xf32>, vector<4x64xf32> -> vector<4x64xf32>
    %178 = arith.addf %173, %177 : vector<4x64xf32>
    %c2_165 = arith.constant 2 : index
    %c0_166 = arith.constant 0 : index
    %179 = tpu.strided_load %arg23[%c2_165, %c0_166] {strides = array<i32: 6, 1>} : memref<24x128xf32, #tpu.memory_space<vmem>>, vector<4x128xf32>
    %c1_167 = arith.constant 1 : index
    %c0_168 = arith.constant 0 : index
    %c0_169 = arith.constant 0 : index
    %180 = vector.load %arg15[%c1_167, %c0_168, %c0_169] : memref<4x128x64xf32, #tpu.memory_space<vmem>>, vector<1x128x64xf32>
    %181 = vector.shape_cast %180 : vector<1x128x64xf32> to vector<128x64xf32>
    %cst_170 = arith.constant dense<0.000000e+00> : vector<4x64xf32>
    %182 = tpu.matmul %179, %181, %cst_170 {dimension_numbers = #tpu.dot_dimension_numbers<[1], [0], [0], [1], [0, 0, 1, 1], [], []>} : vector<4x128xf32>, vector<128x64xf32>, vector<4x64xf32> -> vector<4x64xf32>
    %183 = arith.addf %178, %182 : vector<4x64xf32>
    %c3_171 = arith.constant 3 : index
    %c0_172 = arith.constant 0 : index
    %184 = tpu.strided_load %arg23[%c3_171, %c0_172] {strides = array<i32: 6, 1>} : memref<24x128xf32, #tpu.memory_space<vmem>>, vector<4x128xf32>
    %c2_173 = arith.constant 2 : index
    %c0_174 = arith.constant 0 : index
    %c0_175 = arith.constant 0 : index
    %185 = vector.load %arg15[%c2_173, %c0_174, %c0_175] : memref<4x128x64xf32, #tpu.memory_space<vmem>>, vector<1x128x64xf32>
    %186 = vector.shape_cast %185 : vector<1x128x64xf32> to vector<128x64xf32>
    %cst_176 = arith.constant dense<0.000000e+00> : vector<4x64xf32>
    %187 = tpu.matmul %184, %186, %cst_176 {dimension_numbers = #tpu.dot_dimension_numbers<[1], [0], [0], [1], [0, 0, 1, 1], [], []>} : vector<4x128xf32>, vector<128x64xf32>, vector<4x64xf32> -> vector<4x64xf32>
    %188 = arith.addf %183, %187 : vector<4x64xf32>
    %c4_177 = arith.constant 4 : index
    %c0_178 = arith.constant 0 : index
    %189 = tpu.strided_load %arg23[%c4_177, %c0_178] {strides = array<i32: 6, 1>} : memref<24x128xf32, #tpu.memory_space<vmem>>, vector<4x128xf32>
    %c3_179 = arith.constant 3 : index
    %c0_180 = arith.constant 0 : index
    %c0_181 = arith.constant 0 : index
    %190 = vector.load %arg15[%c3_179, %c0_180, %c0_181] : memref<4x128x64xf32, #tpu.memory_space<vmem>>, vector<1x128x64xf32>
    %191 = vector.shape_cast %190 : vector<1x128x64xf32> to vector<128x64xf32>
    %cst_182 = arith.constant dense<0.000000e+00> : vector<4x64xf32>
    %192 = tpu.matmul %189, %191, %cst_182 {dimension_numbers = #tpu.dot_dimension_numbers<[1], [0], [0], [1], [0, 0, 1, 1], [], []>} : vector<4x128xf32>, vector<128x64xf32>, vector<4x64xf32> -> vector<4x64xf32>
    %193 = arith.addf %188, %192 : vector<4x64xf32>
    %c0_183 = arith.constant 0 : index
    %c0_184 = arith.constant 0 : index
    %194 = vector.load %arg16[%c0_183, %c0_184] : memref<1x64xf32, #tpu.memory_space<vmem>>, vector<1x64xf32>
    %195 = vector.broadcast %194 : vector<1x64xf32> to vector<4x64xf32>
    %196 = arith.addf %193, %195 : vector<4x64xf32>
    %cst_185 = arith.constant 0.000000e+00 : f32
    %197 = vector.broadcast %cst_185 : f32 to vector<4x64xf32>
    %198 = arith.maximumf %196, %197 : vector<4x64xf32>
    %c0_186 = arith.constant 0 : index
    %c0_187 = arith.constant 0 : index
    %199 = vector.load %arg17[%c0_186, %c0_187] : memref<64x128xf32, #tpu.memory_space<vmem>>, vector<64x128xf32>
    %cst_188 = arith.constant dense<0.000000e+00> : vector<4x128xf32>
    %200 = tpu.matmul %198, %199, %cst_188 {dimension_numbers = #tpu.dot_dimension_numbers<[1], [0], [0], [1], [0, 0, 1, 1], [], []>} : vector<4x64xf32>, vector<64x128xf32>, vector<4x128xf32> -> vector<4x128xf32>
    %c0_189 = arith.constant 0 : index
    %c0_190 = arith.constant 0 : index
    %201 = vector.load %arg18[%c0_189, %c0_190] : memref<1x128xf32, #tpu.memory_space<vmem>>, vector<1x128xf32>
    %202 = vector.broadcast %201 : vector<1x128xf32> to vector<4x128xf32>
    %203 = arith.addf %200, %202 : vector<4x128xf32>
    %cst_191 = arith.constant 0.000000e+00 : f32
    %204 = vector.broadcast %cst_191 : f32 to vector<4x128xf32>
    %205 = arith.subf %204, %203 : vector<4x128xf32>
    %206 = math.exp %205 : vector<4x128xf32>
    %cst_192 = arith.constant 1.000000e+00 : f32
    %207 = vector.broadcast %cst_192 : f32 to vector<4x128xf32>
    %208 = arith.addf %207, %206 : vector<4x128xf32>
    %cst_193 = arith.constant 1.000000e+00 : f32
    %209 = vector.broadcast %cst_193 : f32 to vector<4x128xf32>
    %210 = arith.divf %209, %208 : vector<4x128xf32>
    %c0_194 = arith.constant 0 : index
    %c0_195 = arith.constant 0 : index
    %c0_196 = arith.constant 0 : index
    %211 = vector.load %arg19[%c0_194, %c0_195, %c0_196] : memref<1x4x128xf32, #tpu.memory_space<vmem>>, vector<1x4x128xf32>
    %212 = vector.shape_cast %211 : vector<1x4x128xf32> to vector<4x128xf32>
    %213 = vector.shape_cast %210 : vector<4x128xf32> to vector<1x4x128xf32>
    tpu.vector_store %arg19[%c0_194, %c0_195, %c0_196], %213 {strides = array<i32>} : memref<1x4x128xf32, #tpu.memory_space<vmem>>, vector<1x4x128xf32>,
    return
  }
  func.func @transform_0(%arg0: i32) -> (i32, i32, i32) {
    %c0_i32 = arith.constant 0 : i32
    %c0_i32_0 = arith.constant 0 : i32
    %c0_i32_1 = arith.constant 0 : i32
    return %arg0, %c0_i32, %c0_i32_0 : i32, i32, i32
  }
  func.func @transform_1(%arg0: i32) -> (i32, i32) {
    %c0_i32 = arith.constant 0 : i32
    %c0_i32_0 = arith.constant 0 : i32
    %c0_i32_1 = arith.constant 0 : i32
    return %c0_i32, %c0_i32_0 : i32, i32
  }
  func.func @transform_2(%arg0: i32) -> (i32, i32) {
    %c0_i32 = arith.constant 0 : i32
    %c0_i32_0 = arith.constant 0 : i32
    %c0_i32_1 = arith.constant 0 : i32
    return %c0_i32, %c0_i32_0 : i32, i32
  }
  func.func @transform_3(%arg0: i32) -> (i32, i32) {
    %c0_i32 = arith.constant 0 : i32
    %c0_i32_0 = arith.constant 0 : i32
    %c0_i32_1 = arith.constant 0 : i32
    return %c0_i32, %c0_i32_0 : i32, i32
  }
  func.func @transform_4(%arg0: i32) -> (i32, i32, i32) {
    %c0_i32 = arith.constant 0 : i32
    %c0_i32_0 = arith.constant 0 : i32
    %c0_i32_1 = arith.constant 0 : i32
    %c0_i32_2 = arith.constant 0 : i32
    return %c0_i32, %c0_i32_0, %c0_i32_1 : i32, i32, i32
  }
  func.func @transform_5(%arg0: i32) -> (i32, i32) {
    %c0_i32 = arith.constant 0 : i32
    %c0_i32_0 = arith.constant 0 : i32
    %c0_i32_1 = arith.constant 0 : i32
    return %c0_i32, %c0_i32_0 : i32, i32
  }
  func.func @transform_6(%arg0: i32) -> (i32, i32, i32) {
    %c0_i32 = arith.constant 0 : i32
    %c0_i32_0 = arith.constant 0 : i32
    %c0_i32_1 = arith.constant 0 : i32
    %c0_i32_2 = arith.constant 0 : i32
    return %c0_i32, %c0_i32_0, %c0_i32_1 : i32, i32, i32
  }
  func.func @transform_7(%arg0: i32) -> (i32, i32) {
    %c0_i32 = arith.constant 0 : i32
    %c0_i32_0 = arith.constant 0 : i32
    %c0_i32_1 = arith.constant 0 : i32
    return %c0_i32, %c0_i32_0 : i32, i32
  }
  func.func @transform_8(%arg0: i32) -> (i32, i32, i32) {
    %c0_i32 = arith.constant 0 : i32
    %c0_i32_0 = arith.constant 0 : i32
    %c0_i32_1 = arith.constant 0 : i32
    %c0_i32_2 = arith.constant 0 : i32
    return %c0_i32, %c0_i32_0, %c0_i32_1 : i32, i32, i32
  }
  func.func @transform_9(%arg0: i32) -> (i32, i32) {
    %c0_i32 = arith.constant 0 : i32
    %c0_i32_0 = arith.constant 0 : i32
    %c0_i32_1 = arith.constant 0 : i32
    return %c0_i32, %c0_i32_0 : i32, i32
  }
  func.func @transform_10(%arg0: i32) -> (i32, i32, i32) {
    %c0_i32 = arith.constant 0 : i32
    %c0_i32_0 = arith.constant 0 : i32
    %c0_i32_1 = arith.constant 0 : i32
    %c0_i32_2 = arith.constant 0 : i32
    return %c0_i32, %c0_i32_0, %c0_i32_1 : i32, i32, i32
  }
  func.func @transform_11(%arg0: i32) -> (i32, i32) {
    %c0_i32 = arith.constant 0 : i32
    %c0_i32_0 = arith.constant 0 : i32
    %c0_i32_1 = arith.constant 0 : i32
    return %c0_i32, %c0_i32_0 : i32, i32
  }
  func.func @transform_12(%arg0: i32) -> (i32, i32, i32) {
    %c0_i32 = arith.constant 0 : i32
    %c0_i32_0 = arith.constant 0 : i32
    %c0_i32_1 = arith.constant 0 : i32
    %c0_i32_2 = arith.constant 0 : i32
    return %c0_i32, %c0_i32_0, %c0_i32_1 : i32, i32, i32
  }
  func.func @transform_13(%arg0: i32) -> (i32, i32) {
    %c0_i32 = arith.constant 0 : i32
    %c0_i32_0 = arith.constant 0 : i32
    %c0_i32_1 = arith.constant 0 : i32
    return %c0_i32, %c0_i32_0 : i32, i32
  }
  func.func @transform_14(%arg0: i32) -> (i32, i32, i32) {
    %c0_i32 = arith.constant 0 : i32
    %c0_i32_0 = arith.constant 0 : i32
    %c0_i32_1 = arith.constant 0 : i32
    %c0_i32_2 = arith.constant 0 : i32
    return %c0_i32, %c0_i32_0, %c0_i32_1 : i32, i32, i32
  }
  func.func @transform_15(%arg0: i32) -> (i32, i32) {
    %c0_i32 = arith.constant 0 : i32
    %c0_i32_0 = arith.constant 0 : i32
    %c0_i32_1 = arith.constant 0 : i32
    return %c0_i32, %c0_i32_0 : i32, i32
  }
  func.func @transform_16(%arg0: i32) -> (i32, i32) {
    %c0_i32 = arith.constant 0 : i32
    %c0_i32_0 = arith.constant 0 : i32
    %c0_i32_1 = arith.constant 0 : i32
    return %c0_i32, %c0_i32_0 : i32, i32
  }
  func.func @transform_17(%arg0: i32) -> (i32, i32) {
    %c0_i32 = arith.constant 0 : i32
    %c0_i32_0 = arith.constant 0 : i32
    %c0_i32_1 = arith.constant 0 : i32
    return %c0_i32, %c0_i32_0 : i32, i32
  }
  func.func @transform_18(%arg0: i32) -> (i32, i32, i32) {
    %c0_i32 = arith.constant 0 : i32
    %c0_i32_0 = arith.constant 0 : i32
    %c0_i32_1 = arith.constant 0 : i32
    return %arg0, %c0_i32, %c0_i32_0 : i32, i32, i32
  }
}

</mosaic_0001>

<bundles_post_ra>
// kernel: step_counter_cnn_forward.1
= control target key start
LH: loop header
LB: loop body
LE: loop exit
PB: predicated region body
PF: predicated region fallthrough
CT: control target
= control target key end

     0   :  { %s5107_s0 = inlined_call_operand.vmem [shape: f32[8,16,2], index: 0, kind: input, shape index: {}]   ;;  %s5108_s1 = inlined_call_operand.hbm [shape: f32[88,1], index: 1, kind: input, shape index: {}]   ;;  %s5109_s2 = inlined_call_operand.vmem [shape: f32[44,1], index: 2, kind: input, shape index: {}]   ;;  %s5110_s3 = inlined_call_operand.hbm [shape: f32[22,1], index: 3, kind: input, shape index: {}]   ;;  %s5111_s4 = inlined_call_operand.hbm [shape: f32[7,2,32], index: 4, kind: input, shape index: {}]   ;;  %s5112_s5 = inlined_call_operand.hbm [shape: f32[1,32], index: 5, kind: input, shape index: {}]   ;;  %s5113_s6 = inlined_call_operand.vmem [shape: f32[3,32,64], index: 6, kind: input, shape index: {}]   ;;  %s5114_s7 = inlined_call_operand.hbm [shape: f32[1,64], index: 7, kind: input, shape index: {}]   ;;  %s5115_s8 = inlined_call_operand.vmem [shape: f32[3,64,64], index: 8, kind: input, shape index: {}]   ;;  %s5116_s9 = inlined_call_operand.hbm [shape: f32[1,64], index: 9, kind: input, shape index: {}]   ;;  %s5117_s10 = inlined_call_operand.vmem [shape: f32[3,64,128], index: 10, kind: input, shape index: {}]   ;;  %s5118_s11 = inlined_call_operand.hbm [shape: f32[1,128], index: 11, kind: input, shape index: {}]   ;;  %s5119_s12 = inlined_call_operand.vmem [shape: f32[3,128,128], index: 12, kind: input, shape index: {}]   ;;  %s5120_s13 = inlined_call_operand.hbm [shape: f32[1,128], index: 13, kind: input, shape index: {}]   ;;  %s5121_s14 = inlined_call_operand.vmem [shape: f32[4,128,64], index: 14, kind: input, shape index: {}]   ;;  %s5122_s15 = inlined_call_operand.hbm [shape: f32[1,64], index: 15, kind: input, shape index: {}]   ;;  %s5123_s16 = inlined_call_operand.hbm [shape: f32[64,128], index: 16, kind: input, shape index: {}]   ;;  %s5124_s17 = inlined_call_operand.hbm [shape: f32[1,128], index: 17, kind: input, shape index: {}]   ;;  %s5125_s18 = inlined_call_operand.hbm [shape: f32[2,4,128], index: 18, kind: output, shape index: {}]  }
   0x1   :  { %5139 = sst [smem:[#allocation40_spill]] %s5107_s0 }
   0x2   :  { %5140 = sst [smem:[#allocation41_spill]] %s5108_s1 }
   0x3   :  { %5141 = sst [smem:[#allocation42_spill]] %s5109_s2 }
   0x4   :  { %5142 = sst [smem:[#allocation43_spill]] %s5110_s3 }
   0x5   :  { %5143 = sst [smem:[#allocation44_spill]] %s5111_s4 }
   0x6   :  { %5144 = sst [smem:[#allocation45_spill]] %s5112_s5 }
   0x7   :  { %5145 = sst [smem:[#allocation46_spill]] %s5125_s18 }
   0x8   :  { %23 = vsyncpa [#allocation7], 0 }
   0x9   :  { %24 = vsyncpa [#allocation10], 0 }
   0xa   :  { %25 = vsyncpa [#allocation13], 0 }
   0xb   :  { %26 = vsyncpa [#allocation16], 0 }
   0xc   :  { %27 = vsyncpa [#allocation19], 0 }
   0xd   :  { %28 = vsyncpa [#allocation22], 0 }
   0xe   :  { %29 = vsyncpa [#allocation8], 0 }
   0xf   :  { %31 = vsyncpa [#allocation8 + $0x1], 0  ;;  %s3968_s27 = smov 0   ;;  %s3970_s28 = smov 0  }
  0x10   :  { %s3972_s29 = smov 0   ;;  %s3974_s30 = smov 0  }
  0x11 LB: > { %5146 = sst [smem:[#allocation32_spill]] %s3842_s27  ;;  %s3989_s0 = sadd.s32 4294967295, %s3854_s30   ;;  %s3854_s30 = sphi %s3974_s30, %s5171_s30   ;;  %s3850_s29 = sphi %s3972_s29, %s5174_s29   ;;  %s3846_s28 = sphi %s3970_s28, %s5173_s28   ;;  %s3842_s27 = sphi %s3968_s27, %s5172_s27  }
  0x12   : > { %5147 = sst [smem:[#allocation33_spill]] %s3846_s28  ;;  %s2972_s19 = sadd.s32 4294967294, %s3854_s30  }
  0x13   : > { %5148 = sst [smem:[#allocation34_spill]] %s3850_s29  ;;  %s3993_s1 = sadd.s32 1, %s3854_s30  }
  0x14   : > { %5149 = sst [smem:[#allocation35_spill]] %s3854_s30  ;;  %s427_s20 = sadd.s32 1, %s3850_s29 }
  0x15   : > { %5150 = sst [smem:[#allocation36_spill]] %s3993_s1  ;;  %s424_s21 = ssub.s32 %s3854_s30, %s3993_s1 }
  0x16   : > { %p437_p0 = scmp.ne.s32.totalorder %s3850_s29, %s3846_s28  ;;  %p425_p1 = scmp.eq.s32.totalorder %s424_s21, 0 }
  0x17   : > { %p438_p2 = scmp.eq.s32.totalorder %s3989_s0, 1  ;;  %p443_p3 = scmp.ne.s32.totalorder %s3846_s28, %s3842_s27 }
  0x18   : > { %p444_p4 = scmp.eq.s32.totalorder %s2972_s19, 1  ;;  %p2973_p7 = scmp.ge.s32.totalorder %s3854_s30, 1 }
  0x19   : > { %s4004_s22 = scalar_select %p425_p1, %s3850_s29, %s427_s20  }
  0x1a   : > { %p4006_p5 = por %p438_p2, %p437_p0  ;;  %p4010_p6 = por %p444_p4, %p443_p3 }
  0x1b   : > { %5151 = sst [smem:[#allocation37_spill]] %s4004_s22  ;;  %p451_p8 = scmp.lt.s32.totalorder %s3854_s30, 3 }
  0x1c   : > { %s5152_s2 = scalar_select %p4006_p5, 1, 0 }
  0x1d   : > { %s5154_s23 = scalar_select %p4010_p6, 1, 0 }
  0x1e   : > { %5153 = sst [smem:[#allocation38_spill]] %s5152_s2  ;;  %p3352_p9 = scmp.eq.s32.totalorder %s3989_s0, 0 }
  0x1f   : > { %5155 = sst [smem:[#allocation39_spill]] %s5154_s23  ;;  %p4017_p10 = pnand %p2973_p7, %p451_p8 }
  0x20   : > { %s5157_s3 = sld [smem:[#allocation43_spill]]  ;;  %s3856_s1 = smov [#allocation9]  }
  0x21   : > { %p3314_p11 = pneg %p4017_p10  ;;  %s5158_s5 = sld [smem:[#allocation45_spill]] }
  0x22   : > { %s481_s23 = sshll.u32 %s3856_s1, 4  ;;  %s5137_s25 = smov 128   ;;  %s482_s23 = int_to_ptr.vmem [resolvable:$true] %s481_s23 }
  0x23   : > { %p4031_p12 = pnand %p3352_p9, %p3314_p11  ;;  %s3858_s26 = smov 8  }
  0x24   : > { %s3859_s20 = smov [#allocation12]   ;;  %s538_s27 = sshll.u32 %s5116_s9, 4  ;;  %s539_s27 = int_to_ptr.hbm [resolvable:$true] %s538_s27 }
  0x25   : > { %s510_s21 = sshll.u32 %s3859_s20, 4  ;;  %s568_s2 = sshll.u32 %s5120_s13, 4  ;;  %s511_s21 = int_to_ptr.vmem [resolvable:$true] %s510_s21  ;;  %s569_s2 = int_to_ptr.hbm [resolvable:$true] %s568_s2 }
  0x26   : > { %s479_s19 = sshll.u32 %s5157_s3, 4  ;;  %s3860_s18 = smov [#allocation15]   ;;  %s480_s19 = int_to_ptr.hbm [resolvable:$true] %s479_s19 }
  0x27   : > { %s508_s22 = sshll.u32 %s5158_s5, 4  ;;  %s540_s28 = sshll.u32 %s3860_s18, 4  ;;  %s509_s22 = int_to_ptr.hbm [resolvable:$true] %s508_s22  ;;  %s541_s28 = int_to_ptr.vmem [resolvable:$true] %s540_s28 }
  0x28   : > { %3320 = dma.hbm_to_vmem [thread:$0]  (!%p4031_p12), %s480_s19, 384, %s482_s23, [#allocation10], %s5137_s25, %s5137_s25, %s3858_s26  }
  0x29   : > { %3326 = dma.hbm_to_vmem [thread:$0]  (!%p4031_p12), %s509_s22, 16, %s511_s21, [#allocation13]  }
  0x2a   : > { %3332 = dma.hbm_to_vmem [thread:$0]  (!%p4031_p12), %s539_s27, 16, %s541_s28, [#allocation16]  }
  0x2b   : > { %s3861_s23 = smov [#allocation18]   ;;  %s594_s20 = sshll.u32 %s5123_s16, 4  ;;  %s595_s20 = int_to_ptr.hbm [resolvable:$true] %s594_s20 }
  0x2c   : > { %s570_s19 = sshll.u32 %s3861_s23, 4  ;;  %s5160_s21 = sld [smem:[#allocation41_spill]]  ;;  %s571_s19 = int_to_ptr.vmem [resolvable:$true] %s570_s19 }
  0x2d   : > { %3338 = dma.hbm_to_vmem [thread:$0]  (!%p4031_p12), %s569_s2, 16, %s571_s19, [#allocation19]  }
  0x2e   : > { %s3862_s18 = smov [#allocation21]   ;;  %s5161_s27 = smov 128  }
  0x2f   : > { %s596_s25 = sshll.u32 %s3862_s18, 4  ;;  %s3863_s28 = smov [#allocation6]   ;;  %s597_s25 = int_to_ptr.vmem [resolvable:$true] %s596_s25 }
  0x30   : > { %3344 = dma.hbm_to_vmem [thread:$0]  (!%p4031_p12), %s595_s20, 1024, %s597_s25, [#allocation22], %s5161_s27, %s5161_s27, %s3858_s26  }
  0x31   : > { %s464_s23 = sshll.u32 %s3863_s28, 4  ;;  %s5162_s4 = sld [smem:[#allocation44_spill]]  ;;  %s465_s23 = int_to_ptr.vmem [resolvable:$true] %s464_s23 }
  0x32   : > { %s462_s1 = sshll.u32 %s5160_s21, 4  ;;  %s3864_s19 = smov [#allocation11]   ;;  %s463_s1 = int_to_ptr.hbm [resolvable:$true] %s462_s1 }
  0x33   : > { %3317 = dma.hbm_to_vmem [thread:$0]  (!%p4031_p12), %s463_s1, 1408, %s465_s23, [#allocation7], %s5161_s27, %s5161_s27, %s3858_s26  }
  0x34   : > { %s495_s30 = sshll.u32 %s3864_s19, 4  ;;  %s523_s25 = sshll.u32 %s5114_s7, 4  ;;  %s496_s30 = int_to_ptr.vmem [resolvable:$true] %s495_s30  ;;  %s524_s25 = int_to_ptr.hbm [resolvable:$true] %s523_s25 }
  0x35   : > { %s3865_s20 = smov 32   ;;  %s3866_s18 = smov 2  }
  0x36   : > { %s3867_s28 = smov [#allocation14]   ;;  %s553_s26 = sshll.u32 %s5118_s11, 4  ;;  %s554_s26 = int_to_ptr.hbm [resolvable:$true] %s553_s26 }
  0x37   : > { %s493_s2 = sshll.u32 %s5162_s4, 4  ;;  %s525_s3 = sshll.u32 %s3867_s28, 4  ;;  %s494_s2 = int_to_ptr.hbm [resolvable:$true] %s493_s2  ;;  %s526_s3 = int_to_ptr.vmem [resolvable:$true] %s525_s3 }
  0x38   : > { %3323 = dma.hbm_to_vmem [thread:$0]  (!%p4031_p12), %s494_s2, 224, %s496_s30, [#allocation10], %s3865_s20, %s3865_s20, %s3866_s18  }
  0x39   : > { %3329 = dma.hbm_to_vmem [thread:$0]  (!%p4031_p12), %s524_s25, 16, %s526_s3, [#allocation13]  }
  0x3a   : > { %s583_s23 = sshll.u32 %s5122_s15, 4  ;;  %s3868_s19 = smov [#allocation17]   ;;  %s584_s23 = int_to_ptr.hbm [resolvable:$true] %s583_s23 }
  0x3b   : > { %s555_s22 = sshll.u32 %s3868_s19, 4  ;;  %s3869_s2 = smov [#allocation20]   ;;  %s556_s22 = int_to_ptr.vmem [resolvable:$true] %s555_s22 }
  0x3c   : > { %3335 = dma.hbm_to_vmem [thread:$0]  (!%p4031_p12), %s554_s26, 16, %s556_s22, [#allocation16]  }
  0x3d   : > { %s585_s30 = sshll.u32 %s3869_s2, 4  ;;  %s609_s20 = sshll.u32 %s5124_s17, 4  ;;  %s586_s30 = int_to_ptr.vmem [resolvable:$true] %s585_s30  ;;  %s610_s20 = int_to_ptr.hbm [resolvable:$true] %s609_s20 }
  0x3e   : > { %3341 = dma.hbm_to_vmem [thread:$0]  (!%p4031_p12), %s584_s23, 16, %s586_s30, [#allocation19]  }
  0x3f   : > { %s3870_s25 = smov [#allocation23]   ;;  %634 = sbr.rel (%p4017_p10) target bundleno = 1414 (0x586), region = 92 }
  0x40   : > { %s611_s18 = sshll.u32 %s3870_s25, 4  ;;  %s612_s18 = int_to_ptr.vmem [resolvable:$true] %s611_s18 }
  0x41   : > { %3347 = dma.hbm_to_vmem [thread:$0]  (!%p4031_p12), %s610_s20, 16, %s612_s18, [#allocation22]  }
  0x44   : > { %3813 = dma.done.wait (%p3352_p9), [#allocation7], 1408  }
  0x45   : > { %3815 = vsyncadd (%p3352_p9), [#allocation7], 4294965888 }
  0x46   : > { %3817 = dma.done.wait (%p3352_p9), [#allocation10], 608  }
  0x47   : > { %3819 = vsyncadd (%p3352_p9), [#allocation10], 4294966688 }
  0x48   : > { %3821 = dma.done.wait (%p3352_p9), [#allocation13], 32  }
  0x49   : > { %3823 = vsyncadd (%p3352_p9), [#allocation13], 4294967264 }
  0x4a   : > { %3825 = dma.done.wait (%p3352_p9), [#allocation16], 32  }
  0x4b   : > { %3827 = vsyncadd (%p3352_p9), [#allocation16], 4294967264 }
  0x4c   : > { %3829 = dma.done.wait (%p3352_p9), [#allocation19], 32  }
  0x4d   : > { %3831 = vsyncadd (%p3352_p9), [#allocation19], 4294967264 }
  0x4e   : > { %3833 = dma.done.wait (%p3352_p9), [#allocation22], 1040  }
  0x4f   : > { %3835 = vsyncadd (%p3352_p9), [#allocation22], 4294966256  ;;  %s4120_s29 = sshll.u32 %s3989_s0, 2  ;;  %vm767_vm0 = vcmask 15360   ;;  %v3871_v0 = vmov 0.0   ;;  %vm857_vm1 = vcmask 1041408  }
  0x50   : > { %p741_p13 = scmp.lt.s32.totalorder %s4120_s29, 7  ;;  %768 = vst.msk [vmem:[#allocation2] sm:$0xff] %vm767_vm0, %v3871_v0  ;;  %s5163_s5 = sld [smem:[#allocation40_spill]]  ;;  %v823_v1 = vld [vmem:[#allocation11 + $0x2] sm:$0x3]  ;;  %v3872_v58 = vmov 0  }
  0x51   : > { %769 = vst.msk [vmem:[#allocation2 + $0x8] sm:$0xff] %vm767_vm0, %v3871_v0  ;;  %v810_v2 = vld [vmem:[#allocation11] sm:$0x3]  ;;  %3008 = vmatpush.msk.msra.mxu0 %vm857_vm1, %v823_v1  ;;  %3266 = vmatpush.msk.msra.mxu3 %vm857_vm1, %v823_v1  ;;  %v1009_v4 = vld [vmem:[#allocation11 + $0x4] sm:$0x3]  ;;  %v747_v1 = vld [vmem:[#allocation6] sm:$0xff] }
  0x52   : > { %s742_s24 = scalar_select %p741_p13, %s4120_s29, 7  ;;  %770 = vst.msk [vmem:[#allocation2 + $0x10] sm:$0xff] %vm767_vm0, %v3871_v0  ;;  %3267 = vmatpush.msk.msra.mxu2 %vm857_vm1, %v810_v2  ;;  %3020 = vmatpush.msk.msra.mxu1 %vm857_vm1, %v810_v2  ;;  %v1119_v5 = vld [vmem:[#allocation11 + $0x6] sm:$0x3]  ;;  %v1229_v6 = vld [vmem:[#allocation11 + $0x8] sm:$0x3] }
  0x53   : > { %771 = vst.msk [vmem:[#allocation2 + $0x18] sm:$0xff] %vm767_vm0, %v3871_v0  ;;  %3044 = vmatpush.msk.msrb.mxu3 %vm857_vm1, %v1119_v5  ;;  %v1339_v7 = vld [vmem:[#allocation11 + $0xa] sm:$0x3]  ;;  %3056 = vmatpush.msk.msrb.mxu0 %vm857_vm1, %v1229_v6  ;;  %v1449_v15 = vld [vmem:[#allocation11 + $0xc] sm:$0x3]  ;;  %v749_v63 = vld [vmem:[#allocation6 + $0x10] sm:$0xff] }
  0x54   : > { %s3265_s0 = sshll.u32 %s742_s24, 4  ;;  %772 = vst.msk [vmem:[#allocation2 + $0x20] sm:$0xff] %vm767_vm0, %v3871_v0  ;;  %3032 = vmatpush.msk.msrb.mxu2 %vm857_vm1, %v1009_v4  ;;  %3068 = vmatpush.msk.msrb.mxu1 %vm857_vm1, %v1339_v7  ;;  %v750_v6 = vld [vmem:[#allocation6 + $0x18] sm:$0xff]  ;;  %v748_v7 = vld [vmem:[#allocation6 + $0x8] sm:$0xff]  ;;  %s5164_s23 = sld [smem:[#allocation42_spill]]  ;;  %vm1639_vm2 = vcmask 253952  }
  0x55   : > { %773 = vst.msk [vmem:[#allocation2 + $0x28] sm:$0xff] %vm767_vm0, %v3871_v0  ;;  %3425 = vset.pattern.permute.xlu1 %v3872_v58  ;;  %3424 = vset.pattern.permute.xlu0 %v3872_v58  ;;  %vm1641_vm3 = vcmask 261120   ;;  %vm1742_vm4 = vcmask 1040384   ;;  %vm1770_vm5 = vcmask 1046528   ;;  %vm1881_vm6 = vcmask 1045504   ;;  %s5166_s2 = sld [smem:[#allocation46_spill]] }
  0x56   : > { %s4137_s26 = scalar_lea.vmem %s5163_s5, %s3265_s0  ;;  %774 = vst.msk [vmem:[#allocation2 + $0x30] sm:$0xff] %vm767_vm0, %v3871_v0  ;;  %3426 = vset.pattern.permute.xlu2 %v3872_v58  ;;  %1585 = vperm.xlu1 %3425, %v749_v63   ;;  %v764_v63 = vld [vmem:[#allocation9] sm:$0xff]  ;;  %vm1757_vm7 = vcmask 1044480   ;;  %vm2019_vm8 = vcmask 523264   ;;  %vm2209_vm9 = vcmask 516096   ;;  %vm2216_vm10 = vcmask 519168   ;;  %vm3193_vm11 = vmneg %vm1742_vm4 }
  0x57   : > { %v780_v3 = vld [vmem:[%s4137_s26] sm:$0xff]  ;;  %775 = vst.msk [vmem:[#allocation2 + $0x38] sm:$0xff] %vm767_vm0, %v3871_v0  ;;  %v3006_v8 = vld [vmem:[%s4137_s26 + $0x30] sm:$0xff]  ;;  %v3007_v9 = vld [vmem:[%s4137_s26 + $0x38] sm:$0xff]  ;;  %1575 = vperm.xlu0 %3424, %v747_v1  }
  0x58   : > { %782 = vst.msk [vmem:[#allocation2 + $0x3] sm:$0xff] %vm767_vm0, %v780_v3  ;;  %v781_v10 = vld [vmem:[%s4137_s26 + $0x8] sm:$0xff]  ;;  %v3002_v11 = vld [vmem:[%s4137_s26 + $0x10] sm:$0xff]  ;;  %v3003_v14 = vld [vmem:[%s4137_s26 + $0x18] sm:$0xff] }
  0x59   : > { %776 = vst.msk [vmem:[#allocation2 + $0x40] sm:$0xff] %vm767_vm0, %v3871_v0  ;;  %v3004_v24 = vld [vmem:[%s4137_s26 + $0x20] sm:$0xff]  ;;  %v3005_v29 = vld [vmem:[%s4137_s26 + $0x28] sm:$0xff]  ;;  %s5165_s26 = sld [smem:[#allocation33_spill]] }
  0x5a   : > { %777 = vst.msk [vmem:[#allocation2 + $0x48] sm:$0xff] %vm767_vm0, %v3871_v0  ;;  %v1109_v31 = vld [vmem:[#allocation2 + $0x13] sm:$0xff] }
  0x5b   : > { %778 = vst.msk [vmem:[#allocation2 + $0x50] sm:$0xff] %vm767_vm0, %v3871_v0  ;;  %s2801_s30 = scalar_lea.hbm %s5166_s2, %s4120_s29  ;;  %s3788_s3 = scalar_lea.hbm %s5166_s2, 8 }
  0x5c   : > { %779 = vst.msk [vmem:[#allocation2 + $0x58] sm:$0xff] %vm767_vm0, %v3871_v0  ;;  %s2805_s20 = sshll.u32 %s2801_s30, 4  ;;  %s2806_s20 = int_to_ptr.hbm [resolvable:$true] %s2805_s20 }
  0x5d   : > { %797 = vst.msk [vmem:[#allocation2 + $0x4b] sm:$0xff] %vm767_vm0, %v3006_v8  ;;  %v1112_v43 = vld [vmem:[#allocation2 + $0x2b] sm:$0xff]  ;;  %s3782_s29 = sshra.s32 %s2806_s20, 4  ;;  %s3783_s29 = int_to_ptr.hbm [resolvable:$true] %s3782_s29 }
  0x5e   : > { %798 = vst.msk [vmem:[#allocation2 + $0x53] sm:$0xff] %vm767_vm0, %v3007_v9  ;;  %1590 = vperm.xlu1 %3425, %v750_v6   ;;  %s3784_s24 = scalar_lea.hbm %s3783_s29, 4  ;;  %p3789_p3 = scmp.lt.s32.totalorder %s3783_s29, %s5166_s2 }
  0x5f   : > { %v811_v12 = vld [vmem:[#allocation2 + $0x1] sm:$0xff]  ;;  %783 = vst.msk [vmem:[#allocation2 + $0xb] sm:$0xff] %vm767_vm0, %v781_v10  ;;  %1580 = vperm.xlu0 %3424, %v748_v7   ;;  %s737_s1 = sand.u32 1, %s5165_s26   ;;  %p3785_p0 = scmp.ne.s32.totalorder %s3783_s29, %s3784_s24 }
  0x60   : > { %v799_v13 = vld [vmem:[#allocation2] sm:$0xff]  ;;  %3009 = vmatmul.msk.f32.vlgmr.msra.gmra.mxu0 %vm767_vm0, %v811_v12  ;;  %787 = vst.msk [vmem:[#allocation2 + $0x1b] sm:$0xff] %vm767_vm0, %v3002_v11  ;;  %v759_v11 = vld [vmem:[%s5164_s23 + $0x8] sm:$0xff]  ;;  %s2998_s27 = sshll.u32 %s737_s1, 2  ;;  %s2791_s18 = scalar_lea.sflag [#allocation8], %s737_s1 }
  0x61   : > { %3021 = vmatmul.msk.f32.vlgmr.msra.gmra.mxu1 %vm767_vm0, %v799_v13  ;;  %788 = vst.msk [vmem:[#allocation2 + $0x23] sm:$0xff] %vm767_vm0, %v3003_v14  ;;  %v997_v20 = vld [vmem:[#allocation2 + $0x2] sm:$0xff]  ;;  %s739_s21 = scalar_lea.vmem [#allocation24], %s2998_s27  ;;  %p3786_p1 = pnand %p3785_p0, %p4006_p5 }
  0x62   : > { %v1107_v21 = vld [vmem:[#allocation2 + $0x3] sm:$0xff]  ;;  %792 = vst.msk [vmem:[#allocation2 + $0x33] sm:$0xff] %vm767_vm0, %v3004_v24  ;;  %s2803_s4 = sshll.u32 %s739_s21, 4  ;;  %p3790_p4 = scmp.lt.s32.totalorder %s3788_s3, %s3784_s24  ;;  %s2804_s4 = int_to_ptr.vmem [resolvable:$true] %s2803_s4 }
  0x63   : > { %793 = vst.msk [vmem:[#allocation2 + $0x3b] sm:$0xff] %vm767_vm0, %v3005_v29  ;;  %v1115_v55 = vld [vmem:[#allocation2 + $0x43] sm:$0xff]  ;;  %p3787_p2 = pneg %p3786_p1 }
  0x64   : > { %v820_v52 = vld [vmem:[#allocation2 + $0x49] sm:$0xff]  ;;  %v758_v12 = vld [vmem:[%s5164_s23] sm:$0xff]  ;;  %1640 = vst.msk [vmem:[#allocation3] sm:$0x1] %vm1639_vm2, %v3871_v0  ;;  %p3791_p7 = por %p3790_p4, %p3789_p3 }
  0x65   : > { %v821_v16 = vld [vmem:[#allocation2 + $0x51] sm:$0xff]  ;;  %v808_v53 = vld [vmem:[#allocation2 + $0x48] sm:$0xff]  ;;  %2210 = vst.msk [vmem:[#allocation4] sm:$0x1] %vm2209_vm9, %v3871_v0 }
  0x66   : > { %v809_v17 = vld [vmem:[#allocation2 + $0x50] sm:$0xff]  ;;  %3019 = vmatmul.msk.f32.vlgmr.msra.gmra.mxu3 %vm767_vm0, %v821_v16  ;;  %v800_v19 = vld [vmem:[#allocation2 + $0x8] sm:$0xff]  ;;  %1707 = vperm.xlu1 %3425, %v759_v11   ;;  %p3792_p8 = pnand %p3791_p7, %p3787_p2 }
  0x67   : > { %3031 = vmatmul.msk.f32.vlgmr.msra.gmra.mxu2 %vm767_vm0, %v809_v17  ;;  %v812_v18 = vld [vmem:[#allocation2 + $0x9] sm:$0xff]  ;;  %v813_v22 = vld [vmem:[#allocation2 + $0x11] sm:$0xff]  ;;  %v814_v27 = vld [vmem:[#allocation2 + $0x19] sm:$0xff]  ;;  %1702 = vperm.xlu0 %3424, %v758_v12  }
  0x68   : > { %3010 = vmatmul.msk.f32.gmra.mxu0 %vm767_vm0, %v812_v18  ;;  %3080 = vmatpush.msk.msra.mxu2 %vm857_vm1, %v1449_v15  ;;  %v801_v23 = vld [vmem:[#allocation2 + $0x10] sm:$0xff]  ;;  %v802_v28 = vld [vmem:[#allocation2 + $0x18] sm:$0xff]  ;;  %v815_v32 = vld [vmem:[#allocation2 + $0x21] sm:$0xff] }
  0x69   : > { %3022 = vmatmul.msk.f32.gmra.mxu1 %vm767_vm0, %v800_v19  ;;  %v998_v25 = vld [vmem:[#allocation2 + $0xa] sm:$0xff]  ;;  %v999_v30 = vld [vmem:[#allocation2 + $0x12] sm:$0xff]  ;;  %v803_v33 = vld [vmem:[#allocation2 + $0x20] sm:$0xff] }
  0x6a   : > { %v1108_v26 = vld [vmem:[#allocation2 + $0xb] sm:$0xff]  ;;  %v1000_v34 = vld [vmem:[#allocation2 + $0x1a] sm:$0xff]  ;;  %v1001_v38 = vld [vmem:[#allocation2 + $0x22] sm:$0xff] }
  0x6b   : > { %v1110_v35 = vld [vmem:[#allocation2 + $0x1b] sm:$0xff]  ;;  %v816_v36 = vld [vmem:[#allocation2 + $0x29] sm:$0xff]  ;;  %v817_v40 = vld [vmem:[#allocation2 + $0x31] sm:$0xff] }
  0x6c   : > { %v804_v37 = vld [vmem:[#allocation2 + $0x28] sm:$0xff]  ;;  %v805_v41 = vld [vmem:[#allocation2 + $0x30] sm:$0xff]  ;;  %v818_v44 = vld [vmem:[#allocation2 + $0x39] sm:$0xff] }
  0x6d   : > { %v1111_v39 = vld [vmem:[#allocation2 + $0x23] sm:$0xff]  ;;  %v806_v45 = vld [vmem:[#allocation2 + $0x38] sm:$0xff]  ;;  %v1116_v60 = vld [vmem:[#allocation2 + $0x4b] sm:$0xff] }
  0x6e   : > { %3045 = vmatmul.msk.f32.vlgmr.msrb.gmra.mxu3 %vm767_vm0, %v1107_v21  ;;  %v1002_v42 = vld [vmem:[#allocation2 + $0x2a] sm:$0xff]  ;;  %v1003_v46 = vld [vmem:[#allocation2 + $0x32] sm:$0xff]  ;;  %v819_v48 = vld [vmem:[#allocation2 + $0x41] sm:$0xff] }
  0x6f   : > { %3033 = vmatmul.msk.f32.vlgmr.msrb.gmra.mxu2 %vm767_vm0, %v997_v20  ;;  %v1113_v47 = vld [vmem:[#allocation2 + $0x33] sm:$0xff]  ;;  %v807_v49 = vld [vmem:[#allocation2 + $0x40] sm:$0xff]  ;;  %v1006_v59 = vld [vmem:[#allocation2 + $0x4a] sm:$0xff] }
  0x70   : > { %3011 = vmatmul.msk.f32.gmra.mxu0 %vm767_vm0, %v813_v22  ;;  %v1004_v50 = vld [vmem:[#allocation2 + $0x3a] sm:$0xff]  ;;  %v1005_v54 = vld [vmem:[#allocation2 + $0x42] sm:$0xff]  ;;  %v1218_v61 = vld [vmem:[#allocation2 + $0xc] sm:$0xff] }
  0x71   : > { %3023 = vmatmul.msk.f32.gmra.mxu1 %vm767_vm0, %v801_v23  ;;  %v1114_v51 = vld [vmem:[#allocation2 + $0x3b] sm:$0xff]  ;;  %v1217_v56 = vld [vmem:[#allocation2 + $0x4] sm:$0xff]  ;;  %v1328_v62 = vld [vmem:[#allocation2 + $0xd] sm:$0xff] }
  0x72   : > { %v1327_v57 = vld [vmem:[#allocation2 + $0x5] sm:$0xff]  ;;  %v1007_v2 = vld [vmem:[#allocation2 + $0x52] sm:$0xff]  ;;  %v1220_v9 = vld [vmem:[#allocation2 + $0x1c] sm:$0xff] }
  0x73   : > { %v1117_v3 = vld [vmem:[#allocation2 + $0x53] sm:$0xff]  ;;  %v1437_v8 = vld [vmem:[#allocation2 + $0x6] sm:$0xff]  ;;  %v1330_v10 = vld [vmem:[#allocation2 + $0x1d] sm:$0xff] }
  0x74   : > { %v1219_v4 = vld [vmem:[#allocation2 + $0x14] sm:$0xff]  ;;  %v1221_v14 = vld [vmem:[#allocation2 + $0x24] sm:$0xff]  ;;  %v1222_v19 = vld [vmem:[#allocation2 + $0x2c] sm:$0xff] }
  0x75   : > { %v1329_v5 = vld [vmem:[#allocation2 + $0x15] sm:$0xff]  ;;  %v1331_v15 = vld [vmem:[#allocation2 + $0x25] sm:$0xff]  ;;  %v1332_v20 = vld [vmem:[#allocation2 + $0x2d] sm:$0xff] }
  0x76   : > { %3046 = vmatmul.msk.f32.gmra.mxu3 %vm767_vm0, %v1108_v26  ;;  %v1438_v13 = vld [vmem:[#allocation2 + $0xe] sm:$0xff]  ;;  %v754_v17 = vld [vmem:[#allocation6 + $0x38] sm:$0xff]  ;;  %v1439_v18 = vld [vmem:[#allocation2 + $0x16] sm:$0xff] }
  0x77   : > { %3034 = vmatmul.msk.f32.gmra.mxu2 %vm767_vm0, %v998_v25  ;;  %v760_v16 = vld [vmem:[%s5164_s23 + $0x10] sm:$0xff]  ;;  %1610 = vperm.xlu0 %3424, %v754_v17   ;;  %v761_v21 = vld [vmem:[%s5164_s23 + $0x18] sm:$0xff]  ;;  %v763_v29 = vld [vmem:[%s5164_s23 + $0x28] sm:$0xf] }
  0x78   : > { %3012 = vmatmul.msk.f32.gmra.mxu0 %vm767_vm0, %v814_v27  ;;  %1712 = vperm.xlu1 %3425, %v760_v16   ;;  %v756_v22 = vld [vmem:[#allocation6 + $0x48] sm:$0xff]  ;;  %v1440_v23 = vld [vmem:[#allocation2 + $0x1e] sm:$0xff]  ;;  %v751_v27 = vld [vmem:[#allocation6 + $0x20] sm:$0xff] }
  0x79   : > { %3024 = vmatmul.msk.f32.gmra.mxu1 %vm767_vm0, %v802_v28  ;;  %v1223_v26 = vld [vmem:[#allocation2 + $0x34] sm:$0xff]  ;;  %1595 = vperm.xlu2 %3426, %v751_v27   ;;  %v3153_v0 = vld [vmem:[%s5117_s10 + $0x48] sm:$0xff] }
  0x7a   : > { %v1333_v28 = vld [vmem:[#allocation2 + $0x35] sm:$0xff] }
  0x7b   : > { %v1447_v7 = vld [vmem:[#allocation2 + $0x56] sm:$0xff] }
  0x7c   : > { %v3095_v12 = vld [vmem:[%s5113_s6 + $0x38] sm:$0xff] }
  0x7d   : > { %1806 = vmatpush.msra.mxu3 %v3095_v12 }
  0x7e   : > { %3047 = vmatmul.msk.f32.gmra.mxu3 %vm767_vm0, %v1109_v31  ;;  %v1441_v31 = vld [vmem:[#allocation2 + $0x26] sm:$0xff] }
  0x7f   : > { %3035 = vmatmul.msk.f32.gmra.mxu2 %vm767_vm0, %v999_v30  ;;  %1620 = vperm.xlu0 %3424, %v756_v22   ;;  %v762_v30 = vld [vmem:[%s5164_s23 + $0x20] sm:$0xff] }
  0x80   : > { %3013 = vmatmul.msk.f32.gmra.mxu0 %vm767_vm0, %v815_v32  ;;  %1717 = vperm.xlu1 %3425, %v761_v21  }
  0x81   : > { %3025 = vmatmul.msk.f32.gmra.mxu1 %vm767_vm0, %v803_v33  ;;  %v1224_v33 = vld [vmem:[#allocation2 + $0x3c] sm:$0xff] }
  0x86   : > { %3048 = vmatmul.msk.f32.gmra.mxu3 %vm767_vm0, %v1110_v35 }
  0x87   : > { %3036 = vmatmul.msk.f32.gmra.mxu2 %vm767_vm0, %v1000_v34  ;;  %1722 = vperm.xlu0 %3424, %v762_v30   ;;  %v752_v34 = vld [vmem:[#allocation6 + $0x28] sm:$0xff] }
  0x88   : > { %3014 = vmatmul.msk.f32.gmra.mxu0 %vm767_vm0, %v816_v36  ;;  %1727 = vperm.xlu1 %3425, %v763_v29   ;;  %v1334_v36 = vld [vmem:[#allocation2 + $0x3d] sm:$0xff]  ;;  %v3094_v29 = vld [vmem:[%s5113_s6 + $0x30] sm:$0xff] }
  0x89   : > { %3026 = vmatmul.msk.f32.gmra.mxu1 %vm767_vm0, %v804_v37  ;;  %1600 = vperm.xlu2 %3426, %v752_v34   ;;  %v766_v37 = vld [vmem:[#allocation9 + $0x10] sm:$0x3f] }
  0x8a   : > { %1807 = vmatpush.msra.mxu3 %v3094_v29  ;;  %v3110_v29 = vld [vmem:[%s5113_s6 + $0x50] sm:$0xff] }
  0x8e   : > { %3049 = vmatmul.msk.f32.gmra.mxu3 %vm767_vm0, %v1111_v39 }
  0x8f   : > { %3037 = vmatmul.msk.f32.gmra.mxu2 %vm767_vm0, %v1001_v38  ;;  %v765_v38 = vld [vmem:[#allocation9 + $0x8] sm:$0xff] }
  0x90   : > { %3015 = vmatmul.msk.f32.gmra.mxu0 %vm767_vm0, %v817_v40  ;;  %2391 = vperm.xlu1 %3425, %v766_v37   ;;  %v1442_v40 = vld [vmem:[#allocation2 + $0x2e] sm:$0xff] }
  0x91   : > { %3027 = vmatmul.msk.f32.gmra.mxu1 %vm767_vm0, %v805_v41  ;;  %2386 = vperm.xlu0 %3424, %v765_v38  }
  0x96   : > { %3050 = vmatmul.msk.f32.gmra.mxu3 %vm767_vm0, %v1112_v43  ;;  %v753_v43 = vld [vmem:[#allocation6 + $0x30] sm:$0xff] }
  0x97   : > { %3038 = vmatmul.msk.f32.gmra.mxu2 %vm767_vm0, %v1002_v42  ;;  %v1225_v42 = vld [vmem:[#allocation2 + $0x44] sm:$0xff]  ;;  %1605 = vperm.xlu2 %3426, %v753_v43  }
  0x98   : > { %3016 = vmatmul.msk.f32.gmra.mxu0 %vm767_vm0, %v818_v44  ;;  %v4344_v43 = vld [vmem:[#allocation12] ss:$0 sm:$0xff] }
  0x99   : > { %3028 = vmatmul.msk.f32.gmra.mxu1 %vm767_vm0, %v806_v45  ;;  %v1335_v45 = vld [vmem:[#allocation2 + $0x45] sm:$0xff] }
  0x9e   : > { %3051 = vmatmul.msk.f32.gmra.mxu3 %vm767_vm0, %v1113_v47  ;;  %v1443_v47 = vld [vmem:[#allocation2 + $0x36] sm:$0xff] }
  0x9f   : > { %3039 = vmatmul.msk.f32.gmra.mxu2 %vm767_vm0, %v1003_v46 }
  0xa0   : > { %3017 = vmatmul.msk.f32.gmra.mxu0 %vm767_vm0, %v819_v48 }
  0xa1   : > { %3029 = vmatmul.msk.f32.gmra.mxu1 %vm767_vm0, %v807_v49  ;;  %v1226_v49 = vld [vmem:[#allocation2 + $0x4c] sm:$0xff] }
  0xa6   : > { %3052 = vmatmul.msk.f32.gmra.mxu3 %vm767_vm0, %v1114_v51 }
  0xa7   : > { %3040 = vmatmul.msk.f32.gmra.mxu2 %vm767_vm0, %v1004_v50  ;;  %v755_v50 = vld [vmem:[#allocation6 + $0x40] sm:$0xff] }
  0xa8   : > { %3018 = vmatmul.msk.f32.gmra.mxu0 %vm767_vm0, %v820_v52  ;;  %v1336_v52 = vld [vmem:[#allocation2 + $0x4d] sm:$0xff]  ;;  %1615 = vperm.xlu2 %3426, %v755_v50  }
  0xa9   : > { %3030 = vmatmul.msk.f32.gmra.mxu1 %vm767_vm0, %v808_v53 }
  0xae   : > { %3053 = vmatmul.msk.f32.gmra.mxu3 %vm767_vm0, %v1115_v55 }
  0xaf   : > { %3041 = vmatmul.msk.f32.gmra.mxu2 %vm767_vm0, %v1005_v54  ;;  %v1444_v54 = vld [vmem:[#allocation2 + $0x3e] sm:$0xff] }
  0xb0   : > { %3057 = vmatmul.msk.f32.vlgmr.msrb.gmra.mxu0 %vm767_vm0, %v1217_v56  ;;  %v1227_v56 = vld [vmem:[#allocation2 + $0x54] sm:$0xff] }
  0xb1   : > { %3069 = vmatmul.msk.f32.vlgmr.msrb.gmra.mxu1 %vm767_vm0, %v1327_v57  ;;  %v757_v57 = vld [vmem:[#allocation6 + $0x50] sm:$0xff] }
  0xb2   : > { %1625 = vperm.xlu2 %3426, %v757_v57  }
  0xb6   : > { %3054 = vmatmul.msk.f32.gmra.mxu3 %vm767_vm0, %v1116_v60 }
  0xb7   : > { %3042 = vmatmul.msk.f32.gmra.mxu2 %vm767_vm0, %v1006_v59  ;;  %v1337_v59 = vld [vmem:[#allocation2 + $0x55] sm:$0xff] }
  0xb8   : > { %3058 = vmatmul.msk.f32.gmra.mxu0 %vm767_vm0, %v1218_v61  ;;  %v1445_v61 = vld [vmem:[#allocation2 + $0x46] sm:$0xff] }
  0xb9   : > { %3070 = vmatmul.msk.f32.gmra.mxu1 %vm767_vm0, %v1328_v62 }
  0xba   : > { %2381 = vperm.xlu2 %3426, %v764_v63  }
  0xbe   : > { %3055 = vmatmul.msk.f32.gmra.mxu3 %vm767_vm0, %v1117_v3  ;;  %v1446_v3 = vld [vmem:[#allocation2 + $0x4e] sm:$0xff] }
  0xbf   : > { %3043 = vmatmul.msk.f32.gmra.mxu2 %vm767_vm0, %v1007_v2 }
  0xc0   : > { %3059 = vmatmul.msk.f32.gmra.mxu0 %vm767_vm0, %v1219_v4 }
  0xc1   : > { %3071 = vmatmul.msk.f32.gmra.mxu1 %vm767_vm0, %v1329_v5 }
  0xc7   : > { %3081 = vmatmul.msk.f32.vlgmr.msra.gmra.mxu2 %vm767_vm0, %v1437_v8 }
  0xc8   : > { %3060 = vmatmul.msk.f32.gmra.mxu0 %vm767_vm0, %v1220_v9 }
  0xc9   : > { %3072 = vmatmul.msk.f32.gmra.mxu1 %vm767_vm0, %v1330_v10  ;;  %v1576_v57 = vpop.permute.xlu0 %1575 }
  0xcf   : > { %3082 = vmatmul.msk.f32.gmra.mxu2 %vm767_vm0, %v1438_v13 }
  0xd0   : > { %3061 = vmatmul.msk.f32.gmra.mxu0 %vm767_vm0, %v1221_v14 }
  0xd1   : > { %3073 = vmatmul.msk.f32.gmra.mxu1 %vm767_vm0, %v1331_v15 }
  0xd7   : > { %3083 = vmatmul.msk.f32.gmra.mxu2 %vm767_vm0, %v1439_v18 }
  0xd8   : > { %3062 = vmatmul.msk.f32.gmra.mxu0 %vm767_vm0, %v1222_v19 }
  0xd9   : > { %3074 = vmatmul.msk.f32.gmra.mxu1 %vm767_vm0, %v1332_v20 }
  0xdd   : > { %v4249_v24 = vpop.f32.mrf.mxu0 }
  0xde   : > { %v4251_v25 = vpop.f32.mrf.mxu1 }
  0xdf   : > { %3084 = vmatmul.msk.f32.gmra.mxu2 %vm767_vm0, %v1440_v23 }
  0xe0   : > { %3063 = vmatmul.msk.f32.gmra.mxu0 %vm767_vm0, %v1223_v26 }
  0xe1   : > { %3075 = vmatmul.msk.f32.gmra.mxu1 %vm767_vm0, %v1333_v28  ;;  %v965_v28 = vadd.f32 %v4251_v25, %v4249_v24 }
  0xe5   : > { %v4262_v32 = vpop.f32.mrf.mxu0 }
  0xe6   : > { %v4264_v35 = vpop.f32.mrf.mxu1 }
  0xe7   : > { %3085 = vmatmul.msk.f32.gmra.mxu2 %vm767_vm0, %v1441_v31  ;;  %v968_v37 = vadd.f32 %v4264_v35, %v4262_v32 }
  0xe8   : > { %3064 = vmatmul.msk.f32.gmra.mxu0 %vm767_vm0, %v1224_v33 }
  0xe9   : > { %3076 = vmatmul.msk.f32.gmra.mxu1 %vm767_vm0, %v1334_v36  ;;  %v4322_v15 = vpop.f32.mrf.mxu3 }
  0xea   : > { %v4269_v39 = vpop.f32.mrf.mxu2 }
  0xed   : > { %v4271_v41 = vpop.f32.mrf.mxu0 }
  0xee   : > { %v4273_v44 = vpop.f32.mrf.mxu1 }
  0xef   : > { %3086 = vmatmul.msk.f32.gmra.mxu2 %vm767_vm0, %v1442_v40 }
  0xf0   : > { %3065 = vmatmul.msk.f32.gmra.mxu0 %vm767_vm0, %v1225_v42 }
  0xf1   : > { %3077 = vmatmul.msk.f32.gmra.mxu1 %vm767_vm0, %v1335_v45  ;;  %v1173_v19 = vpop.f32.mrf.mxu3 }
  0xf2   : > { %v1063_v46 = vpop.f32.mrf.mxu2 }
  0xf3   : > { %v1096_v31 = vadd.f32 %v1063_v46, %v965_v28 }
  0xf5   : > { %v4278_v48 = vpop.f32.mrf.mxu0  ;;  %v1206_v38 = vadd.f32 %v1173_v19, %v1096_v31 }
  0xf6   : > { %v4280_v51 = vpop.f32.mrf.mxu1 }
  0xf7   : > { %3087 = vmatmul.msk.f32.gmra.mxu2 %vm767_vm0, %v1443_v47 }
  0xf8   : > { %3066 = vmatmul.msk.f32.gmra.mxu0 %vm767_vm0, %v1226_v49  ;;  %v971_v49 = vadd.f32 %v4273_v44, %v4271_v41  ;;  %v3093_v44 = vld [vmem:[%s5113_s6 + $0x28] sm:$0xff] }
  0xf9   : > { %3078 = vmatmul.msk.f32.gmra.mxu1 %vm767_vm0, %v1336_v52  ;;  %v1176_v23 = vpop.f32.mrf.mxu3  ;;  %1808 = vmatpush.msra.mxu3 %v3093_v44 }
  0xfa   : > { %v1066_v53 = vpop.f32.mrf.mxu2 }
  0xfb   : > { %v1097_v24 = vadd.f32 %v1066_v53, %v968_v37  ;;  %v3109_v37 = vld [vmem:[%s5113_s6 + $0x48] sm:$0xff] }
  0xfd   : > { %v4285_v55 = vpop.f32.mrf.mxu0  ;;  %v1207_v46 = vadd.f32 %v1176_v23, %v1097_v24  ;;  %v1586_v24 = vpop.permute.xlu1 %1585 }
  0xfe   : > { %v4287_v58 = vpop.f32.mrf.mxu1 }
  0xff   : > { %3088 = vmatmul.msk.f32.gmra.mxu2 %vm767_vm0, %v1444_v54 }
 0x100   : > { %3067 = vmatmul.msk.f32.gmra.mxu0 %vm767_vm0, %v1227_v56 }
 0x101   : > { %3079 = vmatmul.msk.f32.gmra.mxu1 %vm767_vm0, %v1337_v59  ;;  %v1179_v33 = vpop.f32.mrf.mxu3 }
 0x102   : > { %v1069_v60 = vpop.f32.mrf.mxu2 }
 0x103   : > { %v1098_v32 = vadd.f32 %v1069_v60, %v971_v49 }
 0x105   : > { %v4292_v62 = vpop.f32.mrf.mxu0 }
 0x106   : > { %v4294_v1 = vpop.f32.mrf.mxu1 }
 0x107   : > { %3089 = vmatmul.msk.f32.gmra.mxu2 %vm767_vm0, %v1445_v61 }
 0x109   : > { %v1182_v45 = vpop.f32.mrf.mxu3 }
 0x10a   : > { %v4297_v2 = vpop.f32.mrf.mxu2 }
 0x10d   : > { %v4299_v4 = vpop.f32.mrf.mxu0 }
 0x10e   : > { %v4301_v5 = vpop.f32.mrf.mxu1 }
 0x10f   : > { %3090 = vmatmul.msk.f32.gmra.mxu2 %vm767_vm0, %v1446_v3  ;;  %v974_v3 = vadd.f32 %v4280_v51, %v4278_v48  ;;  %v3111_v48 = vld [vmem:[%s5113_s6 + $0x58] sm:$0xff]  ;;  %v1581_v51 = vpop.permute.xlu0 %1580 }
 0x110   : > { %1917 = vmatpush.msra.mxu0 %v3111_v48 }
 0x111   : > { %v1185_v12 = vpop.f32.mrf.mxu3 }
 0x112   : > { %v4304_v6 = vpop.f32.mrf.mxu2  ;;  %1918 = vmatpush.msra.mxu0 %v3110_v29 }
 0x114   : > { %1919 = vmatpush.msra.mxu0 %v3109_v37 }
 0x115   : > { %v4306_v8 = vpop.f32.mrf.mxu0 }
 0x116   : > { %v4308_v9 = vpop.f32.mrf.mxu1 }
 0x117   : > { %3091 = vmatmul.msk.f32.gmra.mxu2 %vm767_vm0, %v1447_v7  ;;  %v1208_v7 = vadd.f32 %v1179_v33, %v1098_v32  ;;  %v977_v33 = vadd.f32 %v4287_v58, %v4285_v55  ;;  %v3108_v55 = vld [vmem:[%s5113_s6 + $0x40] sm:$0xff]  ;;  %v4387_v29 = vpop.permute.xlu0 %1702 }
 0x118   : > { %1920 = vmatpush.msra.mxu0 %v3108_v55 }
 0x119   : > { %v1188_v58 = vpop.f32.mrf.mxu3 }
 0x11a   : > { %v4311_v10 = vpop.f32.mrf.mxu2 }
 0x11d   : > { %v4313_v11 = vpop.f32.mrf.mxu0 }
 0x11e   : > { %v4318_v13 = vpop.f32.mrf.mxu1 }
 0x122   : > { %v4320_v14 = vpop.f32.mrf.mxu2 }
 0x125   : > { %v4324_v16 = vpop.f32.mrf.mxu0 }
 0x126   : > { %v4326_v17 = vpop.f32.mrf.mxu1 }
 0x12a   : > { %v4328_v18 = vpop.f32.mrf.mxu2 }
 0x12d   : > { %v1283_v20 = vpop.f32.mrf.mxu0 }
 0x12e   : > { %v1393_v22 = vpop.f32.mrf.mxu1  ;;  %v1316_v40 = vadd.f32 %v1283_v20, %v1206_v38 }
 0x130   : > { %v1426_v25 = vadd.f32 %v1393_v22, %v1316_v40  ;;  %v1099_v22 = vadd.f32 %v4297_v2, %v974_v3  ;;  %v1191_v3 = vpop.f32.mrf.mxu3 }
 0x132   : > { %v4330_v21 = vpop.f32.mrf.mxu2  ;;  %v1209_v2 = vadd.f32 %v1182_v45, %v1099_v22 }
 0x135   : > { %v1286_v26 = vpop.f32.mrf.mxu0 }
 0x136   : > { %v1396_v30 = vpop.f32.mrf.mxu1  ;;  %v1317_v54 = vadd.f32 %v1286_v26, %v1207_v46 }
 0x138   : > { %v1427_v53 = vadd.f32 %v1396_v30, %v1317_v54 }
 0x13a   : > { %v4332_v27 = vpop.f32.mrf.mxu2 }
 0x13d   : > { %v1289_v36 = vpop.f32.mrf.mxu0 }
 0x13e   : > { %v1399_v42 = vpop.f32.mrf.mxu1  ;;  %v1318_v60 = vadd.f32 %v1289_v36, %v1208_v7 }
 0x140   : > { %v1428_v26 = vadd.f32 %v1399_v42, %v1318_v60  ;;  %v3092_v42 = vld [vmem:[%s5113_s6 + $0x20] sm:$0xff] }
 0x141   : > { %1809 = vmatpush.msra.mxu3 %v3092_v42 }
 0x142   : > { %v4340_v34 = vpop.f32.mrf.mxu2 }
 0x145   : > { %v1292_v52 = vpop.f32.mrf.mxu0 }
 0x146   : > { %v1402_v59 = vpop.f32.mrf.mxu1  ;;  %v1319_v38 = vadd.f32 %v1292_v52, %v1209_v2  ;;  %v980_v52 = vadd.f32 %v4294_v1, %v4292_v62  ;;  %v983_v1 = vadd.f32 %v4301_v5, %v4299_v4  ;;  %v986_v5 = vadd.f32 %v4308_v9, %v4306_v8 }
 0x148   : > { %v1429_v49 = vadd.f32 %v1402_v59, %v1319_v38  ;;  %v1591_v59 = vpop.permute.xlu1 %1590 }
 0x14a   : > { %v1503_v47 = vpop.f32.mrf.mxu2 }
 0x14b   : > { %v1536_v50 = vadd.f32 %v1503_v47, %v1426_v25  ;;  %v1100_v25 = vadd.f32 %v4304_v6, %v977_v33  ;;  %v1101_v6 = vadd.f32 %v4311_v10, %v980_v52  ;;  %v1194_v33 = vpop.f32.mrf.mxu3 }
 0x14d   : > { %v1551_v56 = vadd.f32 %v4344_v43, %v1536_v50  ;;  %v1295_v20 = vpop.f32.mrf.mxu0  ;;  %v1210_v54 = vadd.f32 %v1185_v12, %v1100_v25  ;;  %v1211_v12 = vadd.f32 %v1188_v58, %v1101_v6  ;;  %v1762_v6 = vld [vmem:[%s5113_s6 + $0x18] sm:$0xff] }
 0x14e   : > { %v1405_v30 = vpop.f32.mrf.mxu1  ;;  %1853 = vmatpush.msrb.mxu3 %v1762_v6 }
 0x14f   : > { %v1562_v35 = vmax.f32 %v1551_v56, 0.0  ;;  %v1320_v32 = vadd.f32 %v1295_v20, %v1210_v54  ;;  %v1596_v20 = vpop.permute.xlu2 %1595 }
 0x151   : > { %v1628_v61 = vmul.f32 %v1576_v57, %v1562_v35  ;;  %v1430_v7 = vadd.f32 %v1405_v30, %v1320_v32  ;;  %v989_v32 = vadd.f32 %v4318_v13, %v4313_v11 }
 0x152   : > { %v1506_v63 = vpop.f32.mrf.mxu2 }
 0x153   : > { %1642 = vst.msk [vmem:[#allocation3 + $0x1] sm:$0xff] %vm1641_vm3, %v1628_v61  ;;  %v1537_v41 = vadd.f32 %v1506_v63, %v1427_v53 }
 0x155   : > { %v1552_v19 = vadd.f32 %v4344_v43, %v1537_v41  ;;  %v1298_v47 = vpop.f32.mrf.mxu0 }
 0x156   : > { %v1408_v57 = vpop.f32.mrf.mxu1  ;;  %v1321_v48 = vadd.f32 %v1298_v47, %v1211_v12  ;;  %v1103_v47 = vadd.f32 %v4328_v18, %v986_v5 }
 0x157   : > { %v1563_v23 = vmax.f32 %v1552_v19, 0.0  ;;  %v1601_v8 = vpop.permute.xlu2 %1600 }
 0x158   : > { %v1213_v18 = vadd.f32 %v1194_v33, %v1103_v47 }
 0x159   : > { %v1629_v28 = vmul.f32 %v1581_v51, %v1563_v23 }
 0x15a   : > { %v1509_v31 = vpop.f32.mrf.mxu2 }
 0x15b   : > { %1643 = vst.msk [vmem:[#allocation3 + $0x9] sm:$0xff] %vm1641_vm3, %v1629_v28  ;;  %v1538_v36 = vadd.f32 %v1509_v31, %v1428_v26  ;;  %v1102_v26 = vadd.f32 %v4320_v14, %v983_v1  ;;  %v1431_v31 = vadd.f32 %v1408_v57, %v1321_v48  ;;  %v1104_v1 = vadd.f32 %v4330_v21, %v989_v32 }
 0x15d   : > { %v1553_v40 = vadd.f32 %v4344_v43, %v1538_v36  ;;  %v1301_v60 = vpop.f32.mrf.mxu0  ;;  %v1212_v38 = vadd.f32 %v1191_v3, %v1102_v26  ;;  %v992_v26 = vadd.f32 %v4326_v17, %v4324_v16 }
 0x15e   : > { %v1411_v51 = vpop.f32.mrf.mxu1 }
 0x15f   : > { %v1564_v45 = vmax.f32 %v1553_v40, 0.0  ;;  %v1105_v16 = vadd.f32 %v4332_v27, %v992_v26 }
 0x161   : > { %v1630_v46 = vmul.f32 %v1586_v24, %v1564_v45  ;;  %v1322_v24 = vadd.f32 %v1301_v60, %v1212_v38 }
 0x162   : > { %v1512_v50 = vpop.f32.mrf.mxu2  ;;  %v1653_v53 = vld [vmem:[#allocation3] ss:$2 sm:$0xff]  ;;  %v1665_v61 = vld [vmem:[#allocation3 + $0x1] ss:$2 sm:$0xff] }
 0x163   : > { %1644 = vst.msk [vmem:[#allocation3 + $0x11] sm:$0xff] %vm1641_vm3, %v1630_v46  ;;  %v1539_v56 = vadd.f32 %v1512_v50, %v1429_v49  ;;  %v1676_v41 = vmax.f32 %v1653_v53, %v1665_v61  ;;  %v1683_v22 = vld [vmem:[#allocation3 + $0x2] ss:$2 sm:$0xff]  ;;  %v4395_v49 = vpop.permute.xlu1 %1707  ;;  %v1432_v54 = vadd.f32 %v1411_v51, %v1322_v24 }
 0x165   : > { %v1554_v35 = vadd.f32 %v4344_v43, %v1539_v56  ;;  %v1694_v23 = vmax.f32 %v1676_v41, %v1683_v22  ;;  %v1304_v14 = vpop.f32.mrf.mxu0 }
 0x166   : > { %v1414_v50 = vpop.f32.mrf.mxu1 }
 0x167   : > { %v1565_v63 = vmax.f32 %v1554_v35, 0.0  ;;  %v1730_v30 = vmul.f32 %v4387_v29, %v1694_v23 }
 0x169   : > { %v1631_v44 = vmul.f32 %v1591_v59, %v1565_v63  ;;  %v1743_v58 = vrot.slane %v1730_v30, 7  ;;  %v1197_v63 = vpop.f32.mrf.mxu3 }
 0x16a   : > { %v1515_v62 = vpop.f32.mrf.mxu2 }
 0x16b   : > { %1645 = vst.msk [vmem:[#allocation3 + $0x19] sm:$0xff] %vm1641_vm3, %v1631_v44  ;;  %v1540_v19 = vadd.f32 %v1515_v62, %v1430_v7  ;;  %v4401_v52 = vsel %vm1742_vm4, 0.0, %v1743_v58  ;;  %v1323_v7 = vadd.f32 %v1304_v14, %v1213_v18 }
 0x16c   : > { %v1771_v3 = vrot.slane %v4401_v52, 1  ;;  %v1882_v59 = vrot.slane %v4401_v52, 2 }
 0x16d   : > { %v1555_v10 = vadd.f32 %v4344_v43, %v1540_v19  ;;  %v1307_v44 = vpop.f32.mrf.mxu0  ;;  %v1606_v19 = vpop.permute.xlu2 %1605 }
 0x16e   : > { %v1417_v23 = vpop.f32.mrf.mxu1 }
 0x16f   : > { %v1566_v28 = vmax.f32 %v1555_v10, 0.0 }
 0x171   : > { %v1632_v4 = vmul.f32 %v1596_v20, %v1566_v28  ;;  %v1433_v20 = vadd.f32 %v1414_v50, %v1323_v7  ;;  %v1214_v28 = vadd.f32 %v1197_v63, %v1104_v1 }
 0x172   : > { %v1518_v2 = vpop.f32.mrf.mxu2  ;;  %v1655_v36 = vld [vmem:[#allocation3 + $0x10] ss:$2 sm:$0xff]  ;;  %v1667_v37 = vld [vmem:[#allocation3 + $0x11] ss:$2 sm:$0xff] }
 0x173   : > { %1646 = vst.msk [vmem:[#allocation3 + $0x21] sm:$0xff] %vm1641_vm3, %v1632_v4  ;;  %v1541_v40 = vadd.f32 %v1518_v2, %v1431_v31  ;;  %v1677_v42 = vmax.f32 %v1655_v36, %v1667_v37  ;;  %v1685_v55 = vld [vmem:[#allocation3 + $0x12] ss:$2 sm:$0xff]  ;;  %v1324_v5 = vadd.f32 %v1307_v44, %v1214_v28  ;;  %v1200_v36 = vpop.f32.mrf.mxu3  ;;  %v4430_v37 = vpop.permute.xlu1 %1712 }
 0x174   : > { %v1761_v31 = vld [vmem:[%s5113_s6 + $0x10] sm:$0xff] }
 0x175   : > { %v1556_v25 = vadd.f32 %v4344_v43, %v1541_v40  ;;  %v1695_v45 = vmax.f32 %v1677_v42, %v1685_v55  ;;  %1854 = vmatpush.msrb.mxu3 %v1761_v31  ;;  %v1611_v40 = vpop.permute.xlu0 %1610  ;;  %v1310_v42 = vpop.f32.mrf.mxu0  ;;  %v1434_v14 = vadd.f32 %v1417_v23, %v1324_v5  ;;  %v1759_v23 = vld [vmem:[%s5113_s6] sm:$0xff] }
 0x177   : > { %v1567_v9 = vmax.f32 %v1556_v25, 0.0  ;;  %v4398_v46 = vmul.f32 %v4395_v49, %v1695_v45  ;;  %v1215_v25 = vadd.f32 %v1200_v36, %v1105_v16 }
 0x179   : > { %v1633_v56 = vmul.f32 %v1601_v8, %v1567_v9  ;;  %v1744_v57 = vrot.slane %v4398_v46, 7  ;;  %v1420_v8 = vpop.f32.mrf.mxu1  ;;  %v995_v46 = vadd.f32 %v4269_v39, %v4322_v15  ;;  %v1325_v50 = vadd.f32 %v1310_v42, %v1215_v25  ;;  %v1616_v39 = vpop.permute.xlu2 %1615 }
 0x17a   : > { %v1521_v35 = vpop.f32.mrf.mxu2 }
 0x17b   : > { %1647 = vst.msk [vmem:[#allocation3 + $0x29] sm:$0xff] %vm1641_vm3, %v1633_v56  ;;  %v1542_v53 = vadd.f32 %v1521_v35, %v1432_v54  ;;  %v4408_v61 = vsel %vm1742_vm4, %v1743_v58, %v1744_v57  ;;  %v1106_v18 = vadd.f32 %v4340_v34, %v995_v46  ;;  %v1435_v15 = vadd.f32 %v1420_v8, %v1325_v50  ;;  %v4453_v1 = vpop.permute.xlu1 %1717 }
 0x17c   : > { %v1772_v11 = vrot.slane %v4408_v61, 1  ;;  %v1883_v13 = vrot.slane %v4408_v61, 2 }
 0x17d   : > { %v1557_v41 = vadd.f32 %v4344_v43, %v1542_v53  ;;  %v1203_v53 = vpop.f32.mrf.mxu3  ;;  %v1313_v63 = vpop.f32.mrf.mxu0 }
 0x17e   : > { %v1773_v60 = vsel %vm1770_vm5, %v1771_v3, %v1772_v11  ;;  %v1884_v62 = vsel %vm1881_vm6, %v1882_v59, %v1883_v13 }
 0x17f   : > { %v1568_v12 = vmax.f32 %v1557_v41, 0.0  ;;  %3096 = vmatmul.msk.f32.vlgmr.msra.gmra.mxu3 %vm1641_vm3, %v1773_v60  ;;  %3112 = vmatmul.msk.f32.vlgmr.msra.gmra.mxu0 %vm1641_vm3, %v1884_v62 }
 0x181   : > { %v1634_v22 = vmul.f32 %v1606_v19, %v1568_v12  ;;  %v1423_v12 = vpop.f32.mrf.mxu1  ;;  %v1626_v36 = vpop.permute.xlu2 %1625 }
 0x182   : > { %v1524_v48 = vpop.f32.mrf.mxu2  ;;  %v1657_v10 = vld [vmem:[#allocation3 + $0x20] ss:$2 sm:$0xff]  ;;  %v1669_v51 = vld [vmem:[#allocation3 + $0x21] ss:$2 sm:$0xff] }
 0x183   : > { %1648 = vst.msk [vmem:[#allocation3 + $0x31] sm:$0xff] %vm1641_vm3, %v1634_v22  ;;  %v1543_v30 = vadd.f32 %v1524_v48, %v1433_v20  ;;  %v1678_v21 = vmax.f32 %v1657_v10, %v1669_v51  ;;  %v1687_v4 = vld [vmem:[#allocation3 + $0x22] ss:$2 sm:$0xff]  ;;  %v1621_v22 = vpop.permute.xlu0 %1620 }
 0x185   : > { %v1558_v33 = vadd.f32 %v4344_v43, %v1543_v30  ;;  %v1696_v2 = vmax.f32 %v1678_v21, %v1687_v4 }
 0x187   : > { %v1569_v17 = vmax.f32 %v1558_v33, 0.0  ;;  %v1732_v38 = vmul.f32 %v4430_v37, %v1696_v2 }
 0x189   : > { %v1635_v55 = vmul.f32 %v1611_v40, %v1569_v17  ;;  %v1746_v58 = vrot.slane %v1732_v38, 7 }
 0x18a   : > { %v1527_v24 = vpop.f32.mrf.mxu2 }
 0x18b   : > { %1649 = vst.msk [vmem:[#allocation3 + $0x39] sm:$0xff] %vm1641_vm3, %v1635_v55  ;;  %v1544_v45 = vadd.f32 %v1527_v24, %v1434_v14  ;;  %v4436_v47 = vsel %vm1742_vm4, %v1744_v57, %v1746_v58  ;;  %v1760_v57 = vld [vmem:[%s5113_s6 + $0x8] sm:$0xff]  ;;  %v4467_v55 = vpop.permute.xlu0 %1722 }
 0x18c   : > { %v1774_v9 = vrot.slane %v4436_v47, 1  ;;  %v1885_v27 = vrot.slane %v4436_v47, 2  ;;  %1855 = vmatpush.msrb.mxu3 %v1760_v57 }
 0x18d   : > { %v1559_v54 = vadd.f32 %v4344_v43, %v1544_v45 }
 0x18e   : > { %v1775_v56 = vsel %vm1770_vm5, %v1772_v11, %v1774_v9  ;;  %v1886_v32 = vsel %vm1881_vm6, %v1883_v13, %v1885_v27  ;;  %v1216_v13 = vadd.f32 %v1203_v53, %v1106_v18  ;;  %1856 = vmatpush.msrb.mxu3 %v1759_v23  ;;  %v3120_v23 = vld [vmem:[%s5115_s8 + $0x50] sm:$0xff] }
 0x18f   : > { %v1570_v35 = vmax.f32 %v1559_v54, 0.0  ;;  %3097 = vmatmul.msk.f32.gmra.mxu3 %vm1641_vm3, %v1775_v56  ;;  %3113 = vmatmul.msk.f32.gmra.mxu0 %vm1641_vm3, %v1886_v32  ;;  %v4471_v54 = vpop.permute.xlu1 %1727 }
 0x190   : > { %v1326_v44 = vadd.f32 %v1313_v63, %v1216_v13  ;;  %v1993_v13 = vld [vmem:[%s5115_s8 + $0x20] sm:$0xff] }
 0x191   : > { %v1636_v6 = vmul.f32 %v1616_v39, %v1570_v35 }
 0x192   : > { %v1530_v3 = vpop.f32.mrf.mxu2  ;;  %v1659_v59 = vld [vmem:[#allocation3 + $0x30] ss:$2 sm:$0xff]  ;;  %v1671_v11 = vld [vmem:[#allocation3 + $0x31] ss:$2 sm:$0xff]  ;;  %v1436_v48 = vadd.f32 %v1423_v12, %v1326_v44  ;;  %v3143_v12 = vld [vmem:[%s5115_s8 + $0xa8] sm:$0xff] }
 0x193   : > { %1650 = vst.msk [vmem:[#allocation3 + $0x41] sm:$0xff] %vm1641_vm3, %v1636_v6  ;;  %v1545_v34 = vadd.f32 %v1530_v3, %v1435_v15  ;;  %v1679_v7 = vmax.f32 %v1659_v59, %v1671_v11  ;;  %v1689_v41 = vld [vmem:[#allocation3 + $0x32] ss:$2 sm:$0xff]  ;;  %v3123_v11 = vld [vmem:[%s5115_s8 + $0x68] sm:$0xff] }
 0x194   : > { %v1996_v3 = vld [vmem:[%s5115_s8 + $0x38] sm:$0xff] }
 0x195   : > { %v1560_v60 = vadd.f32 %v4344_v43, %v1545_v34  ;;  %v1697_v62 = vmax.f32 %v1679_v7, %v1689_v41  ;;  %2087 = vmatpush.msrb.mxu2 %v1996_v3  ;;  %v3125_v59 = vld [vmem:[%s5115_s8 + $0x78] sm:$0xff]  ;;  %v3122_v34 = vld [vmem:[%s5115_s8 + $0x60] sm:$0xff] }
 0x196   : > { %2040 = vmatpush.msra.mxu1 %v3125_v59  ;;  %v3145_v7 = vld [vmem:[%s5115_s8 + $0xb8] sm:$0xff] }
 0x197   : > { %v1571_v19 = vmax.f32 %v1560_v60, 0.0  ;;  %v1733_v20 = vmul.f32 %v4453_v1, %v1697_v62  ;;  %v1992_v41 = vld [vmem:[%s5115_s8 + $0x18] sm:$0xff]  ;;  %2154 = vmatpush.msra.mxu3 %v3145_v7  ;;  %v3144_v60 = vld [vmem:[%s5115_s8 + $0xb0] sm:$0xff] }
 0x198   : > { %v3121_v62 = vld [vmem:[%s5115_s8 + $0x58] sm:$0xff] }
 0x199   : > { %v1637_v10 = vmul.f32 %v1621_v22, %v1571_v19  ;;  %v1748_v51 = vrot.slane %v1733_v20, 7  ;;  %2155 = vmatpush.msra.mxu3 %v3144_v60  ;;  %v1991_v19 = vld [vmem:[%s5115_s8 + $0x10] sm:$0xff]  ;;  %v3142_v22 = vld [vmem:[%s5115_s8 + $0xa0] sm:$0xff] }
 0x19a   : > { %v1533_v26 = vpop.f32.mrf.mxu2 }
 0x19b   : > { %1651 = vst.msk [vmem:[#allocation3 + $0x49] sm:$0xff] %vm1641_vm3, %v1637_v10  ;;  %v1546_v28 = vadd.f32 %v1533_v26, %v1436_v48  ;;  %v1749_v30 = vsel %vm1742_vm4, %v1746_v58, %v1748_v51  ;;  %2156 = vmatpush.msra.mxu3 %v3143_v12  ;;  %v3141_v26 = vld [vmem:[%s5115_s8 + $0x98] sm:$0xff] }
 0x19c   : > { %v1776_v21 = vrot.slane %v1749_v30, 1  ;;  %v1887_v31 = vrot.slane %v1749_v30, 2 }
 0x19d   : > { %v1561_v4 = vadd.f32 %v4344_v43, %v1546_v28  ;;  %2157 = vmatpush.msra.mxu3 %v3142_v22  ;;  %v1989_v28 = vld [vmem:[%s5115_s8] sm:$0xff] }
 0x19e   : > { %v1777_v5 = vsel %vm1770_vm5, %v1774_v9, %v1776_v21  ;;  %v1888_v33 = vsel %vm1881_vm6, %v1885_v27, %v1887_v31 }
 0x19f   : > { %v1572_v2 = vmax.f32 %v1561_v4, 0.0  ;;  %3098 = vmatmul.msk.f32.gmra.mxu3 %vm1641_vm3, %v1777_v5  ;;  %3114 = vmatmul.msk.f32.gmra.mxu0 %vm1641_vm3, %v1888_v33  ;;  %v3139_v4 = vld [vmem:[%s5115_s8 + $0x88] sm:$0xff]  ;;  %v3118_v33 = vld [vmem:[%s5115_s8 + $0x40] sm:$0xff] }
 0x1a0   : > { %2158 = vmatpush.msra.mxu3 %v3141_v26 }
 0x1a1   : > { %v1638_v16 = vmul.f32 %v1626_v36, %v1572_v2  ;;  %v3138_v2 = vld [vmem:[%s5115_s8 + $0x80] sm:$0xff] }
 0x1a2   : > { %v1661_v17 = vld [vmem:[#allocation3 + $0x40] ss:$2 sm:$0xff]  ;;  %v1673_v38 = vld [vmem:[#allocation3 + $0x41] ss:$2 sm:$0xff] }
 0x1a3   : > { %1652 = vst.msk [vmem:[#allocation3 + $0x51] sm:$0xff] %vm1641_vm3, %v1638_v16  ;;  %v1680_v40 = vmax.f32 %v1661_v17, %v1673_v38  ;;  %v1691_v42 = vld [vmem:[#allocation3 + $0x42] ss:$2 sm:$0xff] }
 0x1a4   : > { %v4571_v38 = vld [vmem:[#allocation14] ss:$0 sm:$0xff] }
 0x1a5   : > { %v1698_v14 = vmax.f32 %v1680_v40, %v1691_v42 }
 0x1a7   : > { %v1734_v43 = vmul.f32 %v4467_v55, %v1698_v14 }
 0x1a9   : > { %v1750_v58 = vrot.slane %v1734_v43, 7 }
 0x1aa   : > { %v1663_v24 = vld [vmem:[#allocation3 + $0x50] ss:$2 sm:$0xf]  ;;  %v1675_v25 = vld [vmem:[#allocation3 + $0x51] ss:$2 sm:$0xf] }
 0x1ab   : > { %v1751_v45 = vsel %vm1742_vm4, %v1748_v51, %v1750_v58  ;;  %v1681_v8 = vmax.f32 %v1663_v24, %v1675_v25  ;;  %v1693_v46 = vld [vmem:[#allocation3 + $0x52] ss:$2 sm:$0xf]  ;;  %v1990_v51 = vld [vmem:[%s5115_s8 + $0x8] sm:$0xff] }
 0x1ac   : > { %v1778_v9 = vrot.slane %v1751_v45, 1  ;;  %v1889_v27 = vrot.slane %v1751_v45, 2 }
 0x1ad   : > { %v1699_v50 = vmax.f32 %v1681_v8, %v1693_v46 }
 0x1ae   : > { %v1779_v56 = vsel %vm1770_vm5, %v1776_v21, %v1778_v9  ;;  %v1890_v32 = vsel %vm1881_vm6, %v1887_v31, %v1889_v27  ;;  %v3119_v21 = vld [vmem:[%s5115_s8 + $0x48] sm:$0xff]  ;;  %v3140_v31 = vld [vmem:[%s5115_s8 + $0x90] sm:$0xff] }
 0x1af   : > { %3099 = vmatmul.msk.f32.gmra.mxu3 %vm1641_vm3, %v1779_v56  ;;  %3115 = vmatmul.msk.f32.gmra.mxu0 %vm1641_vm3, %v1890_v32  ;;  %v1735_v18 = vmul.f32 %v4471_v54, %v1699_v50 }
 0x1b0   : > { %2159 = vmatpush.msra.mxu3 %v3140_v31 }
 0x1b1   : > { %v1752_v35 = vrot.slane %v1735_v18, 7 }
 0x1b2   : > { %2160 = vmatpush.msra.mxu3 %v3139_v4 }
 0x1b3   : > { %v1753_v57 = vsel %vm1742_vm4, %v1750_v58, %v1752_v35 }
 0x1b4   : > { %v1758_v53 = vsel %vm1757_vm7, %v1753_v57, 0.0  ;;  %2161 = vmatpush.msra.mxu3 %v3138_v2 }
 0x1b5   : > { %v1780_v39 = vrot.slane %v1758_v53, 1  ;;  %v1891_v15 = vrot.slane %v1758_v53, 2 }
 0x1b7   : > { %v1781_v6 = vsel %vm1770_vm5, %v1778_v9, %v1780_v39  ;;  %v1892_v63 = vsel %vm1881_vm6, %v1889_v27, %v1891_v15 }
 0x1b8   : > { %3100 = vmatmul.msk.f32.gmra.mxu3 %vm1641_vm3, %v1781_v6  ;;  %3116 = vmatmul.msk.f32.gmra.mxu0 %vm1641_vm3, %v1892_v63 }
 0x1c0   : > { %3101 = vmatmul.msk.f32.gmra.mxu3 %vm1641_vm3, %v1780_v39  ;;  %3117 = vmatmul.msk.f32.gmra.mxu0 %vm1641_vm3, %v1891_v15 }
 0x1c8   : > { %3102 = vmatmul.msk.f32.vlgmr.msrb.gmra.mxu3 %vm1641_vm3, %v4401_v52  ;;  %v1995_v52 = vld [vmem:[%s5115_s8 + $0x30] sm:$0xff] }
 0x1c9   : > { %2088 = vmatpush.msrb.mxu2 %v1995_v52 }
 0x1d0   : > { %3103 = vmatmul.msk.f32.gmra.mxu3 %vm1641_vm3, %v4408_v61  ;;  %v3124_v61 = vld [vmem:[%s5115_s8 + $0x70] sm:$0xff] }
 0x1d1   : > { %2041 = vmatpush.msra.mxu1 %v3124_v61 }
 0x1d3   : > { %2042 = vmatpush.msra.mxu1 %v3123_v11 }
 0x1d5   : > { %2043 = vmatpush.msra.mxu1 %v3122_v34 }
 0x1d7   : > { %2044 = vmatpush.msra.mxu1 %v3121_v62 }
 0x1d8   : > { %3104 = vmatmul.msk.f32.gmra.mxu3 %vm1641_vm3, %v4436_v47  ;;  %v1994_v47 = vld [vmem:[%s5115_s8 + $0x28] sm:$0xff] }
 0x1d9   : > { %2089 = vmatpush.msrb.mxu2 %v1994_v47  ;;  %2045 = vmatpush.msra.mxu1 %v3120_v23 }
 0x1db   : > { %2090 = vmatpush.msrb.mxu2 %v1993_v13  ;;  %2046 = vmatpush.msra.mxu1 %v3119_v21 }
 0x1dd   : > { %2091 = vmatpush.msrb.mxu2 %v1992_v41  ;;  %2047 = vmatpush.msra.mxu1 %v3118_v33 }
 0x1df   : > { %2092 = vmatpush.msrb.mxu2 %v1991_v19 }
 0x1e0   : > { %3105 = vmatmul.msk.f32.gmra.mxu3 %vm1641_vm3, %v1749_v30 }
 0x1e1   : > { %2093 = vmatpush.msrb.mxu2 %v1990_v51 }
 0x1e3   : > { %2094 = vmatpush.msrb.mxu2 %v1989_v28 }
 0x1e8   : > { %3106 = vmatmul.msk.f32.gmra.mxu3 %vm1641_vm3, %v1751_v45 }
 0x1f0   : > { %3107 = vmatmul.msk.f32.gmra.mxu3 %vm1641_vm3, %v1758_v53 }
 0x1fc   : > { %v1922_v36 = vpop.f32.mrf.mxu0 }
 0x202   : > { %v1811_v44 = vpop.f32.mrf.mxu3 }
 0x20c   : > { %v1925_v14 = vpop.f32.mrf.mxu0 }
 0x212   : > { %v1814_v20 = vpop.f32.mrf.mxu3 }
 0x21c   : > { %v1928_v46 = vpop.f32.mrf.mxu0 }
 0x222   : > { %v1817_v48 = vpop.f32.mrf.mxu3 }
 0x22c   : > { %v1931_v15 = vpop.f32.mrf.mxu0 }
 0x232   : > { %v1820_v10 = vpop.f32.mrf.mxu3 }
 0x23b   : > { %v4552_v30 = vpop.f32.mrf.mxu3 }
 0x243   : > { %v4563_v5 = vpop.f32.mrf.mxu3 }
 0x24b   : > { %v1858_v16 = vpop.f32.mrf.mxu3 }
 0x24c   : > { %v1859_v17 = vadd.f32 %v1858_v16, %v1811_v44 }
 0x24e   : > { %v1940_v40 = vadd.f32 %v1922_v36, %v1859_v17 }
 0x250   : > { %v1950_v42 = vadd.f32 %v4571_v38, %v1940_v40 }
 0x252   : > { %v1956_v43 = vmax.f32 %v1950_v42, 0.0 }
 0x253   : > { %v1861_v58 = vpop.f32.mrf.mxu3 }
 0x254   : > { %v1962_v24 = vmul.f32 %v1956_v43, %v4387_v29  ;;  %v1862_v25 = vadd.f32 %v1861_v58, %v1814_v20  ;;  %v1934_v20 = vpop.f32.mrf.mxu0 }
 0x256   : > { %v1974_v45 = vrot.slane %v1962_v24, 7  ;;  %v1941_v8 = vadd.f32 %v1925_v14, %v1862_v25 }
 0x258   : > { %v1951_v9 = vadd.f32 %v4571_v38, %v1941_v8  ;;  %v1987_v27 = vsel %vm1742_vm4, 0.0, %v1974_v45 }
 0x259   : > { %3132 = vmatmul.msk.f32.vlgmr.msrb.gmra.mxu2 %vm2019_vm8, %v1987_v27  ;;  %v2008_v6 = vrot.slane %v1987_v27, 1  ;;  %v2123_v63 = vrot.slane %v1987_v27, 2 }
 0x25a   : > { %v1957_v50 = vmax.f32 %v1951_v9, 0.0 }
 0x25b   : > { %v1864_v56 = vpop.f32.mrf.mxu3 }
 0x25c   : > { %v1963_v32 = vmul.f32 %v1957_v50, %v4395_v49  ;;  %v1865_v18 = vadd.f32 %v1864_v56, %v1817_v48  ;;  %v1937_v42 = vpop.f32.mrf.mxu0 }
 0x25e   : > { %v1975_v35 = vrot.slane %v1963_v32, 7  ;;  %v1942_v57 = vadd.f32 %v1928_v46, %v1865_v18 }
 0x260   : > { %v1952_v53 = vadd.f32 %v4571_v38, %v1942_v57  ;;  %v1976_v39 = vsel %vm1742_vm4, %v1974_v45, %v1975_v35  ;;  %v3173_v57 = vld [vmem:[%s5117_s10 + $0xb8] sm:$0xff] }
 0x261   : > { %v2009_v3 = vrot.slane %v1976_v39, 1  ;;  %3133 = vmatmul.msk.f32.gmra.mxu2 %vm2019_vm8, %v1976_v39  ;;  %v2124_v59 = vrot.slane %v1976_v39, 2  ;;  %v2230_v39 = vld [vmem:[%s5117_s10 + $0x38] sm:$0xff] }
 0x262   : > { %v1958_v52 = vmax.f32 %v1952_v53, 0.0  ;;  %2348 = vmatpush.msra.mxu2 %v3173_v57  ;;  %v3159_v53 = vld [vmem:[%s5117_s10 + $0x78] sm:$0xff]  ;;  %2298 = vmatpush.msrb.mxu1 %v2230_v39  ;;  %v2423_v39 = vld [vmem:[%s5119_s12 + $0x68] sm:$0xff] }
 0x263   : > { %v1867_v61 = vpop.f32.mrf.mxu3  ;;  %v2010_v47 = vsel %vm1770_vm5, %v2008_v6, %v2009_v3  ;;  %v2125_v11 = vsel %vm1881_vm6, %v2123_v63, %v2124_v59  ;;  %2263 = vmatpush.msrb.mxu0 %v3159_v53  ;;  %v3158_v6 = vld [vmem:[%s5117_s10 + $0x70] sm:$0xff] }
 0x264   : > { %v1964_v13 = vmul.f32 %v1958_v52, %v4430_v37  ;;  %v1868_v34 = vadd.f32 %v1867_v61, %v1820_v10  ;;  %3126 = vmatmul.msk.f32.vlgmr.msra.gmra.mxu1 %vm2019_vm8, %v2010_v47  ;;  %3146 = vmatmul.msk.f32.vlgmr.msra.gmra.mxu3 %vm2019_vm8, %v2125_v11  ;;  %v2229_v63 = vld [vmem:[%s5117_s10 + $0x30] sm:$0xff]  ;;  %v2228_v52 = vld [vmem:[%s5117_s10 + $0x28] sm:$0xff]  ;;  %v3170_v61 = vld [vmem:[%s5117_s10 + $0xa0] sm:$0xff] }
 0x265   : > { %2264 = vmatpush.msrb.mxu0 %v3158_v6  ;;  %2299 = vmatpush.msrb.mxu1 %v2229_v63  ;;  %v3156_v47 = vld [vmem:[%s5117_s10 + $0x60] sm:$0xff] }
 0x266   : > { %v1977_v7 = vrot.slane %v1964_v13, 7  ;;  %v1943_v41 = vadd.f32 %v1931_v15, %v1868_v34  ;;  %v3172_v15 = vld [vmem:[%s5117_s10 + $0xb0] sm:$0xff]  ;;  %v2227_v11 = vld [vmem:[%s5117_s10 + $0x20] sm:$0xff]  ;;  %v3155_v13 = vld [vmem:[%s5117_s10 + $0x58] sm:$0xff] }
 0x267   : > { %2349 = vmatpush.msra.mxu2 %v3172_v15  ;;  %2300 = vmatpush.msrb.mxu1 %v2228_v52  ;;  %v2226_v34 = vld [vmem:[%s5117_s10 + $0x18] sm:$0xff]  ;;  %v2422_v63 = vld [vmem:[%s5119_s12 + $0x60] sm:$0xff] }
 0x268   : > { %v1953_v44 = vadd.f32 %v4571_v38, %v1943_v41  ;;  %v1978_v60 = vsel %vm1742_vm4, %v1975_v35, %v1977_v7  ;;  %v3154_v41 = vld [vmem:[%s5117_s10 + $0x50] sm:$0xff]  ;;  %v3192_v15 = vld [vmem:[%s5119_s12 + $0xf8] sm:$0xff] }
 0x269   : > { %v2011_v62 = vrot.slane %v1978_v60, 1  ;;  %3134 = vmatmul.msk.f32.gmra.mxu2 %vm2019_vm8, %v1978_v60  ;;  %v2126_v12 = vrot.slane %v1978_v60, 2  ;;  %2301 = vmatpush.msrb.mxu1 %v2227_v11  ;;  %v3168_v60 = vld [vmem:[%s5117_s10 + $0x90] sm:$0xff]  ;;  %v2421_v52 = vld [vmem:[%s5119_s12 + $0x58] sm:$0xff] }
 0x26a   : > { %v1959_v19 = vmax.f32 %v1953_v44, 0.0  ;;  %v2225_v44 = vld [vmem:[%s5117_s10 + $0x10] sm:$0xff]  ;;  %2453 = vmatpush.msrb.mxu3 %v3192_v15 }
 0x26b   : > { %v1870_v22 = vpop.f32.mrf.mxu3  ;;  %v2012_v23 = vsel %vm1770_vm5, %v2009_v3, %v2011_v62  ;;  %v2127_v48 = vsel %vm1881_vm6, %v2124_v59, %v2126_v12  ;;  %v3171_v3 = vld [vmem:[%s5117_s10 + $0xa8] sm:$0xff]  ;;  %2302 = vmatpush.msrb.mxu1 %v2226_v34 }
 0x26c   : > { %v1965_v10 = vmul.f32 %v1959_v19, %v4453_v1  ;;  %v1871_v51 = vadd.f32 %v1870_v22, %v4552_v30  ;;  %3127 = vmatmul.msk.f32.gmra.mxu1 %vm2019_vm8, %v2012_v23  ;;  %3147 = vmatmul.msk.f32.gmra.mxu3 %vm2019_vm8, %v2127_v48  ;;  %v3157_v59 = vld [vmem:[%s5117_s10 + $0x68] sm:$0xff]  ;;  %v2223_v22 = vld [vmem:[%s5117_s10] sm:$0xff] }
 0x26d   : > { %2350 = vmatpush.msra.mxu2 %v3171_v3  ;;  %2265 = vmatpush.msrb.mxu0 %v3157_v59  ;;  %v3167_v19 = vld [vmem:[%s5117_s10 + $0x88] sm:$0xff]  ;;  %v3166_v23 = vld [vmem:[%s5117_s10 + $0x80] sm:$0xff] }
 0x26e   : > { %v1979_v26 = vrot.slane %v1965_v10, 7  ;;  %v1944_v28 = vadd.f32 %v1934_v20, %v1871_v51  ;;  %2303 = vmatpush.msrb.mxu1 %v2225_v44  ;;  %v3152_v20 = vld [vmem:[%s5117_s10 + $0x40] sm:$0xff] }
 0x26f   : > { %2351 = vmatpush.msra.mxu2 %v3170_v61  ;;  %2266 = vmatpush.msrb.mxu0 %v3156_v47  ;;  %v2420_v47 = vld [vmem:[%s5119_s12 + $0x50] sm:$0xff] }
 0x270   : > { %v1954_v21 = vadd.f32 %v4571_v38, %v1944_v28  ;;  %v1980_v31 = vsel %vm1742_vm4, %v1977_v7, %v1979_v26  ;;  %v3169_v7 = vld [vmem:[%s5117_s10 + $0x98] sm:$0xff] }
 0x271   : > { %v2013_v4 = vrot.slane %v1980_v31, 1  ;;  %3135 = vmatmul.msk.f32.gmra.mxu2 %vm2019_vm8, %v1980_v31  ;;  %v2128_v33 = vrot.slane %v1980_v31, 2  ;;  %2267 = vmatpush.msrb.mxu0 %v3155_v13  ;;  %v2419_v13 = vld [vmem:[%s5119_s12 + $0x48] sm:$0xff] }
 0x272   : > { %v1960_v2 = vmax.f32 %v1954_v21, 0.0  ;;  %2352 = vmatpush.msra.mxu2 %v3169_v7 }
 0x273   : > { %v1873_v36 = vpop.f32.mrf.mxu3  ;;  %v2014_v16 = vsel %vm1770_vm5, %v2011_v62, %v2013_v4  ;;  %v2129_v30 = vsel %vm1881_vm6, %v2126_v12, %v2128_v33  ;;  %2268 = vmatpush.msrb.mxu0 %v3154_v41  ;;  %v2224_v12 = vld [vmem:[%s5117_s10 + $0x8] sm:$0xff] }
 0x274   : > { %v1966_v17 = vmul.f32 %v1960_v2, %v4467_v55  ;;  %v1874_v40 = vadd.f32 %v1873_v36, %v4563_v5  ;;  %3128 = vmatmul.msk.f32.gmra.mxu1 %vm2019_vm8, %v2014_v16  ;;  %3148 = vmatmul.msk.f32.gmra.mxu3 %vm2019_vm8, %v2129_v30 }
 0x275   : > { %2353 = vmatpush.msra.mxu2 %v3168_v60  ;;  %2269 = vmatpush.msrb.mxu0 %v3153_v0 }
 0x276   : > { %v1981_v14 = vrot.slane %v1966_v17, 7  ;;  %v1945_v43 = vadd.f32 %v1937_v42, %v1874_v40  ;;  %2304 = vmatpush.msrb.mxu1 %v2224_v12 }
 0x277   : > { %2354 = vmatpush.msra.mxu2 %v3167_v19  ;;  %2270 = vmatpush.msrb.mxu0 %v3152_v20 }
 0x278   : > { %v1955_v58 = vadd.f32 %v4571_v38, %v1945_v43  ;;  %v1982_v24 = vsel %vm1742_vm4, %v1979_v26, %v1981_v14  ;;  %2305 = vmatpush.msrb.mxu1 %v2223_v22  ;;  %v4695_v26 = vld [vmem:[#allocation15] ss:$0 sm:$0xff] }
 0x279   : > { %v2015_v25 = vrot.slane %v1982_v24, 1  ;;  %3136 = vmatmul.msk.f32.gmra.mxu2 %vm2019_vm8, %v1982_v24  ;;  %v2130_v45 = vrot.slane %v1982_v24, 2 }
 0x27a   : > { %v1961_v8 = vmax.f32 %v1955_v58, 0.0  ;;  %2355 = vmatpush.msra.mxu2 %v3166_v23 }
 0x27b   : > { %v2016_v9 = vsel %vm1770_vm5, %v2013_v4, %v2015_v25  ;;  %v2131_v5 = vsel %vm1881_vm6, %v2128_v33, %v2130_v45 }
 0x27c   : > { %v1967_v27 = vmul.f32 %v1961_v8, %v4471_v54  ;;  %3129 = vmatmul.msk.f32.gmra.mxu1 %vm2019_vm8, %v2016_v9  ;;  %3149 = vmatmul.msk.f32.gmra.mxu3 %vm2019_vm8, %v2131_v5 }
 0x27e   : > { %v1983_v46 = vrot.slane %v1967_v27, 7 }
 0x280   : > { %v1984_v38 = vsel %vm1742_vm4, %v1981_v14, %v1983_v46 }
 0x281   : > { %v1988_v50 = vsel %vm1757_vm7, %v1984_v38, 0.0 }
 0x282   : > { %v2017_v56 = vrot.slane %v1988_v50, 1  ;;  %3137 = vmatmul.msk.f32.gmra.mxu2 %vm2019_vm8, %v1988_v50  ;;  %v2132_v32 = vrot.slane %v1988_v50, 2 }
 0x284   : > { %v2018_v18 = vsel %vm1770_vm5, %v2015_v25, %v2017_v56  ;;  %v2133_v35 = vsel %vm1881_vm6, %v2130_v45, %v2132_v32 }
 0x285   : > { %3130 = vmatmul.msk.f32.gmra.mxu1 %vm2019_vm8, %v2018_v18  ;;  %3150 = vmatmul.msk.f32.gmra.mxu3 %vm2019_vm8, %v2133_v35  ;;  %v2424_v35 = vld [vmem:[%s5119_s12 + $0x70] sm:$0xff] }
 0x28d   : > { %3131 = vmatmul.msk.f32.gmra.mxu1 %vm2019_vm8, %v2017_v56  ;;  %3151 = vmatmul.msk.f32.gmra.mxu3 %vm2019_vm8, %v2132_v32 }
 0x2dc   : > { %v2096_v62 = vpop.f32.mrf.mxu2 }
 0x2e1   : > { %v2049_v48 = vpop.f32.mrf.mxu1 }
 0x2e2   : > { %v2097_v10 = vadd.f32 %v2096_v62, %v2049_v48 }
 0x2e4   : > { %v2099_v51 = vpop.f32.mrf.mxu2 }
 0x2e7   : > { %v2163_v28 = vpop.f32.mrf.mxu3 }
 0x2e8   : > { %v2181_v21 = vadd.f32 %v2163_v28, %v2097_v10  ;;  %v2416_v28 = vld [vmem:[%s5119_s12 + $0x30] sm:$0xff] }
 0x2e9   : > { %v2052_v31 = vpop.f32.mrf.mxu1 }
 0x2ea   : > { %v2191_v4 = vadd.f32 %v4695_v26, %v2181_v21  ;;  %v2100_v36 = vadd.f32 %v2099_v51, %v2052_v31  ;;  %v2418_v51 = vld [vmem:[%s5119_s12 + $0x40] sm:$0xff]  ;;  %v3190_v21 = vld [vmem:[%s5119_s12 + $0xe8] sm:$0xff] }
 0x2eb   : > { %v2415_v31 = vld [vmem:[%s5119_s12 + $0x28] sm:$0xff] }
 0x2ec   : > { %v2197_v33 = vmax.f32 %v2191_v4, 0.0  ;;  %v2102_v30 = vpop.f32.mrf.mxu2  ;;  %v3211_v4 = vld [vmem:[%s5119_s12 + $0x178] sm:$0xff] }
 0x2ed   : > { %2530 = vmatpush.msra.mxu1 %v3211_v4 }
 0x2ee   : > { %v2203_v2 = vmul.f32 %v2197_v33, %v4387_v29  ;;  %v2414_v33 = vld [vmem:[%s5119_s12 + $0x20] sm:$0xff] }
 0x2ef   : > { %v2166_v16 = vpop.f32.mrf.mxu3 }
 0x2f0   : > { %2211 = vst.msk [vmem:[#allocation4 + $0x1] sm:$0xff] %vm2019_vm8, %v2203_v2  ;;  %v2182_v17 = vadd.f32 %v2166_v16, %v2100_v36  ;;  %v3210_v2 = vld [vmem:[%s5119_s12 + $0x170] sm:$0xff]  ;;  %v2413_v36 = vld [vmem:[%s5119_s12 + $0x18] sm:$0xff]  ;;  %v3209_v16 = vld [vmem:[%s5119_s12 + $0x168] sm:$0xff] }
 0x2f1   : > { %v2055_v40 = vpop.f32.mrf.mxu1  ;;  %2531 = vmatpush.msra.mxu1 %v3210_v2 }
 0x2f2   : > { %v2192_v42 = vadd.f32 %v4695_v26, %v2182_v17  ;;  %v2103_v58 = vadd.f32 %v2102_v30, %v2055_v40  ;;  %v3189_v30 = vld [vmem:[%s5119_s12 + $0xe0] sm:$0xff]  ;;  %v2412_v17 = vld [vmem:[%s5119_s12 + $0x10] sm:$0xff] }
 0x2f3   : > { %2532 = vmatpush.msra.mxu1 %v3209_v16  ;;  %v3208_v40 = vld [vmem:[%s5119_s12 + $0x160] sm:$0xff] }
 0x2f4   : > { %v2198_v14 = vmax.f32 %v2192_v42, 0.0  ;;  %v2105_v8 = vpop.f32.mrf.mxu2  ;;  %v3188_v42 = vld [vmem:[%s5119_s12 + $0xd8] sm:$0xff] }
 0x2f5   : > { %2533 = vmatpush.msra.mxu1 %v3208_v40 }
 0x2f6   : > { %v2204_v43 = vmul.f32 %v2198_v14, %v4395_v49  ;;  %v2411_v14 = vld [vmem:[%s5119_s12 + $0x8] sm:$0xff] }
 0x2f7   : > { %v2169_v24 = vpop.f32.mrf.mxu3 }
 0x2f8   : > { %2212 = vst.msk [vmem:[#allocation4 + $0x9] sm:$0xff] %vm2019_vm8, %v2204_v43  ;;  %v2183_v25 = vadd.f32 %v2169_v24, %v2103_v58  ;;  %v3207_v43 = vld [vmem:[%s5119_s12 + $0x158] sm:$0xff]  ;;  %v3187_v58 = vld [vmem:[%s5119_s12 + $0xd0] sm:$0xff]  ;;  %v2410_v24 = vld [vmem:[%s5119_s12] sm:$0xff] }
 0x2f9   : > { %v2058_v45 = vpop.f32.mrf.mxu1  ;;  %2534 = vmatpush.msra.mxu1 %v3207_v43 }
 0x2fa   : > { %v2193_v29 = vadd.f32 %v4695_v26, %v2183_v25  ;;  %v2106_v27 = vadd.f32 %v2105_v8, %v2058_v45  ;;  %v3206_v25 = vld [vmem:[%s5119_s12 + $0x150] sm:$0xff]  ;;  %v3186_v45 = vld [vmem:[%s5119_s12 + $0xc8] sm:$0xff] }
 0x2fb   : > { %2535 = vmatpush.msra.mxu1 %v3206_v25  ;;  %v3205_v8 = vld [vmem:[%s5119_s12 + $0x148] sm:$0xff] }
 0x2fc   : > { %v2199_v9 = vmax.f32 %v2193_v29, 0.0  ;;  %v2108_v57 = vpop.f32.mrf.mxu2  ;;  %v3185_v29 = vld [vmem:[%s5119_s12 + $0xc0] sm:$0xff] }
 0x2fd   : > { %2536 = vmatpush.msra.mxu1 %v3205_v8  ;;  %v3227_v8 = vld [vmem:[%s5121_s14 + $0xf8] sm:$0xff] }
 0x2fe   : > { %v2205_v5 = vmul.f32 %v2199_v9, %v4430_v37  ;;  %v2425_v37 = vld [vmem:[%s5119_s12 + $0x78] sm:$0xff]  ;;  %v3204_v9 = vld [vmem:[%s5119_s12 + $0x140] sm:$0xff]  ;;  %2609 = vmatpush.msrb.mxu2 %v3227_v8  ;;  %v2575_v8 = vld [vmem:[%s5121_s14 + $0x8] sm:$0xff] }
 0x2ff   : > { %v2172_v46 = vpop.f32.mrf.mxu3  ;;  %v2232_v38 = vld [vmem:[#allocation4 + $0x1] ss:$2 sm:$0xff]  ;;  %v2218_v50 = vld [vmem:[#allocation4] ss:$2 sm:$0xff]  ;;  %2479 = vmatpush.msra.mxu0 %v2425_v37  ;;  %2537 = vmatpush.msra.mxu1 %v3204_v9  ;;  %v3199_v37 = vld [vmem:[%s5119_s12 + $0x118] sm:$0xff] }
 0x300   : > { %v2317_v56 = vld [vmem:[#allocation4 + $0x2] ss:$2 sm:$0xff]  ;;  %2213 = vst.msk [vmem:[#allocation4 + $0x11] sm:$0xff] %vm2019_vm8, %v2205_v5  ;;  %v2184_v49 = vadd.f32 %v2172_v46, %v2106_v27  ;;  %3160 = vmatmul.msk.f32.vlgmr.msrb.gmra.mxu0 %vm2019_vm8, %v2232_v38  ;;  %3163 = vmatmul.msk.f32.vlgmr.msrb.gmra.mxu1 %vm2019_vm8, %v2218_v50  ;;  %v3184_v5 = vld [vmem:[%s5119_s12 + $0xb8] sm:$0xff] }
 0x301   : > { %3174 = vmatmul.msk.f32.vlgmr.msra.gmra.mxu2 %vm2019_vm8, %v2317_v56  ;;  %2480 = vmatpush.msra.mxu0 %v2424_v35  ;;  %v3203_v27 = vld [vmem:[%s5119_s12 + $0x138] sm:$0xff]  ;;  %v3183_v46 = vld [vmem:[%s5119_s12 + $0xb0] sm:$0xff]  ;;  %v3182_v50 = vld [vmem:[%s5119_s12 + $0xa8] sm:$0xff] }
 0x302   : > { %v2194_v32 = vadd.f32 %v4695_v26, %v2184_v49  ;;  %v2061_v18 = vpop.f32.mrf.mxu1  ;;  %2538 = vmatpush.msra.mxu1 %v3203_v27  ;;  %v3202_v38 = vld [vmem:[%s5119_s12 + $0x130] sm:$0xff]  ;;  %v3201_v56 = vld [vmem:[%s5119_s12 + $0x128] sm:$0xff]  ;;  %v3181_v49 = vld [vmem:[%s5119_s12 + $0xa0] sm:$0xff] }
 0x303   : > { %v2109_v3 = vadd.f32 %v2108_v57, %v2061_v18  ;;  %2481 = vmatpush.msra.mxu0 %v2423_v39  ;;  %v3180_v18 = vld [vmem:[%s5119_s12 + $0x98] sm:$0xff]  ;;  %v3179_v35 = vld [vmem:[%s5119_s12 + $0x90] sm:$0xff]  ;;  %v3197_v39 = vld [vmem:[%s5119_s12 + $0x108] sm:$0xff] }
 0x304   : > { %v2200_v53 = vmax.f32 %v2194_v32, 0.0  ;;  %2539 = vmatpush.msra.mxu1 %v3202_v38  ;;  %v3200_v32 = vld [vmem:[%s5119_s12 + $0x120] sm:$0xff]  ;;  %v3198_v57 = vld [vmem:[%s5119_s12 + $0x110] sm:$0xff]  ;;  %v3243_v9 = vld [vmem:[%s5121_s14 + $0x178] sm:$0xff] }
 0x305   : > { %2482 = vmatpush.msra.mxu0 %v2422_v63  ;;  %v2111_v7 = vpop.f32.mrf.mxu2  ;;  %v3177_v63 = vld [vmem:[%s5119_s12 + $0x80] sm:$0xff]  ;;  %v3226_v27 = vld [vmem:[%s5121_s14 + $0xf0] sm:$0xff] }
 0x306   : > { %v2206_v6 = vmul.f32 %v2200_v53, %v4453_v1  ;;  %2540 = vmatpush.msra.mxu1 %v3201_v56  ;;  %v3178_v53 = vld [vmem:[%s5119_s12 + $0x88] sm:$0xff]  ;;  %v3242_v38 = vld [vmem:[%s5121_s14 + $0x170] sm:$0xff]  ;;  %2610 = vmatpush.msrb.mxu2 %v3226_v27  ;;  %v3212_v27 = vld [vmem:[%s5121_s14 + $0x80] sm:$0xff] }
 0x307   : > { %2483 = vmatpush.msra.mxu0 %v2421_v52  ;;  %v3430_v52 = vld [vmem:[#allocation17] ss:$0 sm:$0xff] }
 0x308   : > { %2214 = vst.msk [vmem:[#allocation4 + $0x19] sm:$0xff] %vm2019_vm8, %v2206_v6  ;;  %v2175_v59 = vpop.f32.mrf.mxu3  ;;  %2541 = vmatpush.msra.mxu1 %v3200_v32  ;;  %v3225_v56 = vld [vmem:[%s5121_s14 + $0xe8] sm:$0xff] }
 0x309   : > { %v2185_v61 = vadd.f32 %v2175_v59, %v2109_v3  ;;  %2484 = vmatpush.msra.mxu0 %v2420_v47  ;;  %v3196_v3 = vld [vmem:[%s5119_s12 + $0x100] sm:$0xff]  ;;  %v3241_v32 = vld [vmem:[%s5121_s14 + $0x168] sm:$0xff]  ;;  %2611 = vmatpush.msrb.mxu2 %v3225_v56 }
 0x30a   : > { %v2064_v11 = vpop.f32.mrf.mxu1  ;;  %2542 = vmatpush.msra.mxu1 %v3199_v37  ;;  %v3224_v37 = vld [vmem:[%s5121_s14 + $0xe0] sm:$0xff] }
 0x30b   : > { %v2195_v1 = vadd.f32 %v4695_v26, %v2185_v61  ;;  %v2112_v44 = vadd.f32 %v2111_v7, %v2064_v11  ;;  %2485 = vmatpush.msra.mxu0 %v2419_v13  ;;  %v2382_v13 = vpop.permute.xlu2 %2381  ;;  %2612 = vmatpush.msrb.mxu2 %v3224_v37 }
 0x30c   : > { %2543 = vmatpush.msra.mxu1 %v3198_v57  ;;  %v3240_v57 = vld [vmem:[%s5121_s14 + $0x160] sm:$0xff] }
 0x30d   : > { %v2201_v34 = vmax.f32 %v2195_v1, 0.0  ;;  %2486 = vmatpush.msra.mxu0 %v2418_v51 }
 0x30e   : > { %2544 = vmatpush.msra.mxu1 %v3197_v39  ;;  %v3223_v39 = vld [vmem:[%s5121_s14 + $0xd8] sm:$0xff] }
 0x30f   : > { %v2207_v41 = vmul.f32 %v2201_v34, %v4467_v55  ;;  %v2234_v60 = vld [vmem:[#allocation4 + $0x11] ss:$2 sm:$0xff]  ;;  %v2220_v62 = vld [vmem:[#allocation4 + $0x10] ss:$2 sm:$0xff]  ;;  %2613 = vmatpush.msrb.mxu2 %v3223_v39 }
 0x310   : > { %v2319_v0 = vld [vmem:[#allocation4 + $0x12] ss:$2 sm:$0xff]  ;;  %v2178_v12 = vpop.f32.mrf.mxu3  ;;  %3161 = vmatmul.msk.f32.gmra.mxu0 %vm2019_vm8, %v2234_v60  ;;  %3164 = vmatmul.msk.f32.gmra.mxu1 %vm2019_vm8, %v2220_v62 }
 0x311   : > { %2215 = vst.msk [vmem:[#allocation4 + $0x21] sm:$0xff] %vm2019_vm8, %v2207_v41  ;;  %v2186_v19 = vadd.f32 %v2178_v12, %v2112_v44  ;;  %3175 = vmatmul.msk.f32.gmra.mxu2 %vm2019_vm8, %v2319_v0  ;;  %2545 = vmatpush.msra.mxu1 %v3196_v3  ;;  %v3222_v3 = vld [vmem:[%s5121_s14 + $0xd0] sm:$0xff] }
 0x312   : > { %2614 = vmatpush.msrb.mxu2 %v3222_v3 }
 0x313   : > { %v2196_v20 = vadd.f32 %v4695_v26, %v2186_v19  ;;  %v3191_v26 = vld [vmem:[%s5119_s12 + $0xf0] sm:$0xff] }
 0x314   : > { %2454 = vmatpush.msrb.mxu3 %v3191_v26 }
 0x315   : > { %v2202_v22 = vmax.f32 %v2196_v20, 0.0  ;;  %v2387_v20 = vpop.permute.xlu0 %2386 }
 0x316   : > { %2455 = vmatpush.msrb.mxu3 %v3190_v21 }
 0x317   : > { %v2208_v55 = vmul.f32 %v2202_v22, %v4471_v54  ;;  %v2417_v54 = vld [vmem:[%s5119_s12 + $0x38] sm:$0xff] }
 0x318   : > { %2487 = vmatpush.msra.mxu0 %v2417_v54  ;;  %2456 = vmatpush.msrb.mxu3 %v3189_v30 }
 0x319   : > { %2217 = vst.msk [vmem:[#allocation4 + $0x29] sm:$0xf] %vm2216_vm10, %v2208_v55 }
 0x31a   : > { %2488 = vmatpush.msra.mxu0 %v2416_v28  ;;  %2457 = vmatpush.msrb.mxu3 %v3188_v42 }
 0x31c   : > { %2489 = vmatpush.msra.mxu0 %v2415_v31  ;;  %2458 = vmatpush.msrb.mxu3 %v3187_v58 }
 0x31e   : > { %2490 = vmatpush.msra.mxu0 %v2414_v33  ;;  %2459 = vmatpush.msrb.mxu3 %v3186_v45 }
 0x320   : > { %v2236_v23 = vld [vmem:[#allocation4 + $0x21] ss:$2 sm:$0x3f]  ;;  %v2222_v48 = vld [vmem:[#allocation4 + $0x20] ss:$2 sm:$0x3f]  ;;  %2491 = vmatpush.msra.mxu0 %v2413_v36  ;;  %2460 = vmatpush.msrb.mxu3 %v3185_v29 }
 0x321   : > { %3162 = vmatmul.msk.f32.gmra.mxu0 %vm2019_vm8, %v2236_v23  ;;  %3165 = vmatmul.msk.f32.gmra.mxu1 %vm2019_vm8, %v2222_v48  ;;  %v2321_v10 = vld [vmem:[#allocation4 + $0x22] ss:$2 sm:$0x3f]  ;;  %v2589_v29 = vld [vmem:[%s5121_s14 + $0x78] sm:$0xff] }
 0x322   : > { %3176 = vmatmul.msk.f32.gmra.mxu2 %vm2019_vm8, %v2321_v10  ;;  %2492 = vmatpush.msra.mxu0 %v2412_v17  ;;  %v2392_v17 = vpop.permute.xlu1 %2391 }
 0x323   : > { %2461 = vmatpush.msrb.mxu3 %v3184_v5  ;;  %v3259_v5 = vld [vmem:[%s5121_s14 + $0x1f8] sm:$0xff] }
 0x324   : > { %2493 = vmatpush.msra.mxu0 %v2411_v14  ;;  %2708 = vmatpush.msrb.mxu1 %v3259_v5 }
 0x325   : > { %2462 = vmatpush.msrb.mxu3 %v3183_v46  ;;  %v2588_v46 = vld [vmem:[%s5121_s14 + $0x70] sm:$0xff] }
 0x326   : > { %2494 = vmatpush.msra.mxu0 %v2410_v24 }
 0x327   : > { %2463 = vmatpush.msrb.mxu3 %v3182_v50  ;;  %v3258_v50 = vld [vmem:[%s5121_s14 + $0x1f0] sm:$0xff] }
 0x328   : > { %2668 = vmatpush.msrb.mxu0 %v3243_v9  ;;  %2709 = vmatpush.msrb.mxu1 %v3258_v50  ;;  %v3245_v9 = vld [vmem:[%s5121_s14 + $0x188] sm:$0xff]  ;;  %v3244_v50 = vld [vmem:[%s5121_s14 + $0x180] sm:$0xff] }
 0x329   : > { %2464 = vmatpush.msrb.mxu3 %v3181_v49  ;;  %v2587_v49 = vld [vmem:[%s5121_s14 + $0x68] sm:$0xff] }
 0x32a   : > { %2669 = vmatpush.msrb.mxu0 %v3242_v38  ;;  %v3228_v38 = vld [vmem:[%s5121_s14 + $0x100] sm:$0xff] }
 0x32b   : > { %2465 = vmatpush.msrb.mxu3 %v3180_v18  ;;  %v3257_v18 = vld [vmem:[%s5121_s14 + $0x1e8] sm:$0xff] }
 0x32c   : > { %2670 = vmatpush.msrb.mxu0 %v3241_v32  ;;  %2710 = vmatpush.msrb.mxu1 %v3257_v18 }
 0x32d   : > { %2466 = vmatpush.msrb.mxu3 %v3179_v35  ;;  %v2586_v35 = vld [vmem:[%s5121_s14 + $0x60] sm:$0xff] }
 0x32e   : > { %2671 = vmatpush.msrb.mxu0 %v3240_v57 }
 0x32f   : > { %2467 = vmatpush.msrb.mxu3 %v3178_v53  ;;  %v3256_v53 = vld [vmem:[%s5121_s14 + $0x1e0] sm:$0xff] }
 0x330   : > { %2711 = vmatpush.msrb.mxu1 %v3256_v53 }
 0x331   : > { %2468 = vmatpush.msrb.mxu3 %v3177_v63  ;;  %v3255_v63 = vld [vmem:[%s5121_s14 + $0x1d8] sm:$0xff] }
 0x332   : > { %2712 = vmatpush.msrb.mxu1 %v3255_v63 }
 0x333   : > { %2629 = vmatpush.msra.mxu3 %v2589_v29  ;;  %v3229_v29 = vld [vmem:[%s5121_s14 + $0x108] sm:$0xff] }
 0x335   : > { %2630 = vmatpush.msra.mxu3 %v2588_v46  ;;  %v2574_v46 = vld [vmem:[%s5121_s14] sm:$0xff] }
 0x337   : > { %2631 = vmatpush.msra.mxu3 %v2587_v49 }
 0x339   : > { %2632 = vmatpush.msra.mxu3 %v2586_v35 }
 0x37d   : > { %v2272_v15 = vpop.f32.mrf.mxu0  ;;  %v2307_v6 = vpop.f32.mrf.mxu1 }
 0x37e   : > { %v2308_v59 = vadd.f32 %v2307_v6, %v2272_v15  ;;  %v2585_v15 = vld [vmem:[%s5121_s14 + $0x58] sm:$0xff] }
 0x37f   : > { %v3239_v6 = vld [vmem:[%s5121_s14 + $0x158] sm:$0xff]  ;;  %2633 = vmatpush.msra.mxu3 %v2585_v15 }
 0x380   : > { %2672 = vmatpush.msrb.mxu0 %v3239_v6 }
 0x384   : > { %v2357_v61 = vpop.f32.mrf.mxu2 }
 0x385   : > { %v2366_v47 = vadd.f32 %v2357_v61, %v2308_v59  ;;  %v2584_v59 = vld [vmem:[%s5121_s14 + $0x50] sm:$0xff] }
 0x386   : > { %2634 = vmatpush.msra.mxu3 %v2584_v59  ;;  %v3254_v61 = vld [vmem:[%s5121_s14 + $0x1d0] sm:$0xff] }
 0x387   : > { %v2373_v1 = vadd.f32 %v3430_v52, %v2366_v47  ;;  %2713 = vmatpush.msrb.mxu1 %v3254_v61  ;;  %v3221_v47 = vld [vmem:[%s5121_s14 + $0xc8] sm:$0xff] }
 0x388   : > { %2615 = vmatpush.msrb.mxu2 %v3221_v47 }
 0x389   : > { %v2376_v11 = vmax.f32 %v2373_v1, 0.0  ;;  %v2583_v1 = vld [vmem:[%s5121_s14 + $0x48] sm:$0xff] }
 0x38a   : > { %2635 = vmatpush.msra.mxu3 %v2583_v1 }
 0x38b   : > { %v2394_v34 = vmul.f32 %v2382_v13, %v2376_v11  ;;  %v3237_v11 = vld [vmem:[%s5121_s14 + $0x148] sm:$0xff] }
 0x38c   : > { %v3253_v13 = vld [vmem:[%s5121_s14 + $0x1c8] sm:$0xff] }
 0x38d   : > { %v2400_v7 = vrot.slane %v2394_v34, 7  ;;  %v2275_v41 = vpop.f32.mrf.mxu0  ;;  %v2310_v44 = vpop.f32.mrf.mxu1  ;;  %2714 = vmatpush.msrb.mxu1 %v3253_v13  ;;  %v3220_v34 = vld [vmem:[%s5121_s14 + $0xc0] sm:$0xff] }
 0x38e   : > { %v2311_v60 = vadd.f32 %v2310_v44, %v2275_v41  ;;  %v3236_v41 = vld [vmem:[%s5121_s14 + $0x140] sm:$0xff]  ;;  %2616 = vmatpush.msrb.mxu2 %v3220_v34 }
 0x38f   : > { %3194 = vmatmul.msk.f32.vlgmr.msra.gmra.mxu0 %vm3193_vm11, %v2400_v7  ;;  %v2408_v55 = vsel %vm1742_vm4, 0.0, %v2400_v7  ;;  %v3252_v44 = vld [vmem:[%s5121_s14 + $0x1c0] sm:$0xff] }
 0x390   : > { %v2445_v26 = vrot.slane %v2408_v55, 1  ;;  %v2522_v54 = vrot.slane %v2408_v55, 2  ;;  %2715 = vmatpush.msrb.mxu1 %v3252_v44  ;;  %v3250_v55 = vld [vmem:[%s5121_s14 + $0x1b0] sm:$0xff]  ;;  %v2741_v13 = vld [vmem:[#allocation21 + $0x30] sm:$0xff]  ;;  %v2740_v34 = vld [vmem:[#allocation21 + $0x28] sm:$0xff] }
 0x391   : > { %v2737_v44 = vld [vmem:[#allocation21 + $0x10] sm:$0xff] }
 0x394   : > { %v2360_v62 = vpop.f32.mrf.mxu2 }
 0x395   : > { %v2367_v0 = vadd.f32 %v2360_v62, %v2311_v60  ;;  %v3219_v60 = vld [vmem:[%s5121_s14 + $0xb8] sm:$0xff] }
 0x396   : > { %v2581_v62 = vld [vmem:[%s5121_s14 + $0x38] sm:$0xff]  ;;  %2617 = vmatpush.msrb.mxu2 %v3219_v60 }
 0x397   : > { %v2374_v12 = vadd.f32 %v3430_v52, %v2367_v0  ;;  %v3235_v0 = vld [vmem:[%s5121_s14 + $0x138] sm:$0xff] }
 0x398   : > { %v2736_v60 = vld [vmem:[#allocation21 + $0x8] sm:$0xff] }
 0x399   : > { %v2377_v19 = vmax.f32 %v2374_v12, 0.0  ;;  %v3251_v12 = vld [vmem:[%s5121_s14 + $0x1b8] sm:$0xff] }
 0x39a   : > { %2716 = vmatpush.msrb.mxu1 %v3251_v12 }
 0x39b   : > { %v2395_v22 = vmul.f32 %v2387_v20, %v2377_v19  ;;  %v3218_v19 = vld [vmem:[%s5121_s14 + $0xb0] sm:$0xff] }
 0x39c   : > { %v2580_v20 = vld [vmem:[%s5121_s14 + $0x30] sm:$0xff]  ;;  %2618 = vmatpush.msrb.mxu2 %v3218_v19  ;;  %2717 = vmatpush.msrb.mxu1 %v3250_v55 }
 0x39d   : > { %v2401_v23 = vrot.slane %v2395_v22, 7  ;;  %v3234_v22 = vld [vmem:[%s5121_s14 + $0x130] sm:$0xff] }
 0x39e   : > { %v2278_v28 = vpop.f32.mrf.mxu0  ;;  %v2313_v21 = vpop.f32.mrf.mxu1  ;;  %v3432_v55 = vld [vmem:[#allocation20] ss:$0 sm:$0xff] }
 0x39f   : > { %v2402_v48 = vsel %vm1742_vm4, %v2400_v7, %v2401_v23  ;;  %v2314_v33 = vadd.f32 %v2313_v21, %v2278_v28  ;;  %v2582_v7 = vld [vmem:[%s5121_s14 + $0x40] sm:$0xff]  ;;  %v3249_v28 = vld [vmem:[%s5121_s14 + $0x1a8] sm:$0xff] }
 0x3a0   : > { %v2446_v10 = vrot.slane %v2402_v48, 1  ;;  %2498 = vmatmul.f32.gmra.mxu0 %v2402_v48  ;;  %v2523_v51 = vrot.slane %v2402_v48, 2  ;;  %2636 = vmatpush.msra.mxu3 %v2582_v7  ;;  %v2579_v48 = vld [vmem:[%s5121_s14 + $0x28] sm:$0xff]  ;;  %v2739_v7 = vld [vmem:[#allocation21 + $0x20] sm:$0xff] }
 0x3a1   : > { %2718 = vmatpush.msrb.mxu1 %v3249_v28 }
 0x3a2   : > { %v2447_v31 = vsel %vm1770_vm5, %v2445_v26, %v2446_v10  ;;  %v2524_v4 = vsel %vm1881_vm6, %v2522_v54, %v2523_v51  ;;  %2637 = vmatpush.msra.mxu3 %v2581_v62  ;;  %v5006_v54 = vld [vmem:[#allocation18] ss:$0 sm:$0xff]  ;;  %v2735_v62 = vld [vmem:[#allocation21] sm:$0xff] }
 0x3a3   : > { %2469 = vmatmul.f32.vlgmr.msrb.gmra.mxu3 %v2447_v31  ;;  %2546 = vmatmul.f32.vlgmr.msra.gmra.mxu1 %v2524_v4  ;;  %v3216_v31 = vld [vmem:[%s5121_s14 + $0xa0] sm:$0xff] }
 0x3a4   : > { %2638 = vmatpush.msra.mxu3 %v2580_v20  ;;  %v2578_v4 = vld [vmem:[%s5121_s14 + $0x20] sm:$0xff] }
 0x3a5   : > { %v2363_v2 = vpop.f32.mrf.mxu2 }
 0x3a6   : > { %v2368_v36 = vadd.f32 %v2363_v2, %v2314_v33  ;;  %2639 = vmatpush.msra.mxu3 %v2579_v48  ;;  %v3232_v33 = vld [vmem:[%s5121_s14 + $0x120] sm:$0xff] }
 0x3a8   : > { %v2375_v16 = vadd.f32 %v3430_v52, %v2368_v36  ;;  %v3238_v52 = vld [vmem:[%s5121_s14 + $0x150] sm:$0xff]  ;;  %2640 = vmatpush.msra.mxu3 %v2578_v4  ;;  %v3248_v36 = vld [vmem:[%s5121_s14 + $0x1a0] sm:$0xff] }
 0x3a9   : > { %2673 = vmatpush.msrb.mxu0 %v3238_v52  ;;  %2719 = vmatpush.msrb.mxu1 %v3248_v36 }
 0x3aa   : > { %v2378_v30 = vmax.f32 %v2375_v16, 0.0 }
 0x3ab   : > { %2674 = vmatpush.msrb.mxu0 %v3237_v11  ;;  %v2742_v11 = vld [vmem:[#allocation21 + $0x38] sm:$0xff] }
 0x3ac   : > { %v2396_v40 = vmul.f32 %v2392_v17, %v2378_v30  ;;  %v3215_v30 = vld [vmem:[%s5121_s14 + $0x98] sm:$0xff] }
 0x3ad   : > { %2675 = vmatpush.msrb.mxu0 %v3236_v41  ;;  %v2577_v17 = vld [vmem:[%s5121_s14 + $0x18] sm:$0xff]  ;;  %v2738_v41 = vld [vmem:[#allocation21 + $0x18] sm:$0xff] }
 0x3ae   : > { %v2403_v42 = vrot.slane %v2396_v40, 7  ;;  %v3231_v40 = vld [vmem:[%s5121_s14 + $0x118] sm:$0xff]  ;;  %2641 = vmatpush.msra.mxu3 %v2577_v17 }
 0x3af   : > { %2676 = vmatpush.msrb.mxu0 %v3235_v0 }
 0x3b0   : > { %v2404_v14 = vsel %vm1742_vm4, %v2401_v23, %v2403_v42  ;;  %v3217_v23 = vld [vmem:[%s5121_s14 + $0xa8] sm:$0xff]  ;;  %v3247_v42 = vld [vmem:[%s5121_s14 + $0x198] sm:$0xff] }
 0x3b1   : > { %v2409_v43 = vsel %vm1770_vm5, %v2404_v14, 0.0  ;;  %3195 = vmatmul.msk.f32.gmra.mxu0 %vm1770_vm5, %v2404_v14  ;;  %2619 = vmatpush.msrb.mxu2 %v3217_v23  ;;  %v3214_v14 = vld [vmem:[%s5121_s14 + $0x90] sm:$0xff] }
 0x3b2   : > { %v2448_v58 = vrot.slane %v2409_v43, 1  ;;  %v2525_v24 = vrot.slane %v2409_v43, 2  ;;  %2677 = vmatpush.msrb.mxu0 %v3234_v22  ;;  %v2576_v43 = vld [vmem:[%s5121_s14 + $0x10] sm:$0xff]  ;;  %2720 = vmatpush.msrb.mxu1 %v3247_v42 }
 0x3b3   : > { %2620 = vmatpush.msrb.mxu2 %v3216_v31  ;;  %2642 = vmatpush.msra.mxu3 %v2576_v43 }
 0x3b4   : > { %v2449_v25 = vsel %vm1770_vm5, %v2446_v10, %v2448_v58  ;;  %v2526_v45 = vsel %vm1881_vm6, %v2523_v51, %v2525_v24  ;;  %v3233_v10 = vld [vmem:[%s5121_s14 + $0x128] sm:$0xff] }
 0x3b5   : > { %2472 = vmatmul.f32.gmra.mxu3 %v2449_v25  ;;  %2549 = vmatmul.f32.gmra.mxu1 %v2526_v45  ;;  %v3246_v25 = vld [vmem:[%s5121_s14 + $0x190] sm:$0xff]  ;;  %v3213_v45 = vld [vmem:[%s5121_s14 + $0x88] sm:$0xff] }
 0x3b6   : > { %2678 = vmatpush.msrb.mxu0 %v3233_v10  ;;  %2621 = vmatpush.msrb.mxu2 %v3215_v30 }
 0x3b7   : > { %2721 = vmatpush.msrb.mxu1 %v3246_v25  ;;  %2643 = vmatpush.msra.mxu3 %v2575_v8 }
 0x3b8   : > { %2679 = vmatpush.msrb.mxu0 %v3232_v33  ;;  %2622 = vmatpush.msrb.mxu2 %v3214_v14 }
 0x3b9   : > { %2722 = vmatpush.msrb.mxu1 %v3245_v9  ;;  %2644 = vmatpush.msra.mxu3 %v2574_v46 }
 0x3ba   : > { %2680 = vmatpush.msrb.mxu0 %v3231_v40  ;;  %2623 = vmatpush.msrb.mxu2 %v3213_v45 }
 0x3bb   : > { %2723 = vmatpush.msrb.mxu1 %v3244_v50 }
 0x3bc   : > { %2624 = vmatpush.msrb.mxu2 %v3212_v27 }
 0x3bd   : > { %2475 = vmatmul.f32.gmra.mxu3 %v2448_v58  ;;  %2552 = vmatmul.f32.gmra.mxu1 %v2525_v24  ;;  %v3230_v24 = vld [vmem:[%s5121_s14 + $0x110] sm:$0xff] }
 0x3be   : > { %2681 = vmatpush.msrb.mxu0 %v3230_v24  ;;  %2758 = vmatpush.msra.mxu2 %v2742_v11 }
 0x3c0   : > { %2682 = vmatpush.msrb.mxu0 %v3229_v29  ;;  %2759 = vmatpush.msra.mxu2 %v2741_v13 }
 0x3c2   : > { %2683 = vmatpush.msrb.mxu0 %v3228_v38  ;;  %2760 = vmatpush.msra.mxu2 %v2740_v34 }
 0x3c4   : > { %2761 = vmatpush.msra.mxu2 %v2739_v7 }
 0x3c6   : > { %2762 = vmatpush.msra.mxu2 %v2738_v41 }
 0x3c8   : > { %2763 = vmatpush.msra.mxu2 %v2737_v44 }
 0x3ca   : > { %2764 = vmatpush.msra.mxu2 %v2736_v60 }
 0x3cc   : > { %2765 = vmatpush.msra.mxu2 %v2735_v62 }
 0x40c   : > { %v2496_v51 = vpop.f32.mrf.mxu0 }
 0x41d   : > { %v2499_v56 = vpop.f32.mrf.mxu0 }
 0x420   : > { %v2547_v2 = vpop.f32.mrf.mxu1 }
 0x426   : > { %v2470_v26 = vpop.f32.mrf.mxu3 }
 0x427   : > { %v2497_v21 = vadd.f32 %v2496_v51, %v2470_v26  ;;  %v3433_v26 = vld [vmem:[#allocation23] ss:$0 sm:$0xff] }
 0x429   : > { %v2556_v16 = vadd.f32 %v2547_v2, %v2497_v21 }
 0x42b   : > { %v2563_v58 = vadd.f32 %v5006_v54, %v2556_v16 }
 0x42d   : > { %v2566_v5 = vmax.f32 %v2563_v58, 0.0 }
 0x42e   : > { %v2502_v53 = vpop.f32.mrf.mxu0 }
 0x42f   : > { %2569 = vst [vmem:[#allocation5 + $0x1] sm:$0xff] %v2566_v5 }
 0x432   : > { %v2550_v49 = vpop.f32.mrf.mxu1 }
 0x438   : > { %v2473_v32 = vpop.f32.mrf.mxu3 }
 0x439   : > { %v2500_v18 = vadd.f32 %v2499_v56, %v2473_v32 }
 0x43a   : > { %v2553_v6 = vpop.f32.mrf.mxu1 }
 0x43b   : > { %v2557_v37 = vadd.f32 %v2550_v49, %v2500_v18 }
 0x43d   : > { %v2564_v35 = vadd.f32 %v5006_v54, %v2557_v37 }
 0x43f   : > { %v2567_v57 = vmax.f32 %v2564_v35, 0.0 }
 0x440   : > { %v2476_v39 = vpop.f32.mrf.mxu3 }
 0x441   : > { %2570 = vst [vmem:[#allocation5 + $0x9] sm:$0xff] %v2567_v57  ;;  %v2503_v15 = vadd.f32 %v2502_v53, %v2476_v39 }
 0x443   : > { %v2558_v63 = vadd.f32 %v2553_v6, %v2503_v15 }
 0x445   : > { %v2565_v3 = vadd.f32 %v5006_v54, %v2558_v63 }
 0x447   : > { %v2568_v59 = vmax.f32 %v2565_v3, 0.0 }
 0x449   : > { %2571 = vst [vmem:[#allocation5 + $0x11] sm:$0x3f] %v2568_v59 }
 0x450   : > { %v2591_v52 = vld [vmem:[#allocation5 + $0x2] ss:$6 sm:$0xf]  ;;  %v2573_v61 = vld [vmem:[#allocation5 + $0x1] ss:$6 sm:$0xf] }
 0x451   : > { %2625 = vmatmul.f32.vlgmr.msrb.gmra.mxu2 %v2591_v52  ;;  %2645 = vmatmul.f32.vlgmr.msra.gmra.mxu3 %v2573_v61  ;;  %v2650_v47 = vld [vmem:[#allocation5 + $0x3] ss:$6 sm:$0xf]  ;;  %v2690_v1 = vld [vmem:[#allocation5 + $0x4] ss:$6 sm:$0xf] }
 0x452   : > { %2684 = vmatmul.f32.vlgmr.msrb.gmra.mxu0 %v2650_v47  ;;  %2724 = vmatmul.f32.vlgmr.msrb.gmra.mxu1 %v2690_v1 }
 0x4cf   : > { %v2685_v20 = vpop.f32.mrf.mxu0  ;;  %v2725_v23 = vpop.f32.mrf.mxu1 }
 0x4d4   : > { %v2626_v0 = vpop.f32.mrf.mxu2  ;;  %v2646_v12 = vpop.f32.mrf.mxu3 }
 0x4d5   : > { %v2647_v19 = vadd.f32 %v2646_v12, %v2626_v0 }
 0x4d7   : > { %v2688_v22 = vadd.f32 %v2685_v20, %v2647_v19 }
 0x4d9   : > { %v2728_v48 = vadd.f32 %v2725_v23, %v2688_v22 }
 0x4db   : > { %v2733_v10 = vadd.f32 %v3432_v55, %v2728_v48 }
 0x4dd   : > { %v2734_v51 = vmax.f32 %v2733_v10, 0.0 }
 0x4df   : > { %3260 = vmatmul.msk.f32.vlgmr.msra.gmra.mxu2 %vm2019_vm8, %v2734_v51 }
 0x562   : > { %v2767_v54 = vpop.f32.mrf.mxu2 }
 0x563   : > { %v2768_v28 = vadd.f32 %v3433_v26, %v2767_v54 }
 0x565   : > { %v2770_v21 = vsub.f32 0.0, %v2768_v28 }
 0x567   : > { %v2771_v31 = vmul.f32 1.442695, %v2770_v21 }
 0x569   : > { %3434 = vpow2.f32 %v2771_v31 }
 0x56f   : > { %v3435_v4 = vpop.eup %3434 }
 0x570   : > { %v2773_v33 = vadd.f32 1.0, %v3435_v4 }
 0x572   : > { %3436 = vrcp.f32 %v2773_v33  ;;  %v2785_v30 = vand.u32 2147483648, %v2773_v33  ;;  %v2783_v40 = vand.u32 2147483647, %v2773_v33  ;;  %vm2779_vm13 = vweird.f32 %v2773_v33 }
 0x574   : > { %v2786_v14 = vor.u32 1.1754944e-38, %v2785_v30  ;;  %vm2784_vm15 = vcmp.eq.f32.partialorder %v2783_v40, 8.507059e+37 }
 0x578   : > { %v3437_v2 = vpop.eup %3436 }
 0x579   : > { %v2775_v36 = vmul.f32 %v3437_v2, %v2773_v33  ;;  %vm2780_vm12 = vweird.f32 %v3437_v2 }
 0x57a   : > { %vm2781_vm14 = vmor %vm2779_vm13, %vm2780_vm12 }
 0x57b   : > { %v2776_v16 = vsub.f32 1.0, %v2775_v36 }
 0x57d   : > { %v2777_v17 = vmul.f32 %v3437_v2, %v2776_v16 }
 0x57f   : > { %v2778_v42 = vadd.f32 %v3437_v2, %v2777_v17 }
 0x581   : > { %v2782_v43 = vsel %vm2781_vm14, %v3437_v2, %v2778_v42 }
 0x582   : > { %v2787_v58 = vsel %vm2784_vm15, %v2786_v14, %v2782_v43 }
 0x583   : > { %2789 = vst [vmem:[%s739_s21] sm:$0xf] %v2787_v58 }
 0x584   : > { %3795 = shalt.err (!%p3792_p8)
}
 0x585   : > { %3312 = dma.vmem_to_hbm [thread:$0]  (%p4006_p5), %s2804_s4, 64, %s2806_s20, %s2791_s18  }
 0x586 PF: > { %s5168_s1 = sld [smem:[#allocation35_spill]] }
 0x587   : > { %s5169_s27 = sld [smem:[#allocation32_spill]] }
 0x58c   : > { %p3374_p9 = scmp.ge.s32.totalorder %s5168_s1, 2 }
 0x58d   : > { %s2817_s22 = sand.u32 1, %s5169_s27  }
 0x58e   : > { %p3349_p10 = pnand %p3374_p9, %p4010_p6  ;;  %s2818_s30 = scalar_lea.sflag [#allocation8], %s2817_s22 }
 0x590   : > { %p3350_p11 = pneg %p3349_p10 }
 0x592   : > { %3837 = dma.done.wait (%p3350_p11), %s2818_s30, 64  }
 0x593   : > { %3839 = vsyncadd (%p3350_p11), %s2818_s30, 4294967232  ;;  %s5171_s30 = sld [smem:[#allocation36_spill]] }
 0x594   : > { %s5172_s27 = sld [smem:[#allocation33_spill]] }
 0x595   : > { %s5173_s28 = sld [smem:[#allocation34_spill]] }
 0x596   : > { %s5174_s29 = sld [smem:[#allocation37_spill]] }
 0x599   : > { %p34_p12 = scmp.ge.s32.totalorder %s5171_s30, 4  }
 0x59b   :  { %36 = sbr.rel (!%p34_p12) target bundleno = 17 (0x11), region = 221 }
 0x5a0   :  { %2824 = vsyncpa [#allocation7], 1 }
 0x5a1   :  { %2826 = vsyncpa [#allocation7 + $0x1], 1 }
 0x5a2   :  { %2827 = vsyncpa [#allocation10], 1 }
 0x5a3   :  { %2828 = vsyncpa [#allocation13], 1 }
 0x5a4   :  { %2829 = vsyncpa [#allocation16], 1 }
 0x5a5   :  { %2830 = vsyncpa [#allocation19], 1 }
 0x5a6   :  { %2831 = vsyncpa [#allocation22], 1 }
 0x5a7   :  { %2832 = vsyncpa [#allocation8], 1 }
 0x5a8   :  { %2834 = vsyncpa [#allocation8 + $0x1], 1 }

</bundles_post_ra>
